<compile_context>
chip_gen: v5e
topology: v5e:2x2
jax: 0.10.0
libtpu: 0.0.40
codegen_flags: <defaults>
</compile_context>

<pallas_src>
import jax
import jax.numpy as jnp
from jax import lax
from jax.experimental import pallas as pl
from jax.experimental.pallas import tpu as pltpu


# ----------------------------------------------------------------------------
# Fully fused kernel: CNN -> BiLSTM stack -> attention -> FC head.
# ----------------------------------------------------------------------------
def make_fused_kernel(B, L, Cin, C1, C2, H, num_layers, F1, NC):
    T = L // 4

    def kernel(*refs):
        it = iter(refs)
        # ---- inputs ----
        x_ref = next(it)                       # (B, L, Cin) channels-last input
        cw1_ref = next(it)                     # (3, Cin, C1) conv1 taps (tap, in, out)
        cb1_ref = next(it)                     # (1, C1)
        cw2_ref = next(it)                     # (3, C1, C2)
        cb2_ref = next(it)                     # (1, C2)
        lstm_refs = [tuple(next(it) for _ in range(6)) for _ in range(num_layers)]
        wa_ref = next(it)                      # (1, 2H) attention weight
        ba_ref = next(it)                      # (1, 1)
        f1w_ref = next(it)                     # (2H, F1)
        f1b_ref = next(it)                     # (1, F1)
        f2w_ref = next(it)                     # (F1, NC)
        f2b_ref = next(it)                     # (1, NC)
        # ---- output ----
        out_ref = next(it)                     # (B, NC)
        # ---- scratches ----
        pad1 = next(it)                        # (L+2, Cin)  conv1 zero-halo buffer
        r1 = next(it)                          # (L, C1)     conv1+ReLU pre-pool
        pad2 = next(it)                        # (L//2+2, C1)
        r2 = next(it)                          # (L//2, C2)
        xs = next(it)                          # (T*B, Dmax) time-major-flat LSTM layer input
        gxf = next(it)                         # (T*B, 4H)   hoisted fwd input projection
        gxb = next(it)                         # (T*B, 4H)   hoisted bwd input projection
        hf = next(it); cf = next(it)           # (B, H) fwd state
        hb = next(it); cb = next(it)           # (B, H) bwd state
        of = next(it)                          # (T, B, H) fwd outputs (time-major)
        ob = next(it)                          # (T, B, H) bwd outputs (time-major)

        # ================= CNN: (Conv1d(k3,p1) + ReLU + MaxPool(2)) x 2 =================
        w1 = cw1_ref[...].astype(jnp.bfloat16)
        w2 = cw2_ref[...].astype(jnp.bfloat16)
        b1 = cb1_ref[...]
        b2 = cb2_ref[...]

        # Zero halo rows once; interiors are fully overwritten per batch below.
        pad1[...] = jnp.zeros_like(pad1)
        pad2[...] = jnp.zeros_like(pad2)

        def conv_relu_pool(x_f32, w, bias, pad_ref, r_ref):
            # x_f32: (Lc, Cin_c) f32  ->  (Lc//2, Cout) f32
            Lc, _ = r_ref.shape
            pad_ref[1:Lc + 1, :] = x_f32
            acc = (jnp.dot(pad_ref[0:Lc, :].astype(jnp.bfloat16), w[0],
                           preferred_element_type=jnp.float32)
                   + jnp.dot(pad_ref[1:Lc + 1, :].astype(jnp.bfloat16), w[1],
                             preferred_element_type=jnp.float32)
                   + jnp.dot(pad_ref[2:Lc + 2, :].astype(jnp.bfloat16), w[2],
                             preferred_element_type=jnp.float32)
                   + bias)
            r_ref[...] = jnp.maximum(acc, 0.0)                     # ReLU
            # MaxPool1d(2): max of even/odd rows via strided sublane loads (no matmuls).
            even = r_ref[pl.ds(0, Lc // 2, stride=2), :]
            odd = r_ref[pl.ds(1, Lc // 2, stride=2), :]
            return jnp.maximum(even, odd)

        for b in range(B):  # B static at trace time; batch handled in one grid step
            c_h1 = conv_relu_pool(x_ref[b], w1, b1, pad1, r1)      # (L//2, C1)
            c_h2 = conv_relu_pool(c_h1, w2, b2, pad2, r2)          # (T, C2)
            # Scatter into time-major-flattened LSTM input (row = t*B + b).
            # TODO(synk): for large T replace the per-row static stores with a strided store/DMA.
            for t in range(T):
                row = t * B + b
                xs[row:row + 1, 0:C2] = c_h2[t:t + 1, :]

        # ================= Bidirectional LSTM stack (gate order i, f, g, o) =================
        def cell(gates, c):
            # Elementwise gate math kept in f32 (VPU/EUP).
            i_g = jax.nn.sigmoid(gates[:, 0:H])
            f_g = jax.nn.sigmoid(gates[:, H:2 * H])
            g_g = jnp.tanh(gates[:, 2 * H:3 * H])
            o_g = jax.nn.sigmoid(gates[:, 3 * H:4 * H])
            c_new = f_g * c + i_g * g_g
            return o_g * jnp.tanh(c_new), c_new

        d_in = C2
        for li, (wihf_ref, wihb_ref, whhf_ref, whhb_ref, bf_ref, bb_ref) in enumerate(lstm_refs):
            # Hoisted input projection for ALL timesteps / both directions (bf16 MXU).
            x_bf = xs[:, 0:d_in].astype(jnp.bfloat16)              # (T*B, d_in)
            gxf[...] = (jnp.dot(x_bf, wihf_ref[...].astype(jnp.bfloat16),
                                preferred_element_type=jnp.float32) + bf_ref[...])
            gxb[...] = (jnp.dot(x_bf, wihb_ref[...].astype(jnp.bfloat16),
                                preferred_element_type=jnp.float32) + bb_ref[...])

            hf[...] = jnp.zeros_like(hf)
            cf[...] = jnp.zeros_like(cf)
            hb[...] = jnp.zeros_like(hb)
            cb[...] = jnp.zeros_like(cb)

            whh_f = whhf_ref[...].astype(jnp.bfloat16)
            whh_b = whhb_ref[...].astype(jnp.bfloat16)

            def body(t, carry):
                s = T - 1 - t
                gates_f = gxf[pl.ds(t * B, B), :] + jnp.dot(
                    hf[...].astype(jnp.bfloat16), whh_f, preferred_element_type=jnp.float32)
                gates_b = gxb[pl.ds(s * B, B), :] + jnp.dot(
                    hb[...].astype(jnp.bfloat16), whh_b, preferred_element_type=jnp.float32)
                h_f, c_f = cell(gates_f, cf[...])
                h_b, c_b = cell(gates_b, cb[...])
                hf[...] = h_f
                cf[...] = c_f
                hb[...] = h_b
                cb[...] = c_b
                of[t] = h_f
                ob[s] = h_b
                return carry

            lax.fori_loop(0, T, body, 0, unroll=True)

            if li + 1 < num_layers:
                # Next-layer input = concat(fwd, bwd) features; rows stay t*B + b.
                xs[:, 0:H] = of[...].reshape(T * B, H)
                xs[:, H:2 * H] = ob[...].reshape(T * B, H)
                d_in = 2 * H

        # ================= Attention (Linear(2H,1) + softmax over T + weighted sum) + FC =================
        of_v = of[...]
        ob_v = ob[...]
        wa = wa_ref[...]                                   # (1, 2H)
        waf = wa[:, 0:H][None, :, :]                       # (1, 1, H)
        wab = wa[:, H:2 * H][None, :, :]
        scores = (jnp.sum(of_v * waf, axis=2, keepdims=True)
                  + jnp.sum(ob_v * wab, axis=2, keepdims=True)
                  + ba_ref[...])                           # (T, B, 1)
        m = jnp.max(scores, axis=0, keepdims=True)
        e = jnp.exp(scores - m)
        denom = jnp.sum(e, axis=0, keepdims=True)
        aw = e * pl.reciprocal(denom, approx=True)         # softmax over T (EUP recip)
        ctx_f = jnp.sum(aw * of_v, axis=0)                 # (B, H)
        ctx_b = jnp.sum(aw * ob_v, axis=0)                 # (B, H)

        w1v = f1w_ref[...]                                 # (2H, F1); concat folded into row split
        fc_h = jnp.maximum(
            jnp.dot(ctx_f.astype(jnp.bfloat16), w1v[0:H, :].astype(jnp.bfloat16),
                    preferred_element_type=jnp.float32)
            + jnp.dot(ctx_b.astype(jnp.bfloat16), w1v[H:2 * H, :].astype(jnp.bfloat16),
                      preferred_element_type=jnp.float32)
            + f1b_ref[...], 0.0)
        # TODO(synk): nn.Dropout(0.3) is identity at inference time; train-mode masking not implemented.
        out_ref[...] = (jnp.dot(fc_h.astype(jnp.bfloat16), f2w_ref[...].astype(jnp.bfloat16),
                                preferred_element_type=jnp.float32) + f2b_ref[...])

    return kernel


# ----------------------------------------------------------------------------
# Wrapper: single pallas_call for the whole forward pass.
# ----------------------------------------------------------------------------
def forward_fn(x, params):
    B, L, Cin = x.shape
    assert L % 4 == 0, "SEQ must be divisible by 4 (two stride-2 max-pools)"
    T = L // 4
    C1 = params["conv1_w"].shape[2]
    C2 = params["conv2_w"].shape[2]
    H = params["lstm"][0]["whh_f"].shape[0]
    num_layers = len(params["lstm"])
    F1 = params["fc1_w"].shape[1]
    NC = params["fc2_w"].shape[1]
    Dmax = max(C2, 2 * H)

    def fullspec(shape):
        nd = len(shape)
        return pl.BlockSpec(shape, lambda i, nd=nd: (0,) * nd)

    inputs = [x,
              params["conv1_w"], params["conv1_b"],
              params["conv2_w"], params["conv2_b"]]
    in_specs = [fullspec((B, L, Cin)),
                fullspec((3, Cin, C1)), fullspec((1, C1)),
                fullspec((3, C1, C2)), fullspec((1, C2))]
    for layer in params["lstm"]:
        d_in = layer["wih_f"].shape[0]
        inputs += [layer["wih_f"], layer["wih_b"], layer["whh_f"], layer["whh_b"],
                   layer["b_f"], layer["b_b"]]
        in_specs += [fullspec((d_in, 4 * H)), fullspec((d_in, 4 * H)),
                     fullspec((H, 4 * H)), fullspec((H, 4 * H)),
                     fullspec((1, 4 * H)), fullspec((1, 4 * H))]
    inputs += [params["attn_w"], params["attn_b"],
               params["fc1_w"], params["fc1_b"],
               params["fc2_w"], params["fc2_b"]]
    in_specs += [fullspec((1, 2 * H)), fullspec((1, 1)),
                 fullspec((2 * H, F1)), fullspec((1, F1)),
                 fullspec((F1, NC)), fullspec((1, NC))]

    scratch = [
        pltpu.VMEM((L + 2, Cin), jnp.float32),      # pad1 (conv1 zero halo)
        pltpu.VMEM((L, C1), jnp.float32),           # r1   (conv1+ReLU pre-pool)
        pltpu.VMEM((L // 2 + 2, C1), jnp.float32),  # pad2
        pltpu.VMEM((L // 2, C2), jnp.float32),      # r2
        pltpu.VMEM((T * B, Dmax), jnp.float32),     # xs   (LSTM layer input, time-major flat)
        pltpu.VMEM((T * B, 4 * H), jnp.float32),    # gxf
        pltpu.VMEM((T * B, 4 * H), jnp.float32),    # gxb
        pltpu.VMEM((B, H), jnp.float32),            # h_fwd
        pltpu.VMEM((B, H), jnp.float32),            # c_fwd
        pltpu.VMEM((B, H), jnp.float32),            # h_bwd
        pltpu.VMEM((B, H), jnp.float32),            # c_bwd
        pltpu.VMEM((T, B, H), jnp.float32),         # of
        pltpu.VMEM((T, B, H), jnp.float32),         # ob
    ]

    kernel = make_fused_kernel(B, L, Cin, C1, C2, H, num_layers, F1, NC)
    return pl.pallas_call(
        kernel,
        out_shape=jax.ShapeDtypeStruct((B, NC), jnp.float32),
        grid=(1,),
        in_specs=in_specs,
        out_specs=fullspec((B, NC)),
        scratch_shapes=scratch,
        compiler_params=pltpu.CompilerParams(dimension_semantics=("arbitrary",)),
    )(*inputs)


forward = jax.jit(forward_fn)


# ----------------------------------------------------------------------------
# Parameter init (shapes pre-packed for the kernel; porting PyTorch weights means
# transposing conv weights to (tap, in, out), linear weights to (in, out), and
# pre-summing LSTM bias_ih + bias_hh per direction).
# ----------------------------------------------------------------------------
def init_params(key, input_size, hidden_size, num_layers, num_classes):
    def nrm(k, shape, scale=0.1):
        return scale * jax.random.normal(k, shape, dtype=jnp.float32)

    keys = iter(jax.random.split(key, 16 + 8 * num_layers))
    params = {
        "conv1_w": nrm(next(keys), (3, input_size, 64)),
        "conv1_b": nrm(next(keys), (1, 64)),
        "conv2_w": nrm(next(keys), (3, 64, 128)),
        "conv2_b": nrm(next(keys), (1, 128)),
        "attn_w": nrm(next(keys), (1, 2 * hidden_size)),
        "attn_b": nrm(next(keys), (1, 1)),
        "fc1_w": nrm(next(keys), (2 * hidden_size, 64)),
        "fc1_b": nrm(next(keys), (1, 64)),
        "fc2_w": nrm(next(keys), (64, num_classes)),
        "fc2_b": nrm(next(keys), (1, num_classes)),
        "lstm": [],
    }
    d_in = 128
    for _ in range(num_layers):
        layer = {
            "wih_f": nrm(next(keys), (d_in, 4 * hidden_size)),
            "whh_f": nrm(next(keys), (hidden_size, 4 * hidden_size)),
            "b_f": nrm(next(keys), (1, 4 * hidden_size)),   # bias_ih + bias_hh pre-summed
            "wih_b": nrm(next(keys), (d_in, 4 * hidden_size)),
            "whh_b": nrm(next(keys), (hidden_size, 4 * hidden_size)),
            "b_b": nrm(next(keys), (1, 4 * hidden_size)),
        }
        params["lstm"].append(layer)
        d_in = 2 * hidden_size
    return params


if __name__ == "__main__":
    B, SEQ, INPUT_SIZE = 2, 16, 8
    HIDDEN, NUM_LAYERS, NUM_CLASSES = 32, 1, 4

    key = jax.random.PRNGKey(0)
    k_params, k_x = jax.random.split(key)
    params = init_params(k_params, INPUT_SIZE, HIDDEN, NUM_LAYERS, NUM_CLASSES)
    x = jax.random.normal(k_x, (B, SEQ, INPUT_SIZE), dtype=jnp.float32)

    out = forward(x, params)
    out = jax.block_until_ready(out)
    assert out.shape == (B, NUM_CLASSES), out.shape
    assert bool(jnp.all(jnp.isfinite(out)))
    print("KERNEL_OK")
</pallas_src>

<mosaic_0001>
module attributes {stable_mosaic.version = 11 : i64} {
  func.func @kernel(%arg0: i32, %arg1: memref<2x16x8xf32, #tpu.memory_space<vmem>>, %arg2: memref<3x8x64xf32, #tpu.memory_space<vmem>>, %arg3: memref<1x64xf32, #tpu.memory_space<vmem>>, %arg4: memref<3x64x128xf32, #tpu.memory_space<vmem>>, %arg5: memref<1x128xf32, #tpu.memory_space<vmem>>, %arg6: memref<128x128xf32, #tpu.memory_space<vmem>>, %arg7: memref<128x128xf32, #tpu.memory_space<vmem>>, %arg8: memref<32x128xf32, #tpu.memory_space<vmem>>, %arg9: memref<32x128xf32, #tpu.memory_space<vmem>>, %arg10: memref<1x128xf32, #tpu.memory_space<vmem>>, %arg11: memref<1x128xf32, #tpu.memory_space<vmem>>, %arg12: memref<1x64xf32, #tpu.memory_space<vmem>>, %arg13: memref<1x1xf32, #tpu.memory_space<vmem>>, %arg14: memref<64x64xf32, #tpu.memory_space<vmem>>, %arg15: memref<1x64xf32, #tpu.memory_space<vmem>>, %arg16: memref<64x4xf32, #tpu.memory_space<vmem>>, %arg17: memref<1x4xf32, #tpu.memory_space<vmem>>, %arg18: memref<2x4xf32, #tpu.memory_space<vmem>>, %arg19: memref<18x8xf32, #tpu.memory_space<vmem>>, %arg20: memref<16x64xf32, #tpu.memory_space<vmem>>, %arg21: memref<10x64xf32, #tpu.memory_space<vmem>>, %arg22: memref<8x128xf32, #tpu.memory_space<vmem>>, %arg23: memref<8x128xf32, #tpu.memory_space<vmem>>, %arg24: memref<8x128xf32, #tpu.memory_space<vmem>>, %arg25: memref<8x128xf32, #tpu.memory_space<vmem>>, %arg26: memref<2x32xf32, #tpu.memory_space<vmem>>, %arg27: memref<2x32xf32, #tpu.memory_space<vmem>>, %arg28: memref<2x32xf32, #tpu.memory_space<vmem>>, %arg29: memref<2x32xf32, #tpu.memory_space<vmem>>, %arg30: memref<4x2x32xf32, #tpu.memory_space<vmem>>, %arg31: memref<4x2x32xf32, #tpu.memory_space<vmem>>) attributes {dimension_semantics = [#tpu.dimension_semantics<arbitrary>], iteration_bounds = array<i64: 1>, scalar_prefetch = 0 : i64, scratch_operands = 13 : i64, tpu.core_type = #tpu.core_type<tc>, window_params = [{pipeline_mode = #tpu.pipeline_mode<synchronous>, transform_indices = @transform_0, window_bounds = array<i64: 2, 16, 8>}, {pipeline_mode = #tpu.pipeline_mode<synchronous>, transform_indices = @transform_1, window_bounds = array<i64: 3, 8, 64>}, {pipeline_mode = #tpu.pipeline_mode<synchronous>, transform_indices = @transform_2, window_bounds = array<i64: 1, 64>}, {pipeline_mode = #tpu.pipeline_mode<synchronous>, transform_indices = @transform_3, window_bounds = array<i64: 3, 64, 128>}, {pipeline_mode = #tpu.pipeline_mode<synchronous>, transform_indices = @transform_4, window_bounds = array<i64: 1, 128>}, {pipeline_mode = #tpu.pipeline_mode<synchronous>, transform_indices = @transform_5, window_bounds = array<i64: 128, 128>}, {pipeline_mode = #tpu.pipeline_mode<synchronous>, transform_indices = @transform_6, window_bounds = array<i64: 128, 128>}, {pipeline_mode = #tpu.pipeline_mode<synchronous>, transform_indices = @transform_7, window_bounds = array<i64: 32, 128>}, {pipeline_mode = #tpu.pipeline_mode<synchronous>, transform_indices = @transform_8, window_bounds = array<i64: 32, 128>}, {pipeline_mode = #tpu.pipeline_mode<synchronous>, transform_indices = @transform_9, window_bounds = array<i64: 1, 128>}, {pipeline_mode = #tpu.pipeline_mode<synchronous>, transform_indices = @transform_10, window_bounds = array<i64: 1, 128>}, {pipeline_mode = #tpu.pipeline_mode<synchronous>, transform_indices = @transform_11, window_bounds = array<i64: 1, 64>}, {pipeline_mode = #tpu.pipeline_mode<synchronous>, transform_indices = @transform_12, window_bounds = array<i64: 1, 1>}, {pipeline_mode = #tpu.pipeline_mode<synchronous>, transform_indices = @transform_13, window_bounds = array<i64: 64, 64>}, {pipeline_mode = #tpu.pipeline_mode<synchronous>, transform_indices = @transform_14, window_bounds = array<i64: 1, 64>}, {pipeline_mode = #tpu.pipeline_mode<synchronous>, transform_indices = @transform_15, window_bounds = array<i64: 64, 4>}, {pipeline_mode = #tpu.pipeline_mode<synchronous>, transform_indices = @transform_16, window_bounds = array<i64: 1, 4>}, {pipeline_mode = #tpu.pipeline_mode<synchronous>, transform_indices = @transform_17, window_bounds = array<i64: 2, 4>}]} {
    %c0 = arith.constant 0 : index
    %c0_0 = arith.constant 0 : index
    %c0_1 = arith.constant 0 : index
    %0 = vector.load %arg2[%c0, %c0_0, %c0_1] : memref<3x8x64xf32, #tpu.memory_space<vmem>>, vector<3x8x64xf32>
    %1 = arith.truncf %0 : vector<3x8x64xf32> to vector<3x8x64xbf16>
    %c0_2 = arith.constant 0 : index
    %c0_3 = arith.constant 0 : index
    %c0_4 = arith.constant 0 : index
    %2 = vector.load %arg4[%c0_2, %c0_3, %c0_4] : memref<3x64x128xf32, #tpu.memory_space<vmem>>, vector<3x64x128xf32>
    %3 = arith.truncf %2 : vector<3x64x128xf32> to vector<3x64x128xbf16>
    %c0_5 = arith.constant 0 : index
    %c0_6 = arith.constant 0 : index
    %4 = vector.load %arg3[%c0_5, %c0_6] : memref<1x64xf32, #tpu.memory_space<vmem>>, vector<1x64xf32>
    %c0_7 = arith.constant 0 : index
    %c0_8 = arith.constant 0 : index
    %5 = vector.load %arg5[%c0_7, %c0_8] : memref<1x128xf32, #tpu.memory_space<vmem>>, vector<1x128xf32>
    %cst = arith.constant 0.000000e+00 : f32
    %6 = vector.broadcast %cst : f32 to vector<18x8xf32>
    %c0_9 = arith.constant 0 : index
    %c0_10 = arith.constant 0 : index
    %7 = vector.load %arg19[%c0_9, %c0_10] : memref<18x8xf32, #tpu.memory_space<vmem>>, vector<18x8xf32>
    tpu.vector_store %arg19[%c0_9, %c0_10], %6 {strides = array<i32>} : memref<18x8xf32, #tpu.memory_space<vmem>>, vector<18x8xf32>,
    %cst_11 = arith.constant 0.000000e+00 : f32
    %8 = vector.broadcast %cst_11 : f32 to vector<10x64xf32>
    %c0_12 = arith.constant 0 : index
    %c0_13 = arith.constant 0 : index
    %9 = vector.load %arg21[%c0_12, %c0_13] : memref<10x64xf32, #tpu.memory_space<vmem>>, vector<10x64xf32>
    tpu.vector_store %arg21[%c0_12, %c0_13], %8 {strides = array<i32>} : memref<10x64xf32, #tpu.memory_space<vmem>>, vector<10x64xf32>,
    %c0_14 = arith.constant 0 : index
    %c0_15 = arith.constant 0 : index
    %c0_16 = arith.constant 0 : index
    %10 = vector.load %arg1[%c0_14, %c0_15, %c0_16] : memref<2x16x8xf32, #tpu.memory_space<vmem>>, vector<1x16x8xf32>
    %11 = vector.shape_cast %10 : vector<1x16x8xf32> to vector<16x8xf32>
    %c1 = arith.constant 1 : index
    %c0_17 = arith.constant 0 : index
    %12 = vector.load %arg19[%c1, %c0_17] : memref<18x8xf32, #tpu.memory_space<vmem>>, vector<16x8xf32>
    tpu.vector_store %arg19[%c1, %c0_17], %11 {strides = array<i32>} : memref<18x8xf32, #tpu.memory_space<vmem>>, vector<16x8xf32>,
    %c0_18 = arith.constant 0 : index
    %c0_19 = arith.constant 0 : index
    %13 = vector.load %arg19[%c0_18, %c0_19] : memref<18x8xf32, #tpu.memory_space<vmem>>, vector<16x8xf32>
    %14 = arith.truncf %13 : vector<16x8xf32> to vector<16x8xbf16>
    %15 = vector.extract_strided_slice %1 {offsets = [0, 0, 0], sizes = [1, 8, 64], strides = [1, 1, 1]} : vector<3x8x64xbf16> to vector<1x8x64xbf16>
    %16 = vector.shape_cast %15 : vector<1x8x64xbf16> to vector<8x64xbf16>
    %cst_20 = arith.constant dense<0.000000e+00> : vector<16x64xf32>
    %17 = tpu.matmul %14, %16, %cst_20 {dimension_numbers = #tpu.dot_dimension_numbers<[1], [0], [0], [1], [0, 0, 1, 1], [], []>} : vector<16x8xbf16>, vector<8x64xbf16>, vector<16x64xf32> -> vector<16x64xf32>
    %c1_21 = arith.constant 1 : index
    %c0_22 = arith.constant 0 : index
    %18 = vector.load %arg19[%c1_21, %c0_22] : memref<18x8xf32, #tpu.memory_space<vmem>>, vector<16x8xf32>
    %19 = arith.truncf %18 : vector<16x8xf32> to vector<16x8xbf16>
    %20 = vector.extract_strided_slice %1 {offsets = [1, 0, 0], sizes = [1, 8, 64], strides = [1, 1, 1]} : vector<3x8x64xbf16> to vector<1x8x64xbf16>
    %21 = vector.shape_cast %20 : vector<1x8x64xbf16> to vector<8x64xbf16>
    %cst_23 = arith.constant dense<0.000000e+00> : vector<16x64xf32>
    %22 = tpu.matmul %19, %21, %cst_23 {dimension_numbers = #tpu.dot_dimension_numbers<[1], [0], [0], [1], [0, 0, 1, 1], [], []>} : vector<16x8xbf16>, vector<8x64xbf16>, vector<16x64xf32> -> vector<16x64xf32>
    %23 = arith.addf %17, %22 : vector<16x64xf32>
    %c2 = arith.constant 2 : index
    %c0_24 = arith.constant 0 : index
    %24 = vector.load %arg19[%c2, %c0_24] : memref<18x8xf32, #tpu.memory_space<vmem>>, vector<16x8xf32>
    %25 = arith.truncf %24 : vector<16x8xf32> to vector<16x8xbf16>
    %26 = vector.extract_strided_slice %1 {offsets = [2, 0, 0], sizes = [1, 8, 64], strides = [1, 1, 1]} : vector<3x8x64xbf16> to vector<1x8x64xbf16>
    %27 = vector.shape_cast %26 : vector<1x8x64xbf16> to vector<8x64xbf16>
    %cst_25 = arith.constant dense<0.000000e+00> : vector<16x64xf32>
    %28 = tpu.matmul %25, %27, %cst_25 {dimension_numbers = #tpu.dot_dimension_numbers<[1], [0], [0], [1], [0, 0, 1, 1], [], []>} : vector<16x8xbf16>, vector<8x64xbf16>, vector<16x64xf32> -> vector<16x64xf32>
    %29 = arith.addf %23, %28 : vector<16x64xf32>
    %30 = vector.broadcast %4 : vector<1x64xf32> to vector<16x64xf32>
    %31 = arith.addf %29, %30 : vector<16x64xf32>
    %cst_26 = arith.constant 0.000000e+00 : f32
    %32 = vector.broadcast %cst_26 : f32 to vector<16x64xf32>
    %33 = arith.maximumf %31, %32 : vector<16x64xf32>
    %c0_27 = arith.constant 0 : index
    %c0_28 = arith.constant 0 : index
    %34 = vector.load %arg20[%c0_27, %c0_28] : memref<16x64xf32, #tpu.memory_space<vmem>>, vector<16x64xf32>
    tpu.vector_store %arg20[%c0_27, %c0_28], %33 {strides = array<i32>} : memref<16x64xf32, #tpu.memory_space<vmem>>, vector<16x64xf32>,
    %c0_29 = arith.constant 0 : index
    %c0_30 = arith.constant 0 : index
    %35 = tpu.strided_load %arg20[%c0_29, %c0_30] {strides = array<i32: 2, 1>} : memref<16x64xf32, #tpu.memory_space<vmem>>, vector<8x64xf32>
    %c1_31 = arith.constant 1 : index
    %c0_32 = arith.constant 0 : index
    %36 = tpu.strided_load %arg20[%c1_31, %c0_32] {strides = array<i32: 2, 1>} : memref<16x64xf32, #tpu.memory_space<vmem>>, vector<8x64xf32>
    %37 = arith.maximumf %35, %36 : vector<8x64xf32>
    %c1_33 = arith.constant 1 : index
    %c0_34 = arith.constant 0 : index
    %38 = vector.load %arg21[%c1_33, %c0_34] : memref<10x64xf32, #tpu.memory_space<vmem>>, vector<8x64xf32>
    tpu.vector_store %arg21[%c1_33, %c0_34], %37 {strides = array<i32>} : memref<10x64xf32, #tpu.memory_space<vmem>>, vector<8x64xf32>,
    %c0_35 = arith.constant 0 : index
    %c0_36 = arith.constant 0 : index
    %39 = vector.load %arg21[%c0_35, %c0_36] : memref<10x64xf32, #tpu.memory_space<vmem>>, vector<8x64xf32>
    %40 = arith.truncf %39 : vector<8x64xf32> to vector<8x64xbf16>
    %41 = vector.extract_strided_slice %3 {offsets = [0, 0, 0], sizes = [1, 64, 128], strides = [1, 1, 1]} : vector<3x64x128xbf16> to vector<1x64x128xbf16>
    %42 = vector.shape_cast %41 : vector<1x64x128xbf16> to vector<64x128xbf16>
    %cst_37 = arith.constant dense<0.000000e+00> : vector<8x128xf32>
    %43 = tpu.matmul %40, %42, %cst_37 {dimension_numbers = #tpu.dot_dimension_numbers<[1], [0], [0], [1], [0, 0, 1, 1], [], []>} : vector<8x64xbf16>, vector<64x128xbf16>, vector<8x128xf32> -> vector<8x128xf32>
    %c1_38 = arith.constant 1 : index
    %c0_39 = arith.constant 0 : index
    %44 = vector.load %arg21[%c1_38, %c0_39] : memref<10x64xf32, #tpu.memory_space<vmem>>, vector<8x64xf32>
    %45 = arith.truncf %44 : vector<8x64xf32> to vector<8x64xbf16>
    %46 = vector.extract_strided_slice %3 {offsets = [1, 0, 0], sizes = [1, 64, 128], strides = [1, 1, 1]} : vector<3x64x128xbf16> to vector<1x64x128xbf16>
    %47 = vector.shape_cast %46 : vector<1x64x128xbf16> to vector<64x128xbf16>
    %cst_40 = arith.constant dense<0.000000e+00> : vector<8x128xf32>
    %48 = tpu.matmul %45, %47, %cst_40 {dimension_numbers = #tpu.dot_dimension_numbers<[1], [0], [0], [1], [0, 0, 1, 1], [], []>} : vector<8x64xbf16>, vector<64x128xbf16>, vector<8x128xf32> -> vector<8x128xf32>
    %49 = arith.addf %43, %48 : vector<8x128xf32>
    %c2_41 = arith.constant 2 : index
    %c0_42 = arith.constant 0 : index
    %50 = vector.load %arg21[%c2_41, %c0_42] : memref<10x64xf32, #tpu.memory_space<vmem>>, vector<8x64xf32>
    %51 = arith.truncf %50 : vector<8x64xf32> to vector<8x64xbf16>
    %52 = vector.extract_strided_slice %3 {offsets = [2, 0, 0], sizes = [1, 64, 128], strides = [1, 1, 1]} : vector<3x64x128xbf16> to vector<1x64x128xbf16>
    %53 = vector.shape_cast %52 : vector<1x64x128xbf16> to vector<64x128xbf16>
    %cst_43 = arith.constant dense<0.000000e+00> : vector<8x128xf32>
    %54 = tpu.matmul %51, %53, %cst_43 {dimension_numbers = #tpu.dot_dimension_numbers<[1], [0], [0], [1], [0, 0, 1, 1], [], []>} : vector<8x64xbf16>, vector<64x128xbf16>, vector<8x128xf32> -> vector<8x128xf32>
    %55 = arith.addf %49, %54 : vector<8x128xf32>
    %56 = vector.broadcast %5 : vector<1x128xf32> to vector<8x128xf32>
    %57 = arith.addf %55, %56 : vector<8x128xf32>
    %cst_44 = arith.constant 0.000000e+00 : f32
    %58 = vector.broadcast %cst_44 : f32 to vector<8x128xf32>
    %59 = arith.maximumf %57, %58 : vector<8x128xf32>
    %c0_45 = arith.constant 0 : index
    %c0_46 = arith.constant 0 : index
    %60 = vector.load %arg22[%c0_45, %c0_46] : memref<8x128xf32, #tpu.memory_space<vmem>>, vector<8x128xf32>
    tpu.vector_store %arg22[%c0_45, %c0_46], %59 {strides = array<i32>} : memref<8x128xf32, #tpu.memory_space<vmem>>, vector<8x128xf32>,
    %c0_47 = arith.constant 0 : index
    %c0_48 = arith.constant 0 : index
    %61 = tpu.strided_load %arg22[%c0_47, %c0_48] {strides = array<i32: 2, 1>} : memref<8x128xf32, #tpu.memory_space<vmem>>, vector<4x128xf32>
    %c1_49 = arith.constant 1 : index
    %c0_50 = arith.constant 0 : index
    %62 = tpu.strided_load %arg22[%c1_49, %c0_50] {strides = array<i32: 2, 1>} : memref<8x128xf32, #tpu.memory_space<vmem>>, vector<4x128xf32>
    %63 = arith.maximumf %61, %62 : vector<4x128xf32>
    %64 = vector.extract_strided_slice %63 {offsets = [0, 0], sizes = [1, 128], strides = [1, 1]} : vector<4x128xf32> to vector<1x128xf32>
    %c0_51 = arith.constant 0 : index
    %c0_52 = arith.constant 0 : index
    %65 = vector.load %arg23[%c0_51, %c0_52] : memref<8x128xf32, #tpu.memory_space<vmem>>, vector<1x128xf32>
    tpu.vector_store %arg23[%c0_51, %c0_52], %64 {strides = array<i32>} : memref<8x128xf32, #tpu.memory_space<vmem>>, vector<1x128xf32>,
    %66 = vector.extract_strided_slice %63 {offsets = [1, 0], sizes = [1, 128], strides = [1, 1]} : vector<4x128xf32> to vector<1x128xf32>
    %c2_53 = arith.constant 2 : index
    %c0_54 = arith.constant 0 : index
    %67 = vector.load %arg23[%c2_53, %c0_54] : memref<8x128xf32, #tpu.memory_space<vmem>>, vector<1x128xf32>
    tpu.vector_store %arg23[%c2_53, %c0_54], %66 {strides = array<i32>} : memref<8x128xf32, #tpu.memory_space<vmem>>, vector<1x128xf32>,
    %68 = vector.extract_strided_slice %63 {offsets = [2, 0], sizes = [1, 128], strides = [1, 1]} : vector<4x128xf32> to vector<1x128xf32>
    %c4 = arith.constant 4 : index
    %c0_55 = arith.constant 0 : index
    %69 = vector.load %arg23[%c4, %c0_55] : memref<8x128xf32, #tpu.memory_space<vmem>>, vector<1x128xf32>
    tpu.vector_store %arg23[%c4, %c0_55], %68 {strides = array<i32>} : memref<8x128xf32, #tpu.memory_space<vmem>>, vector<1x128xf32>,
    %70 = vector.extract_strided_slice %63 {offsets = [3, 0], sizes = [1, 128], strides = [1, 1]} : vector<4x128xf32> to vector<1x128xf32>
    %c6 = arith.constant 6 : index
    %c0_56 = arith.constant 0 : index
    %71 = vector.load %arg23[%c6, %c0_56] : memref<8x128xf32, #tpu.memory_space<vmem>>, vector<1x128xf32>
    tpu.vector_store %arg23[%c6, %c0_56], %70 {strides = array<i32>} : memref<8x128xf32, #tpu.memory_space<vmem>>, vector<1x128xf32>,
    %c1_57 = arith.constant 1 : index
    %c0_58 = arith.constant 0 : index
    %c0_59 = arith.constant 0 : index
    %72 = vector.load %arg1[%c1_57, %c0_58, %c0_59] : memref<2x16x8xf32, #tpu.memory_space<vmem>>, vector<1x16x8xf32>
    %73 = vector.shape_cast %72 : vector<1x16x8xf32> to vector<16x8xf32>
    %c1_60 = arith.constant 1 : index
    %c0_61 = arith.constant 0 : index
    %74 = vector.load %arg19[%c1_60, %c0_61] : memref<18x8xf32, #tpu.memory_space<vmem>>, vector<16x8xf32>
    tpu.vector_store %arg19[%c1_60, %c0_61], %73 {strides = array<i32>} : memref<18x8xf32, #tpu.memory_space<vmem>>, vector<16x8xf32>,
    %c0_62 = arith.constant 0 : index
    %c0_63 = arith.constant 0 : index
    %75 = vector.load %arg19[%c0_62, %c0_63] : memref<18x8xf32, #tpu.memory_space<vmem>>, vector<16x8xf32>
    %76 = arith.truncf %75 : vector<16x8xf32> to vector<16x8xbf16>
    %77 = vector.extract_strided_slice %1 {offsets = [0, 0, 0], sizes = [1, 8, 64], strides = [1, 1, 1]} : vector<3x8x64xbf16> to vector<1x8x64xbf16>
    %78 = vector.shape_cast %77 : vector<1x8x64xbf16> to vector<8x64xbf16>
    %cst_64 = arith.constant dense<0.000000e+00> : vector<16x64xf32>
    %79 = tpu.matmul %76, %78, %cst_64 {dimension_numbers = #tpu.dot_dimension_numbers<[1], [0], [0], [1], [0, 0, 1, 1], [], []>} : vector<16x8xbf16>, vector<8x64xbf16>, vector<16x64xf32> -> vector<16x64xf32>
    %c1_65 = arith.constant 1 : index
    %c0_66 = arith.constant 0 : index
    %80 = vector.load %arg19[%c1_65, %c0_66] : memref<18x8xf32, #tpu.memory_space<vmem>>, vector<16x8xf32>
    %81 = arith.truncf %80 : vector<16x8xf32> to vector<16x8xbf16>
    %82 = vector.extract_strided_slice %1 {offsets = [1, 0, 0], sizes = [1, 8, 64], strides = [1, 1, 1]} : vector<3x8x64xbf16> to vector<1x8x64xbf16>
    %83 = vector.shape_cast %82 : vector<1x8x64xbf16> to vector<8x64xbf16>
    %cst_67 = arith.constant dense<0.000000e+00> : vector<16x64xf32>
    %84 = tpu.matmul %81, %83, %cst_67 {dimension_numbers = #tpu.dot_dimension_numbers<[1], [0], [0], [1], [0, 0, 1, 1], [], []>} : vector<16x8xbf16>, vector<8x64xbf16>, vector<16x64xf32> -> vector<16x64xf32>
    %85 = arith.addf %79, %84 : vector<16x64xf32>
    %c2_68 = arith.constant 2 : index
    %c0_69 = arith.constant 0 : index
    %86 = vector.load %arg19[%c2_68, %c0_69] : memref<18x8xf32, #tpu.memory_space<vmem>>, vector<16x8xf32>
    %87 = arith.truncf %86 : vector<16x8xf32> to vector<16x8xbf16>
    %88 = vector.extract_strided_slice %1 {offsets = [2, 0, 0], sizes = [1, 8, 64], strides = [1, 1, 1]} : vector<3x8x64xbf16> to vector<1x8x64xbf16>
    %89 = vector.shape_cast %88 : vector<1x8x64xbf16> to vector<8x64xbf16>
    %cst_70 = arith.constant dense<0.000000e+00> : vector<16x64xf32>
    %90 = tpu.matmul %87, %89, %cst_70 {dimension_numbers = #tpu.dot_dimension_numbers<[1], [0], [0], [1], [0, 0, 1, 1], [], []>} : vector<16x8xbf16>, vector<8x64xbf16>, vector<16x64xf32> -> vector<16x64xf32>
    %91 = arith.addf %85, %90 : vector<16x64xf32>
    %92 = vector.broadcast %4 : vector<1x64xf32> to vector<16x64xf32>
    %93 = arith.addf %91, %92 : vector<16x64xf32>
    %cst_71 = arith.constant 0.000000e+00 : f32
    %94 = vector.broadcast %cst_71 : f32 to vector<16x64xf32>
    %95 = arith.maximumf %93, %94 : vector<16x64xf32>
    %c0_72 = arith.constant 0 : index
    %c0_73 = arith.constant 0 : index
    %96 = vector.load %arg20[%c0_72, %c0_73] : memref<16x64xf32, #tpu.memory_space<vmem>>, vector<16x64xf32>
    tpu.vector_store %arg20[%c0_72, %c0_73], %95 {strides = array<i32>} : memref<16x64xf32, #tpu.memory_space<vmem>>, vector<16x64xf32>,
    %c0_74 = arith.constant 0 : index
    %c0_75 = arith.constant 0 : index
    %97 = tpu.strided_load %arg20[%c0_74, %c0_75] {strides = array<i32: 2, 1>} : memref<16x64xf32, #tpu.memory_space<vmem>>, vector<8x64xf32>
    %c1_76 = arith.constant 1 : index
    %c0_77 = arith.constant 0 : index
    %98 = tpu.strided_load %arg20[%c1_76, %c0_77] {strides = array<i32: 2, 1>} : memref<16x64xf32, #tpu.memory_space<vmem>>, vector<8x64xf32>
    %99 = arith.maximumf %97, %98 : vector<8x64xf32>
    %c1_78 = arith.constant 1 : index
    %c0_79 = arith.constant 0 : index
    %100 = vector.load %arg21[%c1_78, %c0_79] : memref<10x64xf32, #tpu.memory_space<vmem>>, vector<8x64xf32>
    tpu.vector_store %arg21[%c1_78, %c0_79], %99 {strides = array<i32>} : memref<10x64xf32, #tpu.memory_space<vmem>>, vector<8x64xf32>,
    %c0_80 = arith.constant 0 : index
    %c0_81 = arith.constant 0 : index
    %101 = vector.load %arg21[%c0_80, %c0_81] : memref<10x64xf32, #tpu.memory_space<vmem>>, vector<8x64xf32>
    %102 = arith.truncf %101 : vector<8x64xf32> to vector<8x64xbf16>
    %103 = vector.extract_strided_slice %3 {offsets = [0, 0, 0], sizes = [1, 64, 128], strides = [1, 1, 1]} : vector<3x64x128xbf16> to vector<1x64x128xbf16>
    %104 = vector.shape_cast %103 : vector<1x64x128xbf16> to vector<64x128xbf16>
    %cst_82 = arith.constant dense<0.000000e+00> : vector<8x128xf32>
    %105 = tpu.matmul %102, %104, %cst_82 {dimension_numbers = #tpu.dot_dimension_numbers<[1], [0], [0], [1], [0, 0, 1, 1], [], []>} : vector<8x64xbf16>, vector<64x128xbf16>, vector<8x128xf32> -> vector<8x128xf32>
    %c1_83 = arith.constant 1 : index
    %c0_84 = arith.constant 0 : index
    %106 = vector.load %arg21[%c1_83, %c0_84] : memref<10x64xf32, #tpu.memory_space<vmem>>, vector<8x64xf32>
    %107 = arith.truncf %106 : vector<8x64xf32> to vector<8x64xbf16>
    %108 = vector.extract_strided_slice %3 {offsets = [1, 0, 0], sizes = [1, 64, 128], strides = [1, 1, 1]} : vector<3x64x128xbf16> to vector<1x64x128xbf16>
    %109 = vector.shape_cast %108 : vector<1x64x128xbf16> to vector<64x128xbf16>
    %cst_85 = arith.constant dense<0.000000e+00> : vector<8x128xf32>
    %110 = tpu.matmul %107, %109, %cst_85 {dimension_numbers = #tpu.dot_dimension_numbers<[1], [0], [0], [1], [0, 0, 1, 1], [], []>} : vector<8x64xbf16>, vector<64x128xbf16>, vector<8x128xf32> -> vector<8x128xf32>
    %111 = arith.addf %105, %110 : vector<8x128xf32>
    %c2_86 = arith.constant 2 : index
    %c0_87 = arith.constant 0 : index
    %112 = vector.load %arg21[%c2_86, %c0_87] : memref<10x64xf32, #tpu.memory_space<vmem>>, vector<8x64xf32>
    %113 = arith.truncf %112 : vector<8x64xf32> to vector<8x64xbf16>
    %114 = vector.extract_strided_slice %3 {offsets = [2, 0, 0], sizes = [1, 64, 128], strides = [1, 1, 1]} : vector<3x64x128xbf16> to vector<1x64x128xbf16>
    %115 = vector.shape_cast %114 : vector<1x64x128xbf16> to vector<64x128xbf16>
    %cst_88 = arith.constant dense<0.000000e+00> : vector<8x128xf32>
    %116 = tpu.matmul %113, %115, %cst_88 {dimension_numbers = #tpu.dot_dimension_numbers<[1], [0], [0], [1], [0, 0, 1, 1], [], []>} : vector<8x64xbf16>, vector<64x128xbf16>, vector<8x128xf32> -> vector<8x128xf32>
    %117 = arith.addf %111, %116 : vector<8x128xf32>
    %118 = vector.broadcast %5 : vector<1x128xf32> to vector<8x128xf32>
    %119 = arith.addf %117, %118 : vector<8x128xf32>
    %cst_89 = arith.constant 0.000000e+00 : f32
    %120 = vector.broadcast %cst_89 : f32 to vector<8x128xf32>
    %121 = arith.maximumf %119, %120 : vector<8x128xf32>
    %c0_90 = arith.constant 0 : index
    %c0_91 = arith.constant 0 : index
    %122 = vector.load %arg22[%c0_90, %c0_91] : memref<8x128xf32, #tpu.memory_space<vmem>>, vector<8x128xf32>
    tpu.vector_store %arg22[%c0_90, %c0_91], %121 {strides = array<i32>} : memref<8x128xf32, #tpu.memory_space<vmem>>, vector<8x128xf32>,
    %c0_92 = arith.constant 0 : index
    %c0_93 = arith.constant 0 : index
    %123 = tpu.strided_load %arg22[%c0_92, %c0_93] {strides = array<i32: 2, 1>} : memref<8x128xf32, #tpu.memory_space<vmem>>, vector<4x128xf32>
    %c1_94 = arith.constant 1 : index
    %c0_95 = arith.constant 0 : index
    %124 = tpu.strided_load %arg22[%c1_94, %c0_95] {strides = array<i32: 2, 1>} : memref<8x128xf32, #tpu.memory_space<vmem>>, vector<4x128xf32>
    %125 = arith.maximumf %123, %124 : vector<4x128xf32>
    %126 = vector.extract_strided_slice %125 {offsets = [0, 0], sizes = [1, 128], strides = [1, 1]} : vector<4x128xf32> to vector<1x128xf32>
    %c1_96 = arith.constant 1 : index
    %c0_97 = arith.constant 0 : index
    %127 = vector.load %arg23[%c1_96, %c0_97] : memref<8x128xf32, #tpu.memory_space<vmem>>, vector<1x128xf32>
    tpu.vector_store %arg23[%c1_96, %c0_97], %126 {strides = array<i32>} : memref<8x128xf32, #tpu.memory_space<vmem>>, vector<1x128xf32>,
    %128 = vector.extract_strided_slice %125 {offsets = [1, 0], sizes = [1, 128], strides = [1, 1]} : vector<4x128xf32> to vector<1x128xf32>
    %c3 = arith.constant 3 : index
    %c0_98 = arith.constant 0 : index
    %129 = vector.load %arg23[%c3, %c0_98] : memref<8x128xf32, #tpu.memory_space<vmem>>, vector<1x128xf32>
    tpu.vector_store %arg23[%c3, %c0_98], %128 {strides = array<i32>} : memref<8x128xf32, #tpu.memory_space<vmem>>, vector<1x128xf32>,
    %130 = vector.extract_strided_slice %125 {offsets = [2, 0], sizes = [1, 128], strides = [1, 1]} : vector<4x128xf32> to vector<1x128xf32>
    %c5 = arith.constant 5 : index
    %c0_99 = arith.constant 0 : index
    %131 = vector.load %arg23[%c5, %c0_99] : memref<8x128xf32, #tpu.memory_space<vmem>>, vector<1x128xf32>
    tpu.vector_store %arg23[%c5, %c0_99], %130 {strides = array<i32>} : memref<8x128xf32, #tpu.memory_space<vmem>>, vector<1x128xf32>,
    %132 = vector.extract_strided_slice %125 {offsets = [3, 0], sizes = [1, 128], strides = [1, 1]} : vector<4x128xf32> to vector<1x128xf32>
    %c7 = arith.constant 7 : index
    %c0_100 = arith.constant 0 : index
    %133 = vector.load %arg23[%c7, %c0_100] : memref<8x128xf32, #tpu.memory_space<vmem>>, vector<1x128xf32>
    tpu.vector_store %arg23[%c7, %c0_100], %132 {strides = array<i32>} : memref<8x128xf32, #tpu.memory_space<vmem>>, vector<1x128xf32>,
    %c0_101 = arith.constant 0 : index
    %c0_102 = arith.constant 0 : index
    %134 = vector.load %arg23[%c0_101, %c0_102] : memref<8x128xf32, #tpu.memory_space<vmem>>, vector<8x128xf32>
    %135 = arith.truncf %134 : vector<8x128xf32> to vector<8x128xbf16>
    %c0_103 = arith.constant 0 : index
    %c0_104 = arith.constant 0 : index
    %136 = vector.load %arg6[%c0_103, %c0_104] : memref<128x128xf32, #tpu.memory_space<vmem>>, vector<128x128xf32>
    %137 = arith.truncf %136 : vector<128x128xf32> to vector<128x128xbf16>
    %cst_105 = arith.constant dense<0.000000e+00> : vector<8x128xf32>
    %138 = tpu.matmul %135, %137, %cst_105 {dimension_numbers = #tpu.dot_dimension_numbers<[1], [0], [0], [1], [0, 0, 1, 1], [], []>} : vector<8x128xbf16>, vector<128x128xbf16>, vector<8x128xf32> -> vector<8x128xf32>
    %c0_106 = arith.constant 0 : index
    %c0_107 = arith.constant 0 : index
    %139 = vector.load %arg10[%c0_106, %c0_107] : memref<1x128xf32, #tpu.memory_space<vmem>>, vector<1x128xf32>
    %140 = vector.broadcast %139 : vector<1x128xf32> to vector<8x128xf32>
    %141 = arith.addf %138, %140 : vector<8x128xf32>
    %c0_108 = arith.constant 0 : index
    %c0_109 = arith.constant 0 : index
    %142 = vector.load %arg24[%c0_108, %c0_109] : memref<8x128xf32, #tpu.memory_space<vmem>>, vector<8x128xf32>
    tpu.vector_store %arg24[%c0_108, %c0_109], %141 {strides = array<i32>} : memref<8x128xf32, #tpu.memory_space<vmem>>, vector<8x128xf32>,
    %c0_110 = arith.constant 0 : index
    %c0_111 = arith.constant 0 : index
    %143 = vector.load %arg7[%c0_110, %c0_111] : memref<128x128xf32, #tpu.memory_space<vmem>>, vector<128x128xf32>
    %144 = arith.truncf %143 : vector<128x128xf32> to vector<128x128xbf16>
    %cst_112 = arith.constant dense<0.000000e+00> : vector<8x128xf32>
    %145 = tpu.matmul %135, %144, %cst_112 {dimension_numbers = #tpu.dot_dimension_numbers<[1], [0], [0], [1], [0, 0, 1, 1], [], []>} : vector<8x128xbf16>, vector<128x128xbf16>, vector<8x128xf32> -> vector<8x128xf32>
    %c0_113 = arith.constant 0 : index
    %c0_114 = arith.constant 0 : index
    %146 = vector.load %arg11[%c0_113, %c0_114] : memref<1x128xf32, #tpu.memory_space<vmem>>, vector<1x128xf32>
    %147 = vector.broadcast %146 : vector<1x128xf32> to vector<8x128xf32>
    %148 = arith.addf %145, %147 : vector<8x128xf32>
    %c0_115 = arith.constant 0 : index
    %c0_116 = arith.constant 0 : index
    %149 = vector.load %arg25[%c0_115, %c0_116] : memref<8x128xf32, #tpu.memory_space<vmem>>, vector<8x128xf32>
    tpu.vector_store %arg25[%c0_115, %c0_116], %148 {strides = array<i32>} : memref<8x128xf32, #tpu.memory_space<vmem>>, vector<8x128xf32>,
    %cst_117 = arith.constant 0.000000e+00 : f32
    %150 = vector.broadcast %cst_117 : f32 to vector<2x32xf32>
    %c0_118 = arith.constant 0 : index
    %c0_119 = arith.constant 0 : index
    %151 = vector.load %arg26[%c0_118, %c0_119] : memref<2x32xf32, #tpu.memory_space<vmem>>, vector<2x32xf32>
    tpu.vector_store %arg26[%c0_118, %c0_119], %150 {strides = array<i32>} : memref<2x32xf32, #tpu.memory_space<vmem>>, vector<2x32xf32>,
    %cst_120 = arith.constant 0.000000e+00 : f32
    %152 = vector.broadcast %cst_120 : f32 to vector<2x32xf32>
    %c0_121 = arith.constant 0 : index
    %c0_122 = arith.constant 0 : index
    %153 = vector.load %arg27[%c0_121, %c0_122] : memref<2x32xf32, #tpu.memory_space<vmem>>, vector<2x32xf32>
    tpu.vector_store %arg27[%c0_121, %c0_122], %152 {strides = array<i32>} : memref<2x32xf32, #tpu.memory_space<vmem>>, vector<2x32xf32>,
    %cst_123 = arith.constant 0.000000e+00 : f32
    %154 = vector.broadcast %cst_123 : f32 to vector<2x32xf32>
    %c0_124 = arith.constant 0 : index
    %c0_125 = arith.constant 0 : index
    %155 = vector.load %arg28[%c0_124, %c0_125] : memref<2x32xf32, #tpu.memory_space<vmem>>, vector<2x32xf32>
    tpu.vector_store %arg28[%c0_124, %c0_125], %154 {strides = array<i32>} : memref<2x32xf32, #tpu.memory_space<vmem>>, vector<2x32xf32>,
    %cst_126 = arith.constant 0.000000e+00 : f32
    %156 = vector.broadcast %cst_126 : f32 to vector<2x32xf32>
    %c0_127 = arith.constant 0 : index
    %c0_128 = arith.constant 0 : index
    %157 = vector.load %arg29[%c0_127, %c0_128] : memref<2x32xf32, #tpu.memory_space<vmem>>, vector<2x32xf32>
    tpu.vector_store %arg29[%c0_127, %c0_128], %156 {strides = array<i32>} : memref<2x32xf32, #tpu.memory_space<vmem>>, vector<2x32xf32>,
    %c0_129 = arith.constant 0 : index
    %c0_130 = arith.constant 0 : index
    %158 = vector.load %arg8[%c0_129, %c0_130] : memref<32x128xf32, #tpu.memory_space<vmem>>, vector<32x128xf32>
    %159 = arith.truncf %158 : vector<32x128xf32> to vector<32x128xbf16>
    %c0_131 = arith.constant 0 : index
    %c0_132 = arith.constant 0 : index
    %160 = vector.load %arg9[%c0_131, %c0_132] : memref<32x128xf32, #tpu.memory_space<vmem>>, vector<32x128xf32>
    %161 = arith.truncf %160 : vector<32x128xf32> to vector<32x128xbf16>
    %c0_i32 = arith.constant 0 : i32
    %c3_i32 = arith.constant 3 : i32
    %162 = arith.subi %c3_i32, %c0_i32 : i32
    %c2_i32 = arith.constant 2 : i32
    %163 = arith.muli %c0_i32, %c2_i32 : i32
    %164 = arith.index_cast %163 : i32 to index
    %c0_133 = arith.constant 0 : index
    %165 = vector.load %arg24[%164, %c0_133] : memref<8x128xf32, #tpu.memory_space<vmem>>, vector<2x128xf32>
    %c0_134 = arith.constant 0 : index
    %c0_135 = arith.constant 0 : index
    %166 = vector.load %arg26[%c0_134, %c0_135] : memref<2x32xf32, #tpu.memory_space<vmem>>, vector<2x32xf32>
    %167 = arith.truncf %166 : vector<2x32xf32> to vector<2x32xbf16>
    %cst_136 = arith.constant dense<0.000000e+00> : vector<2x128xf32>
    %168 = tpu.matmul %167, %159, %cst_136 {dimension_numbers = #tpu.dot_dimension_numbers<[1], [0], [0], [1], [0, 0, 1, 1], [], []>} : vector<2x32xbf16>, vector<32x128xbf16>, vector<2x128xf32> -> vector<2x128xf32>
    %169 = arith.addf %165, %168 : vector<2x128xf32>
    %c2_i32_137 = arith.constant 2 : i32
    %170 = arith.muli %162, %c2_i32_137 : i32
    %171 = arith.index_cast %170 : i32 to index
    %c0_138 = arith.constant 0 : index
    %172 = vector.load %arg25[%171, %c0_138] : memref<8x128xf32, #tpu.memory_space<vmem>>, vector<2x128xf32>
    %c0_139 = arith.constant 0 : index
    %c0_140 = arith.constant 0 : index
    %173 = vector.load %arg28[%c0_139, %c0_140] : memref<2x32xf32, #tpu.memory_space<vmem>>, vector<2x32xf32>
    %174 = arith.truncf %173 : vector<2x32xf32> to vector<2x32xbf16>
    %cst_141 = arith.constant dense<0.000000e+00> : vector<2x128xf32>
    %175 = tpu.matmul %174, %161, %cst_141 {dimension_numbers = #tpu.dot_dimension_numbers<[1], [0], [0], [1], [0, 0, 1, 1], [], []>} : vector<2x32xbf16>, vector<32x128xbf16>, vector<2x128xf32> -> vector<2x128xf32>
    %176 = arith.addf %172, %175 : vector<2x128xf32>
    %c0_142 = arith.constant 0 : index
    %c0_143 = arith.constant 0 : index
    %177 = vector.load %arg27[%c0_142, %c0_143] : memref<2x32xf32, #tpu.memory_space<vmem>>, vector<2x32xf32>
    %178 = vector.extract_strided_slice %169 {offsets = [0, 0], sizes = [2, 32], strides = [1, 1]} : vector<2x128xf32> to vector<2x32xf32>
    %179 = arith.negf %178 : vector<2x32xf32>
    %180 = math.exp %179 : vector<2x32xf32>
    %cst_144 = arith.constant 1.000000e+00 : f32
    %181 = vector.broadcast %cst_144 : f32 to vector<2x32xf32>
    %182 = arith.addf %181, %180 : vector<2x32xf32>
    %183 = arith.divf %181, %182 : vector<2x32xf32>
    %184 = vector.extract_strided_slice %169 {offsets = [0, 32], sizes = [2, 32], strides = [1, 1]} : vector<2x128xf32> to vector<2x32xf32>
    %185 = arith.negf %184 : vector<2x32xf32>
    %186 = math.exp %185 : vector<2x32xf32>
    %cst_145 = arith.constant 1.000000e+00 : f32
    %187 = vector.broadcast %cst_145 : f32 to vector<2x32xf32>
    %188 = arith.addf %187, %186 : vector<2x32xf32>
    %189 = arith.divf %187, %188 : vector<2x32xf32>
    %190 = vector.extract_strided_slice %169 {offsets = [0, 64], sizes = [2, 32], strides = [1, 1]} : vector<2x128xf32> to vector<2x32xf32>
    %191 = math.tanh %190 : vector<2x32xf32>
    %192 = vector.extract_strided_slice %169 {offsets = [0, 96], sizes = [2, 32], strides = [1, 1]} : vector<2x128xf32> to vector<2x32xf32>
    %193 = arith.negf %192 : vector<2x32xf32>
    %194 = math.exp %193 : vector<2x32xf32>
    %cst_146 = arith.constant 1.000000e+00 : f32
    %195 = vector.broadcast %cst_146 : f32 to vector<2x32xf32>
    %196 = arith.addf %195, %194 : vector<2x32xf32>
    %197 = arith.divf %195, %196 : vector<2x32xf32>
    %198 = arith.mulf %189, %177 : vector<2x32xf32>
    %199 = arith.mulf %183, %191 : vector<2x32xf32>
    %200 = arith.addf %198, %199 : vector<2x32xf32>
    %201 = math.tanh %200 : vector<2x32xf32>
    %202 = arith.mulf %197, %201 : vector<2x32xf32>
    %c0_147 = arith.constant 0 : index
    %c0_148 = arith.constant 0 : index
    %203 = vector.load %arg29[%c0_147, %c0_148] : memref<2x32xf32, #tpu.memory_space<vmem>>, vector<2x32xf32>
    %204 = vector.extract_strided_slice %176 {offsets = [0, 0], sizes = [2, 32], strides = [1, 1]} : vector<2x128xf32> to vector<2x32xf32>
    %205 = arith.negf %204 : vector<2x32xf32>
    %206 = math.exp %205 : vector<2x32xf32>
    %cst_149 = arith.constant 1.000000e+00 : f32
    %207 = vector.broadcast %cst_149 : f32 to vector<2x32xf32>
    %208 = arith.addf %207, %206 : vector<2x32xf32>
    %209 = arith.divf %207, %208 : vector<2x32xf32>
    %210 = vector.extract_strided_slice %176 {offsets = [0, 32], sizes = [2, 32], strides = [1, 1]} : vector<2x128xf32> to vector<2x32xf32>
    %211 = arith.negf %210 : vector<2x32xf32>
    %212 = math.exp %211 : vector<2x32xf32>
    %cst_150 = arith.constant 1.000000e+00 : f32
    %213 = vector.broadcast %cst_150 : f32 to vector<2x32xf32>
    %214 = arith.addf %213, %212 : vector<2x32xf32>
    %215 = arith.divf %213, %214 : vector<2x32xf32>
    %216 = vector.extract_strided_slice %176 {offsets = [0, 64], sizes = [2, 32], strides = [1, 1]} : vector<2x128xf32> to vector<2x32xf32>
    %217 = math.tanh %216 : vector<2x32xf32>
    %218 = vector.extract_strided_slice %176 {offsets = [0, 96], sizes = [2, 32], strides = [1, 1]} : vector<2x128xf32> to vector<2x32xf32>
    %219 = arith.negf %218 : vector<2x32xf32>
    %220 = math.exp %219 : vector<2x32xf32>
    %cst_151 = arith.constant 1.000000e+00 : f32
    %221 = vector.broadcast %cst_151 : f32 to vector<2x32xf32>
    %222 = arith.addf %221, %220 : vector<2x32xf32>
    %223 = arith.divf %221, %222 : vector<2x32xf32>
    %224 = arith.mulf %215, %203 : vector<2x32xf32>
    %225 = arith.mulf %209, %217 : vector<2x32xf32>
    %226 = arith.addf %224, %225 : vector<2x32xf32>
    %227 = math.tanh %226 : vector<2x32xf32>
    %228 = arith.mulf %223, %227 : vector<2x32xf32>
    %c0_152 = arith.constant 0 : index
    %c0_153 = arith.constant 0 : index
    %229 = vector.load %arg26[%c0_152, %c0_153] : memref<2x32xf32, #tpu.memory_space<vmem>>, vector<2x32xf32>
    tpu.vector_store %arg26[%c0_152, %c0_153], %202 {strides = array<i32>} : memref<2x32xf32, #tpu.memory_space<vmem>>, vector<2x32xf32>,
    %c0_154 = arith.constant 0 : index
    %c0_155 = arith.constant 0 : index
    %230 = vector.load %arg27[%c0_154, %c0_155] : memref<2x32xf32, #tpu.memory_space<vmem>>, vector<2x32xf32>
    tpu.vector_store %arg27[%c0_154, %c0_155], %200 {strides = array<i32>} : memref<2x32xf32, #tpu.memory_space<vmem>>, vector<2x32xf32>,
    %c0_156 = arith.constant 0 : index
    %c0_157 = arith.constant 0 : index
    %231 = vector.load %arg28[%c0_156, %c0_157] : memref<2x32xf32, #tpu.memory_space<vmem>>, vector<2x32xf32>
    tpu.vector_store %arg28[%c0_156, %c0_157], %228 {strides = array<i32>} : memref<2x32xf32, #tpu.memory_space<vmem>>, vector<2x32xf32>,
    %c0_158 = arith.constant 0 : index
    %c0_159 = arith.constant 0 : index
    %232 = vector.load %arg29[%c0_158, %c0_159] : memref<2x32xf32, #tpu.memory_space<vmem>>, vector<2x32xf32>
    tpu.vector_store %arg29[%c0_158, %c0_159], %226 {strides = array<i32>} : memref<2x32xf32, #tpu.memory_space<vmem>>, vector<2x32xf32>,
    %233 = arith.index_cast %c0_i32 : i32 to index
    %c0_160 = arith.constant 0 : index
    %c0_161 = arith.constant 0 : index
    %234 = vector.load %arg30[%233, %c0_160, %c0_161] : memref<4x2x32xf32, #tpu.memory_space<vmem>>, vector<1x2x32xf32>
    %235 = vector.shape_cast %234 : vector<1x2x32xf32> to vector<2x32xf32>
    %236 = vector.shape_cast %202 : vector<2x32xf32> to vector<1x2x32xf32>
    tpu.vector_store %arg30[%233, %c0_160, %c0_161], %236 {strides = array<i32>} : memref<4x2x32xf32, #tpu.memory_space<vmem>>, vector<1x2x32xf32>,
    %237 = arith.index_cast %162 : i32 to index
    %c0_162 = arith.constant 0 : index
    %c0_163 = arith.constant 0 : index
    %238 = vector.load %arg31[%237, %c0_162, %c0_163] : memref<4x2x32xf32, #tpu.memory_space<vmem>>, vector<1x2x32xf32>
    %239 = vector.shape_cast %238 : vector<1x2x32xf32> to vector<2x32xf32>
    %240 = vector.shape_cast %228 : vector<2x32xf32> to vector<1x2x32xf32>
    tpu.vector_store %arg31[%237, %c0_162, %c0_163], %240 {strides = array<i32>} : memref<4x2x32xf32, #tpu.memory_space<vmem>>, vector<1x2x32xf32>,
    %c1_i32 = arith.constant 1 : i32
    %c3_i32_164 = arith.constant 3 : i32
    %241 = arith.subi %c3_i32_164, %c1_i32 : i32
    %c2_i32_165 = arith.constant 2 : i32
    %242 = arith.muli %c1_i32, %c2_i32_165 : i32
    %243 = arith.index_cast %242 : i32 to index
    %c0_166 = arith.constant 0 : index
    %244 = vector.load %arg24[%243, %c0_166] : memref<8x128xf32, #tpu.memory_space<vmem>>, vector<2x128xf32>
    %c0_167 = arith.constant 0 : index
    %c0_168 = arith.constant 0 : index
    %245 = vector.load %arg26[%c0_167, %c0_168] : memref<2x32xf32, #tpu.memory_space<vmem>>, vector<2x32xf32>
    %246 = arith.truncf %245 : vector<2x32xf32> to vector<2x32xbf16>
    %cst_169 = arith.constant dense<0.000000e+00> : vector<2x128xf32>
    %247 = tpu.matmul %246, %159, %cst_169 {dimension_numbers = #tpu.dot_dimension_numbers<[1], [0], [0], [1], [0, 0, 1, 1], [], []>} : vector<2x32xbf16>, vector<32x128xbf16>, vector<2x128xf32> -> vector<2x128xf32>
    %248 = arith.addf %244, %247 : vector<2x128xf32>
    %c2_i32_170 = arith.constant 2 : i32
    %249 = arith.muli %241, %c2_i32_170 : i32
    %250 = arith.index_cast %249 : i32 to index
    %c0_171 = arith.constant 0 : index
    %251 = vector.load %arg25[%250, %c0_171] : memref<8x128xf32, #tpu.memory_space<vmem>>, vector<2x128xf32>
    %c0_172 = arith.constant 0 : index
    %c0_173 = arith.constant 0 : index
    %252 = vector.load %arg28[%c0_172, %c0_173] : memref<2x32xf32, #tpu.memory_space<vmem>>, vector<2x32xf32>
    %253 = arith.truncf %252 : vector<2x32xf32> to vector<2x32xbf16>
    %cst_174 = arith.constant dense<0.000000e+00> : vector<2x128xf32>
    %254 = tpu.matmul %253, %161, %cst_174 {dimension_numbers = #tpu.dot_dimension_numbers<[1], [0], [0], [1], [0, 0, 1, 1], [], []>} : vector<2x32xbf16>, vector<32x128xbf16>, vector<2x128xf32> -> vector<2x128xf32>
    %255 = arith.addf %251, %254 : vector<2x128xf32>
    %c0_175 = arith.constant 0 : index
    %c0_176 = arith.constant 0 : index
    %256 = vector.load %arg27[%c0_175, %c0_176] : memref<2x32xf32, #tpu.memory_space<vmem>>, vector<2x32xf32>
    %257 = vector.extract_strided_slice %248 {offsets = [0, 0], sizes = [2, 32], strides = [1, 1]} : vector<2x128xf32> to vector<2x32xf32>
    %258 = arith.negf %257 : vector<2x32xf32>
    %259 = math.exp %258 : vector<2x32xf32>
    %cst_177 = arith.constant 1.000000e+00 : f32
    %260 = vector.broadcast %cst_177 : f32 to vector<2x32xf32>
    %261 = arith.addf %260, %259 : vector<2x32xf32>
    %262 = arith.divf %260, %261 : vector<2x32xf32>
    %263 = vector.extract_strided_slice %248 {offsets = [0, 32], sizes = [2, 32], strides = [1, 1]} : vector<2x128xf32> to vector<2x32xf32>
    %264 = arith.negf %263 : vector<2x32xf32>
    %265 = math.exp %264 : vector<2x32xf32>
    %cst_178 = arith.constant 1.000000e+00 : f32
    %266 = vector.broadcast %cst_178 : f32 to vector<2x32xf32>
    %267 = arith.addf %266, %265 : vector<2x32xf32>
    %268 = arith.divf %266, %267 : vector<2x32xf32>
    %269 = vector.extract_strided_slice %248 {offsets = [0, 64], sizes = [2, 32], strides = [1, 1]} : vector<2x128xf32> to vector<2x32xf32>
    %270 = math.tanh %269 : vector<2x32xf32>
    %271 = vector.extract_strided_slice %248 {offsets = [0, 96], sizes = [2, 32], strides = [1, 1]} : vector<2x128xf32> to vector<2x32xf32>
    %272 = arith.negf %271 : vector<2x32xf32>
    %273 = math.exp %272 : vector<2x32xf32>
    %cst_179 = arith.constant 1.000000e+00 : f32
    %274 = vector.broadcast %cst_179 : f32 to vector<2x32xf32>
    %275 = arith.addf %274, %273 : vector<2x32xf32>
    %276 = arith.divf %274, %275 : vector<2x32xf32>
    %277 = arith.mulf %268, %256 : vector<2x32xf32>
    %278 = arith.mulf %262, %270 : vector<2x32xf32>
    %279 = arith.addf %277, %278 : vector<2x32xf32>
    %280 = math.tanh %279 : vector<2x32xf32>
    %281 = arith.mulf %276, %280 : vector<2x32xf32>
    %c0_180 = arith.constant 0 : index
    %c0_181 = arith.constant 0 : index
    %282 = vector.load %arg29[%c0_180, %c0_181] : memref<2x32xf32, #tpu.memory_space<vmem>>, vector<2x32xf32>
    %283 = vector.extract_strided_slice %255 {offsets = [0, 0], sizes = [2, 32], strides = [1, 1]} : vector<2x128xf32> to vector<2x32xf32>
    %284 = arith.negf %283 : vector<2x32xf32>
    %285 = math.exp %284 : vector<2x32xf32>
    %cst_182 = arith.constant 1.000000e+00 : f32
    %286 = vector.broadcast %cst_182 : f32 to vector<2x32xf32>
    %287 = arith.addf %286, %285 : vector<2x32xf32>
    %288 = arith.divf %286, %287 : vector<2x32xf32>
    %289 = vector.extract_strided_slice %255 {offsets = [0, 32], sizes = [2, 32], strides = [1, 1]} : vector<2x128xf32> to vector<2x32xf32>
    %290 = arith.negf %289 : vector<2x32xf32>
    %291 = math.exp %290 : vector<2x32xf32>
    %cst_183 = arith.constant 1.000000e+00 : f32
    %292 = vector.broadcast %cst_183 : f32 to vector<2x32xf32>
    %293 = arith.addf %292, %291 : vector<2x32xf32>
    %294 = arith.divf %292, %293 : vector<2x32xf32>
    %295 = vector.extract_strided_slice %255 {offsets = [0, 64], sizes = [2, 32], strides = [1, 1]} : vector<2x128xf32> to vector<2x32xf32>
    %296 = math.tanh %295 : vector<2x32xf32>
    %297 = vector.extract_strided_slice %255 {offsets = [0, 96], sizes = [2, 32], strides = [1, 1]} : vector<2x128xf32> to vector<2x32xf32>
    %298 = arith.negf %297 : vector<2x32xf32>
    %299 = math.exp %298 : vector<2x32xf32>
    %cst_184 = arith.constant 1.000000e+00 : f32
    %300 = vector.broadcast %cst_184 : f32 to vector<2x32xf32>
    %301 = arith.addf %300, %299 : vector<2x32xf32>
    %302 = arith.divf %300, %301 : vector<2x32xf32>
    %303 = arith.mulf %294, %282 : vector<2x32xf32>
    %304 = arith.mulf %288, %296 : vector<2x32xf32>
    %305 = arith.addf %303, %304 : vector<2x32xf32>
    %306 = math.tanh %305 : vector<2x32xf32>
    %307 = arith.mulf %302, %306 : vector<2x32xf32>
    %c0_185 = arith.constant 0 : index
    %c0_186 = arith.constant 0 : index
    %308 = vector.load %arg26[%c0_185, %c0_186] : memref<2x32xf32, #tpu.memory_space<vmem>>, vector<2x32xf32>
    tpu.vector_store %arg26[%c0_185, %c0_186], %281 {strides = array<i32>} : memref<2x32xf32, #tpu.memory_space<vmem>>, vector<2x32xf32>,
    %c0_187 = arith.constant 0 : index
    %c0_188 = arith.constant 0 : index
    %309 = vector.load %arg27[%c0_187, %c0_188] : memref<2x32xf32, #tpu.memory_space<vmem>>, vector<2x32xf32>
    tpu.vector_store %arg27[%c0_187, %c0_188], %279 {strides = array<i32>} : memref<2x32xf32, #tpu.memory_space<vmem>>, vector<2x32xf32>,
    %c0_189 = arith.constant 0 : index
    %c0_190 = arith.constant 0 : index
    %310 = vector.load %arg28[%c0_189, %c0_190] : memref<2x32xf32, #tpu.memory_space<vmem>>, vector<2x32xf32>
    tpu.vector_store %arg28[%c0_189, %c0_190], %307 {strides = array<i32>} : memref<2x32xf32, #tpu.memory_space<vmem>>, vector<2x32xf32>,
    %c0_191 = arith.constant 0 : index
    %c0_192 = arith.constant 0 : index
    %311 = vector.load %arg29[%c0_191, %c0_192] : memref<2x32xf32, #tpu.memory_space<vmem>>, vector<2x32xf32>
    tpu.vector_store %arg29[%c0_191, %c0_192], %305 {strides = array<i32>} : memref<2x32xf32, #tpu.memory_space<vmem>>, vector<2x32xf32>,
    %312 = arith.index_cast %c1_i32 : i32 to index
    %c0_193 = arith.constant 0 : index
    %c0_194 = arith.constant 0 : index
    %313 = vector.load %arg30[%312, %c0_193, %c0_194] : memref<4x2x32xf32, #tpu.memory_space<vmem>>, vector<1x2x32xf32>
    %314 = vector.shape_cast %313 : vector<1x2x32xf32> to vector<2x32xf32>
    %315 = vector.shape_cast %281 : vector<2x32xf32> to vector<1x2x32xf32>
    tpu.vector_store %arg30[%312, %c0_193, %c0_194], %315 {strides = array<i32>} : memref<4x2x32xf32, #tpu.memory_space<vmem>>, vector<1x2x32xf32>,
    %316 = arith.index_cast %241 : i32 to index
    %c0_195 = arith.constant 0 : index
    %c0_196 = arith.constant 0 : index
    %317 = vector.load %arg31[%316, %c0_195, %c0_196] : memref<4x2x32xf32, #tpu.memory_space<vmem>>, vector<1x2x32xf32>
    %318 = vector.shape_cast %317 : vector<1x2x32xf32> to vector<2x32xf32>
    %319 = vector.shape_cast %307 : vector<2x32xf32> to vector<1x2x32xf32>
    tpu.vector_store %arg31[%316, %c0_195, %c0_196], %319 {strides = array<i32>} : memref<4x2x32xf32, #tpu.memory_space<vmem>>, vector<1x2x32xf32>,
    %c2_i32_197 = arith.constant 2 : i32
    %c3_i32_198 = arith.constant 3 : i32
    %320 = arith.subi %c3_i32_198, %c2_i32_197 : i32
    %c2_i32_199 = arith.constant 2 : i32
    %321 = arith.muli %c2_i32_197, %c2_i32_199 : i32
    %322 = arith.index_cast %321 : i32 to index
    %c0_200 = arith.constant 0 : index
    %323 = vector.load %arg24[%322, %c0_200] : memref<8x128xf32, #tpu.memory_space<vmem>>, vector<2x128xf32>
    %c0_201 = arith.constant 0 : index
    %c0_202 = arith.constant 0 : index
    %324 = vector.load %arg26[%c0_201, %c0_202] : memref<2x32xf32, #tpu.memory_space<vmem>>, vector<2x32xf32>
    %325 = arith.truncf %324 : vector<2x32xf32> to vector<2x32xbf16>
    %cst_203 = arith.constant dense<0.000000e+00> : vector<2x128xf32>
    %326 = tpu.matmul %325, %159, %cst_203 {dimension_numbers = #tpu.dot_dimension_numbers<[1], [0], [0], [1], [0, 0, 1, 1], [], []>} : vector<2x32xbf16>, vector<32x128xbf16>, vector<2x128xf32> -> vector<2x128xf32>
    %327 = arith.addf %323, %326 : vector<2x128xf32>
    %c2_i32_204 = arith.constant 2 : i32
    %328 = arith.muli %320, %c2_i32_204 : i32
    %329 = arith.index_cast %328 : i32 to index
    %c0_205 = arith.constant 0 : index
    %330 = vector.load %arg25[%329, %c0_205] : memref<8x128xf32, #tpu.memory_space<vmem>>, vector<2x128xf32>
    %c0_206 = arith.constant 0 : index
    %c0_207 = arith.constant 0 : index
    %331 = vector.load %arg28[%c0_206, %c0_207] : memref<2x32xf32, #tpu.memory_space<vmem>>, vector<2x32xf32>
    %332 = arith.truncf %331 : vector<2x32xf32> to vector<2x32xbf16>
    %cst_208 = arith.constant dense<0.000000e+00> : vector<2x128xf32>
    %333 = tpu.matmul %332, %161, %cst_208 {dimension_numbers = #tpu.dot_dimension_numbers<[1], [0], [0], [1], [0, 0, 1, 1], [], []>} : vector<2x32xbf16>, vector<32x128xbf16>, vector<2x128xf32> -> vector<2x128xf32>
    %334 = arith.addf %330, %333 : vector<2x128xf32>
    %c0_209 = arith.constant 0 : index
    %c0_210 = arith.constant 0 : index
    %335 = vector.load %arg27[%c0_209, %c0_210] : memref<2x32xf32, #tpu.memory_space<vmem>>, vector<2x32xf32>
    %336 = vector.extract_strided_slice %327 {offsets = [0, 0], sizes = [2, 32], strides = [1, 1]} : vector<2x128xf32> to vector<2x32xf32>
    %337 = arith.negf %336 : vector<2x32xf32>
    %338 = math.exp %337 : vector<2x32xf32>
    %cst_211 = arith.constant 1.000000e+00 : f32
    %339 = vector.broadcast %cst_211 : f32 to vector<2x32xf32>
    %340 = arith.addf %339, %338 : vector<2x32xf32>
    %341 = arith.divf %339, %340 : vector<2x32xf32>
    %342 = vector.extract_strided_slice %327 {offsets = [0, 32], sizes = [2, 32], strides = [1, 1]} : vector<2x128xf32> to vector<2x32xf32>
    %343 = arith.negf %342 : vector<2x32xf32>
    %344 = math.exp %343 : vector<2x32xf32>
    %cst_212 = arith.constant 1.000000e+00 : f32
    %345 = vector.broadcast %cst_212 : f32 to vector<2x32xf32>
    %346 = arith.addf %345, %344 : vector<2x32xf32>
    %347 = arith.divf %345, %346 : vector<2x32xf32>
    %348 = vector.extract_strided_slice %327 {offsets = [0, 64], sizes = [2, 32], strides = [1, 1]} : vector<2x128xf32> to vector<2x32xf32>
    %349 = math.tanh %348 : vector<2x32xf32>
    %350 = vector.extract_strided_slice %327 {offsets = [0, 96], sizes = [2, 32], strides = [1, 1]} : vector<2x128xf32> to vector<2x32xf32>
    %351 = arith.negf %350 : vector<2x32xf32>
    %352 = math.exp %351 : vector<2x32xf32>
    %cst_213 = arith.constant 1.000000e+00 : f32
    %353 = vector.broadcast %cst_213 : f32 to vector<2x32xf32>
    %354 = arith.addf %353, %352 : vector<2x32xf32>
    %355 = arith.divf %353, %354 : vector<2x32xf32>
    %356 = arith.mulf %347, %335 : vector<2x32xf32>
    %357 = arith.mulf %341, %349 : vector<2x32xf32>
    %358 = arith.addf %356, %357 : vector<2x32xf32>
    %359 = math.tanh %358 : vector<2x32xf32>
    %360 = arith.mulf %355, %359 : vector<2x32xf32>
    %c0_214 = arith.constant 0 : index
    %c0_215 = arith.constant 0 : index
    %361 = vector.load %arg29[%c0_214, %c0_215] : memref<2x32xf32, #tpu.memory_space<vmem>>, vector<2x32xf32>
    %362 = vector.extract_strided_slice %334 {offsets = [0, 0], sizes = [2, 32], strides = [1, 1]} : vector<2x128xf32> to vector<2x32xf32>
    %363 = arith.negf %362 : vector<2x32xf32>
    %364 = math.exp %363 : vector<2x32xf32>
    %cst_216 = arith.constant 1.000000e+00 : f32
    %365 = vector.broadcast %cst_216 : f32 to vector<2x32xf32>
    %366 = arith.addf %365, %364 : vector<2x32xf32>
    %367 = arith.divf %365, %366 : vector<2x32xf32>
    %368 = vector.extract_strided_slice %334 {offsets = [0, 32], sizes = [2, 32], strides = [1, 1]} : vector<2x128xf32> to vector<2x32xf32>
    %369 = arith.negf %368 : vector<2x32xf32>
    %370 = math.exp %369 : vector<2x32xf32>
    %cst_217 = arith.constant 1.000000e+00 : f32
    %371 = vector.broadcast %cst_217 : f32 to vector<2x32xf32>
    %372 = arith.addf %371, %370 : vector<2x32xf32>
    %373 = arith.divf %371, %372 : vector<2x32xf32>
    %374 = vector.extract_strided_slice %334 {offsets = [0, 64], sizes = [2, 32], strides = [1, 1]} : vector<2x128xf32> to vector<2x32xf32>
    %375 = math.tanh %374 : vector<2x32xf32>
    %376 = vector.extract_strided_slice %334 {offsets = [0, 96], sizes = [2, 32], strides = [1, 1]} : vector<2x128xf32> to vector<2x32xf32>
    %377 = arith.negf %376 : vector<2x32xf32>
    %378 = math.exp %377 : vector<2x32xf32>
    %cst_218 = arith.constant 1.000000e+00 : f32
    %379 = vector.broadcast %cst_218 : f32 to vector<2x32xf32>
    %380 = arith.addf %379, %378 : vector<2x32xf32>
    %381 = arith.divf %379, %380 : vector<2x32xf32>
    %382 = arith.mulf %373, %361 : vector<2x32xf32>
    %383 = arith.mulf %367, %375 : vector<2x32xf32>
    %384 = arith.addf %382, %383 : vector<2x32xf32>
    %385 = math.tanh %384 : vector<2x32xf32>
    %386 = arith.mulf %381, %385 : vector<2x32xf32>
    %c0_219 = arith.constant 0 : index
    %c0_220 = arith.constant 0 : index
    %387 = vector.load %arg26[%c0_219, %c0_220] : memref<2x32xf32, #tpu.memory_space<vmem>>, vector<2x32xf32>
    tpu.vector_store %arg26[%c0_219, %c0_220], %360 {strides = array<i32>} : memref<2x32xf32, #tpu.memory_space<vmem>>, vector<2x32xf32>,
    %c0_221 = arith.constant 0 : index
    %c0_222 = arith.constant 0 : index
    %388 = vector.load %arg27[%c0_221, %c0_222] : memref<2x32xf32, #tpu.memory_space<vmem>>, vector<2x32xf32>
    tpu.vector_store %arg27[%c0_221, %c0_222], %358 {strides = array<i32>} : memref<2x32xf32, #tpu.memory_space<vmem>>, vector<2x32xf32>,
    %c0_223 = arith.constant 0 : index
    %c0_224 = arith.constant 0 : index
    %389 = vector.load %arg28[%c0_223, %c0_224] : memref<2x32xf32, #tpu.memory_space<vmem>>, vector<2x32xf32>
    tpu.vector_store %arg28[%c0_223, %c0_224], %386 {strides = array<i32>} : memref<2x32xf32, #tpu.memory_space<vmem>>, vector<2x32xf32>,
    %c0_225 = arith.constant 0 : index
    %c0_226 = arith.constant 0 : index
    %390 = vector.load %arg29[%c0_225, %c0_226] : memref<2x32xf32, #tpu.memory_space<vmem>>, vector<2x32xf32>
    tpu.vector_store %arg29[%c0_225, %c0_226], %384 {strides = array<i32>} : memref<2x32xf32, #tpu.memory_space<vmem>>, vector<2x32xf32>,
    %391 = arith.index_cast %c2_i32_197 : i32 to index
    %c0_227 = arith.constant 0 : index
    %c0_228 = arith.constant 0 : index
    %392 = vector.load %arg30[%391, %c0_227, %c0_228] : memref<4x2x32xf32, #tpu.memory_space<vmem>>, vector<1x2x32xf32>
    %393 = vector.shape_cast %392 : vector<1x2x32xf32> to vector<2x32xf32>
    %394 = vector.shape_cast %360 : vector<2x32xf32> to vector<1x2x32xf32>
    tpu.vector_store %arg30[%391, %c0_227, %c0_228], %394 {strides = array<i32>} : memref<4x2x32xf32, #tpu.memory_space<vmem>>, vector<1x2x32xf32>,
    %395 = arith.index_cast %320 : i32 to index
    %c0_229 = arith.constant 0 : index
    %c0_230 = arith.constant 0 : index
    %396 = vector.load %arg31[%395, %c0_229, %c0_230] : memref<4x2x32xf32, #tpu.memory_space<vmem>>, vector<1x2x32xf32>
    %397 = vector.shape_cast %396 : vector<1x2x32xf32> to vector<2x32xf32>
    %398 = vector.shape_cast %386 : vector<2x32xf32> to vector<1x2x32xf32>
    tpu.vector_store %arg31[%395, %c0_229, %c0_230], %398 {strides = array<i32>} : memref<4x2x32xf32, #tpu.memory_space<vmem>>, vector<1x2x32xf32>,
    %c3_i32_231 = arith.constant 3 : i32
    %c3_i32_232 = arith.constant 3 : i32
    %399 = arith.subi %c3_i32_232, %c3_i32_231 : i32
    %c2_i32_233 = arith.constant 2 : i32
    %400 = arith.muli %c3_i32_231, %c2_i32_233 : i32
    %401 = arith.index_cast %400 : i32 to index
    %c0_234 = arith.constant 0 : index
    %402 = vector.load %arg24[%401, %c0_234] : memref<8x128xf32, #tpu.memory_space<vmem>>, vector<2x128xf32>
    %c0_235 = arith.constant 0 : index
    %c0_236 = arith.constant 0 : index
    %403 = vector.load %arg26[%c0_235, %c0_236] : memref<2x32xf32, #tpu.memory_space<vmem>>, vector<2x32xf32>
    %404 = arith.truncf %403 : vector<2x32xf32> to vector<2x32xbf16>
    %cst_237 = arith.constant dense<0.000000e+00> : vector<2x128xf32>
    %405 = tpu.matmul %404, %159, %cst_237 {dimension_numbers = #tpu.dot_dimension_numbers<[1], [0], [0], [1], [0, 0, 1, 1], [], []>} : vector<2x32xbf16>, vector<32x128xbf16>, vector<2x128xf32> -> vector<2x128xf32>
    %406 = arith.addf %402, %405 : vector<2x128xf32>
    %c2_i32_238 = arith.constant 2 : i32
    %407 = arith.muli %399, %c2_i32_238 : i32
    %408 = arith.index_cast %407 : i32 to index
    %c0_239 = arith.constant 0 : index
    %409 = vector.load %arg25[%408, %c0_239] : memref<8x128xf32, #tpu.memory_space<vmem>>, vector<2x128xf32>
    %c0_240 = arith.constant 0 : index
    %c0_241 = arith.constant 0 : index
    %410 = vector.load %arg28[%c0_240, %c0_241] : memref<2x32xf32, #tpu.memory_space<vmem>>, vector<2x32xf32>
    %411 = arith.truncf %410 : vector<2x32xf32> to vector<2x32xbf16>
    %cst_242 = arith.constant dense<0.000000e+00> : vector<2x128xf32>
    %412 = tpu.matmul %411, %161, %cst_242 {dimension_numbers = #tpu.dot_dimension_numbers<[1], [0], [0], [1], [0, 0, 1, 1], [], []>} : vector<2x32xbf16>, vector<32x128xbf16>, vector<2x128xf32> -> vector<2x128xf32>
    %413 = arith.addf %409, %412 : vector<2x128xf32>
    %c0_243 = arith.constant 0 : index
    %c0_244 = arith.constant 0 : index
    %414 = vector.load %arg27[%c0_243, %c0_244] : memref<2x32xf32, #tpu.memory_space<vmem>>, vector<2x32xf32>
    %415 = vector.extract_strided_slice %406 {offsets = [0, 0], sizes = [2, 32], strides = [1, 1]} : vector<2x128xf32> to vector<2x32xf32>
    %416 = arith.negf %415 : vector<2x32xf32>
    %417 = math.exp %416 : vector<2x32xf32>
    %cst_245 = arith.constant 1.000000e+00 : f32
    %418 = vector.broadcast %cst_245 : f32 to vector<2x32xf32>
    %419 = arith.addf %418, %417 : vector<2x32xf32>
    %420 = arith.divf %418, %419 : vector<2x32xf32>
    %421 = vector.extract_strided_slice %406 {offsets = [0, 32], sizes = [2, 32], strides = [1, 1]} : vector<2x128xf32> to vector<2x32xf32>
    %422 = arith.negf %421 : vector<2x32xf32>
    %423 = math.exp %422 : vector<2x32xf32>
    %cst_246 = arith.constant 1.000000e+00 : f32
    %424 = vector.broadcast %cst_246 : f32 to vector<2x32xf32>
    %425 = arith.addf %424, %423 : vector<2x32xf32>
    %426 = arith.divf %424, %425 : vector<2x32xf32>
    %427 = vector.extract_strided_slice %406 {offsets = [0, 64], sizes = [2, 32], strides = [1, 1]} : vector<2x128xf32> to vector<2x32xf32>
    %428 = math.tanh %427 : vector<2x32xf32>
    %429 = vector.extract_strided_slice %406 {offsets = [0, 96], sizes = [2, 32], strides = [1, 1]} : vector<2x128xf32> to vector<2x32xf32>
    %430 = arith.negf %429 : vector<2x32xf32>
    %431 = math.exp %430 : vector<2x32xf32>
    %cst_247 = arith.constant 1.000000e+00 : f32
    %432 = vector.broadcast %cst_247 : f32 to vector<2x32xf32>
    %433 = arith.addf %432, %431 : vector<2x32xf32>
    %434 = arith.divf %432, %433 : vector<2x32xf32>
    %435 = arith.mulf %426, %414 : vector<2x32xf32>
    %436 = arith.mulf %420, %428 : vector<2x32xf32>
    %437 = arith.addf %435, %436 : vector<2x32xf32>
    %438 = math.tanh %437 : vector<2x32xf32>
    %439 = arith.mulf %434, %438 : vector<2x32xf32>
    %c0_248 = arith.constant 0 : index
    %c0_249 = arith.constant 0 : index
    %440 = vector.load %arg29[%c0_248, %c0_249] : memref<2x32xf32, #tpu.memory_space<vmem>>, vector<2x32xf32>
    %441 = vector.extract_strided_slice %413 {offsets = [0, 0], sizes = [2, 32], strides = [1, 1]} : vector<2x128xf32> to vector<2x32xf32>
    %442 = arith.negf %441 : vector<2x32xf32>
    %443 = math.exp %442 : vector<2x32xf32>
    %cst_250 = arith.constant 1.000000e+00 : f32
    %444 = vector.broadcast %cst_250 : f32 to vector<2x32xf32>
    %445 = arith.addf %444, %443 : vector<2x32xf32>
    %446 = arith.divf %444, %445 : vector<2x32xf32>
    %447 = vector.extract_strided_slice %413 {offsets = [0, 32], sizes = [2, 32], strides = [1, 1]} : vector<2x128xf32> to vector<2x32xf32>
    %448 = arith.negf %447 : vector<2x32xf32>
    %449 = math.exp %448 : vector<2x32xf32>
    %cst_251 = arith.constant 1.000000e+00 : f32
    %450 = vector.broadcast %cst_251 : f32 to vector<2x32xf32>
    %451 = arith.addf %450, %449 : vector<2x32xf32>
    %452 = arith.divf %450, %451 : vector<2x32xf32>
    %453 = vector.extract_strided_slice %413 {offsets = [0, 64], sizes = [2, 32], strides = [1, 1]} : vector<2x128xf32> to vector<2x32xf32>
    %454 = math.tanh %453 : vector<2x32xf32>
    %455 = vector.extract_strided_slice %413 {offsets = [0, 96], sizes = [2, 32], strides = [1, 1]} : vector<2x128xf32> to vector<2x32xf32>
    %456 = arith.negf %455 : vector<2x32xf32>
    %457 = math.exp %456 : vector<2x32xf32>
    %cst_252 = arith.constant 1.000000e+00 : f32
    %458 = vector.broadcast %cst_252 : f32 to vector<2x32xf32>
    %459 = arith.addf %458, %457 : vector<2x32xf32>
    %460 = arith.divf %458, %459 : vector<2x32xf32>
    %461 = arith.mulf %452, %440 : vector<2x32xf32>
    %462 = arith.mulf %446, %454 : vector<2x32xf32>
    %463 = arith.addf %461, %462 : vector<2x32xf32>
    %464 = math.tanh %463 : vector<2x32xf32>
    %465 = arith.mulf %460, %464 : vector<2x32xf32>
    %c0_253 = arith.constant 0 : index
    %c0_254 = arith.constant 0 : index
    %466 = vector.load %arg26[%c0_253, %c0_254] : memref<2x32xf32, #tpu.memory_space<vmem>>, vector<2x32xf32>
    tpu.vector_store %arg26[%c0_253, %c0_254], %439 {strides = array<i32>} : memref<2x32xf32, #tpu.memory_space<vmem>>, vector<2x32xf32>,
    %c0_255 = arith.constant 0 : index
    %c0_256 = arith.constant 0 : index
    %467 = vector.load %arg27[%c0_255, %c0_256] : memref<2x32xf32, #tpu.memory_space<vmem>>, vector<2x32xf32>
    tpu.vector_store %arg27[%c0_255, %c0_256], %437 {strides = array<i32>} : memref<2x32xf32, #tpu.memory_space<vmem>>, vector<2x32xf32>,
    %c0_257 = arith.constant 0 : index
    %c0_258 = arith.constant 0 : index
    %468 = vector.load %arg28[%c0_257, %c0_258] : memref<2x32xf32, #tpu.memory_space<vmem>>, vector<2x32xf32>
    tpu.vector_store %arg28[%c0_257, %c0_258], %465 {strides = array<i32>} : memref<2x32xf32, #tpu.memory_space<vmem>>, vector<2x32xf32>,
    %c0_259 = arith.constant 0 : index
    %c0_260 = arith.constant 0 : index
    %469 = vector.load %arg29[%c0_259, %c0_260] : memref<2x32xf32, #tpu.memory_space<vmem>>, vector<2x32xf32>
    tpu.vector_store %arg29[%c0_259, %c0_260], %463 {strides = array<i32>} : memref<2x32xf32, #tpu.memory_space<vmem>>, vector<2x32xf32>,
    %470 = arith.index_cast %c3_i32_231 : i32 to index
    %c0_261 = arith.constant 0 : index
    %c0_262 = arith.constant 0 : index
    %471 = vector.load %arg30[%470, %c0_261, %c0_262] : memref<4x2x32xf32, #tpu.memory_space<vmem>>, vector<1x2x32xf32>
    %472 = vector.shape_cast %471 : vector<1x2x32xf32> to vector<2x32xf32>
    %473 = vector.shape_cast %439 : vector<2x32xf32> to vector<1x2x32xf32>
    tpu.vector_store %arg30[%470, %c0_261, %c0_262], %473 {strides = array<i32>} : memref<4x2x32xf32, #tpu.memory_space<vmem>>, vector<1x2x32xf32>,
    %474 = arith.index_cast %399 : i32 to index
    %c0_263 = arith.constant 0 : index
    %c0_264 = arith.constant 0 : index
    %475 = vector.load %arg31[%474, %c0_263, %c0_264] : memref<4x2x32xf32, #tpu.memory_space<vmem>>, vector<1x2x32xf32>
    %476 = vector.shape_cast %475 : vector<1x2x32xf32> to vector<2x32xf32>
    %477 = vector.shape_cast %465 : vector<2x32xf32> to vector<1x2x32xf32>
    tpu.vector_store %arg31[%474, %c0_263, %c0_264], %477 {strides = array<i32>} : memref<4x2x32xf32, #tpu.memory_space<vmem>>, vector<1x2x32xf32>,
    %c4_i32 = arith.constant 4 : i32
    %c0_265 = arith.constant 0 : index
    %c0_266 = arith.constant 0 : index
    %c0_267 = arith.constant 0 : index
    %478 = vector.load %arg30[%c0_265, %c0_266, %c0_267] : memref<4x2x32xf32, #tpu.memory_space<vmem>>, vector<4x2x32xf32>
    %c0_268 = arith.constant 0 : index
    %c0_269 = arith.constant 0 : index
    %c0_270 = arith.constant 0 : index
    %479 = vector.load %arg31[%c0_268, %c0_269, %c0_270] : memref<4x2x32xf32, #tpu.memory_space<vmem>>, vector<4x2x32xf32>
    %c0_271 = arith.constant 0 : index
    %c0_272 = arith.constant 0 : index
    %480 = vector.load %arg12[%c0_271, %c0_272] : memref<1x64xf32, #tpu.memory_space<vmem>>, vector<1x64xf32>
    %481 = vector.extract_strided_slice %480 {offsets = [0, 0], sizes = [1, 32], strides = [1, 1]} : vector<1x64xf32> to vector<1x32xf32>
    %482 = vector.shape_cast %481 : vector<1x32xf32> to vector<1x1x32xf32>
    %483 = vector.extract_strided_slice %480 {offsets = [0, 32], sizes = [1, 32], strides = [1, 1]} : vector<1x64xf32> to vector<1x32xf32>
    %484 = vector.shape_cast %483 : vector<1x32xf32> to vector<1x1x32xf32>
    %485 = vector.broadcast %482 : vector<1x1x32xf32> to vector<4x2x32xf32>
    %486 = arith.mulf %478, %485 : vector<4x2x32xf32>
    %cst_273 = arith.constant dense<0.000000e+00> : vector<4x2xf32>
    %487 = vector.multi_reduction <add>, %486, %cst_273 [2] : vector<4x2x32xf32> to vector<4x2xf32>
    %488 = vector.shape_cast %487 : vector<4x2xf32> to vector<4x2x1xf32>
    %489 = vector.broadcast %484 : vector<1x1x32xf32> to vector<4x2x32xf32>
    %490 = arith.mulf %479, %489 : vector<4x2x32xf32>
    %cst_274 = arith.constant dense<0.000000e+00> : vector<4x2xf32>
    %491 = vector.multi_reduction <add>, %490, %cst_274 [2] : vector<4x2x32xf32> to vector<4x2xf32>
    %492 = vector.shape_cast %491 : vector<4x2xf32> to vector<4x2x1xf32>
    %493 = arith.addf %488, %492 : vector<4x2x1xf32>
    %c0_275 = arith.constant 0 : index
    %c0_276 = arith.constant 0 : index
    %494 = vector.load %arg13[%c0_275, %c0_276] : memref<1x1xf32, #tpu.memory_space<vmem>>, vector<1x1xf32>
    %495 = vector.shape_cast %494 : vector<1x1xf32> to vector<1x1x1xf32>
    %496 = vector.broadcast %495 : vector<1x1x1xf32> to vector<4x2x1xf32>
    %497 = arith.addf %493, %496 : vector<4x2x1xf32>
    %cst_277 = arith.constant dense<0xFF800000> : vector<2x1xf32>
    %498 = vector.multi_reduction <maximumf>, %497, %cst_277 [0] : vector<4x2x1xf32> to vector<2x1xf32>
    %499 = vector.shape_cast %498 : vector<2x1xf32> to vector<1x2x1xf32>
    %500 = vector.broadcast %499 : vector<1x2x1xf32> to vector<4x2x1xf32>
    %501 = arith.subf %497, %500 : vector<4x2x1xf32>
    %502 = math.exp %501 : vector<4x2x1xf32>
    %cst_278 = arith.constant dense<0.000000e+00> : vector<2x1xf32>
    %503 = vector.multi_reduction <add>, %502, %cst_278 [0] : vector<4x2x1xf32> to vector<2x1xf32>
    %504 = vector.shape_cast %503 : vector<2x1xf32> to vector<1x2x1xf32>
    %505 = tpu.reciprocal %504 {approx = true} : vector<1x2x1xf32> -> vector<1x2x1xf32>
    %506 = vector.broadcast %505 : vector<1x2x1xf32> to vector<4x2x1xf32>
    %507 = arith.mulf %502, %506 : vector<4x2x1xf32>
    %508 = vector.broadcast %507 : vector<4x2x1xf32> to vector<4x2x32xf32>
    %509 = arith.mulf %508, %478 : vector<4x2x32xf32>
    %cst_279 = arith.constant dense<0.000000e+00> : vector<2x32xf32>
    %510 = vector.multi_reduction <add>, %509, %cst_279 [0] : vector<4x2x32xf32> to vector<2x32xf32>
    %511 = vector.broadcast %507 : vector<4x2x1xf32> to vector<4x2x32xf32>
    %512 = arith.mulf %511, %479 : vector<4x2x32xf32>
    %cst_280 = arith.constant dense<0.000000e+00> : vector<2x32xf32>
    %513 = vector.multi_reduction <add>, %512, %cst_280 [0] : vector<4x2x32xf32> to vector<2x32xf32>
    %c0_281 = arith.constant 0 : index
    %c0_282 = arith.constant 0 : index
    %514 = vector.load %arg14[%c0_281, %c0_282] : memref<64x64xf32, #tpu.memory_space<vmem>>, vector<64x64xf32>
    %515 = arith.truncf %510 : vector<2x32xf32> to vector<2x32xbf16>
    %516 = vector.extract_strided_slice %514 {offsets = [0, 0], sizes = [32, 64], strides = [1, 1]} : vector<64x64xf32> to vector<32x64xf32>
    %517 = arith.truncf %516 : vector<32x64xf32> to vector<32x64xbf16>
    %cst_283 = arith.constant dense<0.000000e+00> : vector<2x64xf32>
    %518 = tpu.matmul %515, %517, %cst_283 {dimension_numbers = #tpu.dot_dimension_numbers<[1], [0], [0], [1], [0, 0, 1, 1], [], []>} : vector<2x32xbf16>, vector<32x64xbf16>, vector<2x64xf32> -> vector<2x64xf32>
    %519 = arith.truncf %513 : vector<2x32xf32> to vector<2x32xbf16>
    %520 = vector.extract_strided_slice %514 {offsets = [32, 0], sizes = [32, 64], strides = [1, 1]} : vector<64x64xf32> to vector<32x64xf32>
    %521 = arith.truncf %520 : vector<32x64xf32> to vector<32x64xbf16>
    %cst_284 = arith.constant dense<0.000000e+00> : vector<2x64xf32>
    %522 = tpu.matmul %519, %521, %cst_284 {dimension_numbers = #tpu.dot_dimension_numbers<[1], [0], [0], [1], [0, 0, 1, 1], [], []>} : vector<2x32xbf16>, vector<32x64xbf16>, vector<2x64xf32> -> vector<2x64xf32>
    %523 = arith.addf %518, %522 : vector<2x64xf32>
    %c0_285 = arith.constant 0 : index
    %c0_286 = arith.constant 0 : index
    %524 = vector.load %arg15[%c0_285, %c0_286] : memref<1x64xf32, #tpu.memory_space<vmem>>, vector<1x64xf32>
    %525 = vector.broadcast %524 : vector<1x64xf32> to vector<2x64xf32>
    %526 = arith.addf %523, %525 : vector<2x64xf32>
    %cst_287 = arith.constant 0.000000e+00 : f32
    %527 = vector.broadcast %cst_287 : f32 to vector<2x64xf32>
    %528 = arith.maximumf %526, %527 : vector<2x64xf32>
    %529 = arith.truncf %528 : vector<2x64xf32> to vector<2x64xbf16>
    %c0_288 = arith.constant 0 : index
    %c0_289 = arith.constant 0 : index
    %530 = vector.load %arg16[%c0_288, %c0_289] : memref<64x4xf32, #tpu.memory_space<vmem>>, vector<64x4xf32>
    %531 = arith.truncf %530 : vector<64x4xf32> to vector<64x4xbf16>
    %cst_290 = arith.constant dense<0.000000e+00> : vector<2x4xf32>
    %532 = tpu.matmul %529, %531, %cst_290 {dimension_numbers = #tpu.dot_dimension_numbers<[1], [0], [0], [1], [0, 0, 1, 1], [], []>} : vector<2x64xbf16>, vector<64x4xbf16>, vector<2x4xf32> -> vector<2x4xf32>
    %c0_291 = arith.constant 0 : index
    %c0_292 = arith.constant 0 : index
    %533 = vector.load %arg17[%c0_291, %c0_292] : memref<1x4xf32, #tpu.memory_space<vmem>>, vector<1x4xf32>
    %534 = vector.broadcast %533 : vector<1x4xf32> to vector<2x4xf32>
    %535 = arith.addf %532, %534 : vector<2x4xf32>
    %c0_293 = arith.constant 0 : index
    %c0_294 = arith.constant 0 : index
    %536 = vector.load %arg18[%c0_293, %c0_294] : memref<2x4xf32, #tpu.memory_space<vmem>>, vector<2x4xf32>
    tpu.vector_store %arg18[%c0_293, %c0_294], %535 {strides = array<i32>} : memref<2x4xf32, #tpu.memory_space<vmem>>, vector<2x4xf32>,
    return
  }
  func.func @transform_0(%arg0: i32) -> (i32, i32, i32) {
    %c0_i32 = arith.constant 0 : i32
    %c0_i32_0 = arith.constant 0 : i32
    %c0_i32_1 = arith.constant 0 : i32
    %c0_i32_2 = arith.constant 0 : i32
    return %c0_i32, %c0_i32_0, %c0_i32_1 : i32, i32, i32
  }
  func.func @transform_1(%arg0: i32) -> (i32, i32, i32) {
    %c0_i32 = arith.constant 0 : i32
    %c0_i32_0 = arith.constant 0 : i32
    %c0_i32_1 = arith.constant 0 : i32
    %c0_i32_2 = arith.constant 0 : i32
    return %c0_i32, %c0_i32_0, %c0_i32_1 : i32, i32, i32
  }
  func.func @transform_2(%arg0: i32) -> (i32, i32) {
    %c0_i32 = arith.constant 0 : i32
    %c0_i32_0 = arith.constant 0 : i32
    %c0_i32_1 = arith.constant 0 : i32
    return %c0_i32, %c0_i32_0 : i32, i32
  }
  func.func @transform_3(%arg0: i32) -> (i32, i32, i32) {
    %c0_i32 = arith.constant 0 : i32
    %c0_i32_0 = arith.constant 0 : i32
    %c0_i32_1 = arith.constant 0 : i32
    %c0_i32_2 = arith.constant 0 : i32
    return %c0_i32, %c0_i32_0, %c0_i32_1 : i32, i32, i32
  }
  func.func @transform_4(%arg0: i32) -> (i32, i32) {
    %c0_i32 = arith.constant 0 : i32
    %c0_i32_0 = arith.constant 0 : i32
    %c0_i32_1 = arith.constant 0 : i32
    return %c0_i32, %c0_i32_0 : i32, i32
  }
  func.func @transform_5(%arg0: i32) -> (i32, i32) {
    %c0_i32 = arith.constant 0 : i32
    %c0_i32_0 = arith.constant 0 : i32
    %c0_i32_1 = arith.constant 0 : i32
    return %c0_i32, %c0_i32_0 : i32, i32
  }
  func.func @transform_6(%arg0: i32) -> (i32, i32) {
    %c0_i32 = arith.constant 0 : i32
    %c0_i32_0 = arith.constant 0 : i32
    %c0_i32_1 = arith.constant 0 : i32
    return %c0_i32, %c0_i32_0 : i32, i32
  }
  func.func @transform_7(%arg0: i32) -> (i32, i32) {
    %c0_i32 = arith.constant 0 : i32
    %c0_i32_0 = arith.constant 0 : i32
    %c0_i32_1 = arith.constant 0 : i32
    return %c0_i32, %c0_i32_0 : i32, i32
  }
  func.func @transform_8(%arg0: i32) -> (i32, i32) {
    %c0_i32 = arith.constant 0 : i32
    %c0_i32_0 = arith.constant 0 : i32
    %c0_i32_1 = arith.constant 0 : i32
    return %c0_i32, %c0_i32_0 : i32, i32
  }
  func.func @transform_9(%arg0: i32) -> (i32, i32) {
    %c0_i32 = arith.constant 0 : i32
    %c0_i32_0 = arith.constant 0 : i32
    %c0_i32_1 = arith.constant 0 : i32
    return %c0_i32, %c0_i32_0 : i32, i32
  }
  func.func @transform_10(%arg0: i32) -> (i32, i32) {
    %c0_i32 = arith.constant 0 : i32
    %c0_i32_0 = arith.constant 0 : i32
    %c0_i32_1 = arith.constant 0 : i32
    return %c0_i32, %c0_i32_0 : i32, i32
  }
  func.func @transform_11(%arg0: i32) -> (i32, i32) {
    %c0_i32 = arith.constant 0 : i32
    %c0_i32_0 = arith.constant 0 : i32
    %c0_i32_1 = arith.constant 0 : i32
    return %c0_i32, %c0_i32_0 : i32, i32
  }
  func.func @transform_12(%arg0: i32) -> (i32, i32) {
    %c0_i32 = arith.constant 0 : i32
    %c0_i32_0 = arith.constant 0 : i32
    %c0_i32_1 = arith.constant 0 : i32
    return %c0_i32, %c0_i32_0 : i32, i32
  }
  func.func @transform_13(%arg0: i32) -> (i32, i32) {
    %c0_i32 = arith.constant 0 : i32
    %c0_i32_0 = arith.constant 0 : i32
    %c0_i32_1 = arith.constant 0 : i32
    return %c0_i32, %c0_i32_0 : i32, i32
  }
  func.func @transform_14(%arg0: i32) -> (i32, i32) {
    %c0_i32 = arith.constant 0 : i32
    %c0_i32_0 = arith.constant 0 : i32
    %c0_i32_1 = arith.constant 0 : i32
    return %c0_i32, %c0_i32_0 : i32, i32
  }
  func.func @transform_15(%arg0: i32) -> (i32, i32) {
    %c0_i32 = arith.constant 0 : i32
    %c0_i32_0 = arith.constant 0 : i32
    %c0_i32_1 = arith.constant 0 : i32
    return %c0_i32, %c0_i32_0 : i32, i32
  }
  func.func @transform_16(%arg0: i32) -> (i32, i32) {
    %c0_i32 = arith.constant 0 : i32
    %c0_i32_0 = arith.constant 0 : i32
    %c0_i32_1 = arith.constant 0 : i32
    return %c0_i32, %c0_i32_0 : i32, i32
  }
  func.func @transform_17(%arg0: i32) -> (i32, i32) {
    %c0_i32 = arith.constant 0 : i32
    %c0_i32_0 = arith.constant 0 : i32
    %c0_i32_1 = arith.constant 0 : i32
    return %c0_i32, %c0_i32_0 : i32, i32
  }
}

</mosaic_0001>

<bundles_post_ra>
// kernel: forward_fn.1
= control target key start
LH: loop header
LB: loop body
LE: loop exit
PB: predicated region body
PF: predicated region fallthrough
CT: control target
= control target key end

     0   :  { %s2233_s0 = inlined_call_operand.vmem [shape: f32[2,16,8], index: 0, kind: input, shape index: {}]   ;;  %s2234_s1 = inlined_call_operand.hbm [shape: f32[3,8,64], index: 1, kind: input, shape index: {}]   ;;  %s2235_s2 = inlined_call_operand.vmem [shape: f32[1,64], index: 2, kind: input, shape index: {}]   ;;  %s2236_s3 = inlined_call_operand.hbm [shape: f32[3,64,128], index: 3, kind: input, shape index: {}]   ;;  %s2237_s4 = inlined_call_operand.vmem [shape: f32[1,128], index: 4, kind: input, shape index: {}]   ;;  %s2238_s5 = inlined_call_operand.hbm [shape: f32[128,128], index: 5, kind: input, shape index: {}]   ;;  %s2239_s6 = inlined_call_operand.hbm [shape: f32[128,128], index: 6, kind: input, shape index: {}]   ;;  %s2240_s7 = inlined_call_operand.vmem [shape: f32[32,128], index: 7, kind: input, shape index: {}]   ;;  %s2241_s8 = inlined_call_operand.hbm [shape: f32[32,128], index: 8, kind: input, shape index: {}]   ;;  %s2242_s9 = inlined_call_operand.vmem [shape: f32[1,128], index: 9, kind: input, shape index: {}]   ;;  %s2243_s10 = inlined_call_operand.vmem [shape: f32[1,128], index: 10, kind: input, shape index: {}]   ;;  %s2244_s11 = inlined_call_operand.vmem [shape: f32[1,64], index: 11, kind: input, shape index: {}]   ;;  %s2245_s12 = inlined_call_operand.<no memory space> [shape: f32[1,1], index: 12, kind: input, shape index: {}]   ;;  %s2246_s13 = inlined_call_operand.vmem [shape: f32[64,64], index: 13, kind: input, shape index: {}]   ;;  %s2247_s14 = inlined_call_operand.vmem [shape: f32[1,64], index: 14, kind: input, shape index: {}]   ;;  %s2248_s15 = inlined_call_operand.vmem [shape: f32[64,4], index: 15, kind: input, shape index: {}]   ;;  %s2249_s16 = inlined_call_operand.vmem [shape: f32[1,4], index: 16, kind: input, shape index: {}]   ;;  %s2250_s17 = inlined_call_operand.hbm [shape: f32[2,4], index: 17, kind: output, shape index: {}]  }
   0x1   :  { %2252 = sst [smem:[#allocation30_spill]] %s2233_s0  ;;  %v22_v0 = vstv %s2245_s12 }
   0x2   :  { %2253 = sst [smem:[#allocation31_spill]] %s2234_s1  ;;  %23 = vst [vmem:[#allocation15] sm:$0x1] %v22_v0 }
   0x3   :  { %24 = vsyncpa [#allocation17], 0 }
   0x4   :  { %25 = vsyncpa [#allocation20], 0 }
   0x5   :  { %26 = vsyncpa [#allocation23], 0 }
   0x6   :  { %27 = vsyncpa [#allocation18], 0  ;;  %s49_s28 = sshll.u32 %s2236_s3, 4  ;;  %s1792_s29 = smov [#allocation19]   ;;  %s50_s28 = int_to_ptr.hbm [resolvable:$true] %s49_s28 }
   0x7   :  { %s51_s0 = sshll.u32 %s1792_s29, 4  ;;  %s77_s19 = sshll.u32 %s2239_s6, 4  ;;  %s52_s0 = int_to_ptr.vmem [resolvable:$true] %s51_s0  ;;  %s78_s19 = int_to_ptr.hbm [resolvable:$true] %s77_s19 }
   0x8   :  { %s1793_s1 = smov 128   ;;  %s1794_s20 = smov 8  }
   0x9   :  { %57 = dma.hbm_to_vmem [thread:$0]  %s50_s28, 3072, %s52_s0, [#allocation20], %s1793_s1, %s1793_s1, %s1794_s20  }
   0xa   :  { %s1795_s12 = smov [#allocation22]   ;;  %s2254_s24 = sld [smem:[#allocation31_spill]] }
   0xb   :  { %s79_s21 = sshll.u32 %s1795_s12, 4  ;;  %s64_s27 = sshll.u32 %s2238_s5, 4  ;;  %s80_s21 = int_to_ptr.vmem [resolvable:$true] %s79_s21  ;;  %s65_s27 = int_to_ptr.hbm [resolvable:$true] %s64_s27 }
   0xc   :  { %85 = dma.hbm_to_vmem [thread:$0]  %s78_s19, 2048, %s80_s21, [#allocation23], %s1793_s1, %s1793_s1, %s1794_s20  }
   0xd   :  { %s1796_s29 = smov [#allocation16]   ;;  %s1797_s6 = smov [#allocation21]  }
   0xe   :  { %s36_s30 = sshll.u32 %s1796_s29, 4  ;;  %s66_s28 = sshll.u32 %s1797_s6, 4  ;;  %s37_s30 = int_to_ptr.vmem [resolvable:$true] %s36_s30  ;;  %s67_s28 = int_to_ptr.vmem [resolvable:$true] %s66_s28 }
   0xf   :  { %s92_s12 = sshll.u32 %s2241_s8, 4  ;;  %s1798_s22 = smov [#allocation24]   ;;  %s93_s12 = int_to_ptr.hbm [resolvable:$true] %s92_s12 }
  0x10   :  { %s34_s25 = sshll.u32 %s2254_s24, 4  ;;  %s94_s19 = sshll.u32 %s1798_s22, 4  ;;  %s35_s25 = int_to_ptr.hbm [resolvable:$true] %s34_s25  ;;  %s95_s19 = int_to_ptr.vmem [resolvable:$true] %s94_s19 }
  0x11   :  { %42 = dma.hbm_to_vmem [thread:$0]  %s35_s25, 384, %s37_s30, [#allocation17], %s1793_s1, %s1793_s1, %s1794_s20  }
  0x12   :  { %72 = dma.hbm_to_vmem [thread:$0]  %s65_s27, 2048, %s67_s28, [#allocation20], %s1793_s1, %s1793_s1, %s1794_s20  }
  0x13   :  { %100 = dma.hbm_to_vmem [thread:$0]  %s93_s12, 512, %s95_s19, [#allocation23], %s1793_s1, %s1793_s1, %s1794_s20  }
  0x14   :  { %1784 = dma.done.wait [#allocation17], 384  }
  0x15   :  { %1785 = vsyncadd [#allocation17], 4294966912 }
  0x16   :  { %1786 = dma.done.wait [#allocation20], 5120  }
  0x17   :  { %1787 = vsyncadd [#allocation20], 4294962176 }
  0x18   :  { %1788 = dma.done.wait [#allocation23], 2560  }
  0x19   :  { %1789 = vsyncadd [#allocation23], 4294964736  ;;  %vm194_vm0 = vcmask 64512   ;;  %vm197_vm1 = vcmask 58368   ;;  %v1799_v1 = vmov 0.0   ;;  %v139_v2 = vld [vmem:[#allocation16 + $0x8] sm:$0xff] }
  0x1a   :  { %195 = vst.msk [vmem:[#allocation2] sm:$0xff] %vm194_vm0, %v1799_v1  ;;  %vm216_vm2 = vcmask 1043456   ;;  %v138_v3 = vld [vmem:[#allocation16] sm:$0xff]  ;;  %v140_v4 = vld [vmem:[#allocation16 + $0x10] sm:$0xff]  ;;  %v142_v5 = vpack.c.bf16 %v139_v2, %v139_v2  ;;  %s2255_s1 = sld [smem:[#allocation30_spill]]  ;;  %vm199_vm3 = vcmask 523264  }
  0x1b   :  { %196 = vst.msk [vmem:[#allocation2 + $0x8] sm:$0xff] %vm194_vm0, %v1799_v1  ;;  %v141_v6 = vpack.c.bf16 %v138_v3, %v138_v3  ;;  %v143_v7 = vpack.c.bf16 %v140_v4, %v140_v4  ;;  %v158_v24 = vld [vmem:[#allocation19 + $0x70] sm:$0xff]  ;;  %v159_v25 = vld [vmem:[#allocation19 + $0x78] sm:$0xff]  ;;  %v156_v42 = vld [vmem:[#allocation19 + $0x60] sm:$0xff]  ;;  %vm201_vm4 = vcmask 517120   ;;  %vm662_vm5 = vcmask 254976  }
  0x1c   :  { %198 = vst.msk [vmem:[#allocation2 + $0x10] sm:$0x3] %vm197_vm1, %v1799_v1  ;;  %v218_v10 = vsel %vm216_vm2, %v142_v5, 0  ;;  %v150_v26 = vld [vmem:[#allocation19 + $0x30] sm:$0xff]  ;;  %v182_v27 = vpack.c.bf16 %v158_v24, %v158_v24  ;;  %v183_v28 = vpack.c.bf16 %v159_v25, %v159_v25  ;;  %v151_v29 = vld [vmem:[#allocation19 + $0x38] sm:$0xff]  ;;  %v157_v43 = vld [vmem:[#allocation19 + $0x68] sm:$0xff]  ;;  %v180_v46 = vpack.c.bf16 %v156_v42, %v156_v42 }
  0x1d   :  { %v1925_v11 = vsel %vm216_vm2, %v141_v6, 0  ;;  %v1927_v12 = vsel %vm216_vm2, %v143_v7, 0  ;;  %227 = vmatpush.bf16.msra.mxu0 %v218_v10  ;;  %200 = vst.msk [vmem:[#allocation4] sm:$0xff] %vm199_vm3, %v1799_v1  ;;  %v174_v30 = vpack.c.bf16 %v150_v26, %v150_v26  ;;  %v166_v31 = vld [vmem:[#allocation19 + $0xb0] sm:$0xff]  ;;  %v167_v32 = vld [vmem:[#allocation19 + $0xb8] sm:$0xff]  ;;  %v175_v33 = vpack.c.bf16 %v151_v29, %v151_v29  ;;  %v148_v44 = vld [vmem:[#allocation19 + $0x20] sm:$0xff] }
  0x1e   :  { %247 = vmatpush.bf16.msra.mxu1 %v1925_v11  ;;  %270 = vmatpush.bf16.msra.mxu2 %v1927_v12  ;;  %v190_v34 = vpack.c.bf16 %v166_v31, %v166_v31  ;;  %v191_v35 = vpack.c.bf16 %v167_v32, %v167_v32  ;;  %v311_v36 = vunpack.c.l.b16 %v182_v27  ;;  %v312_v37 = vunpack.c.l.b16 %v183_v28  ;;  %v149_v48 = vld [vmem:[#allocation19 + $0x28] sm:$0xff]  ;;  %v164_v50 = vld [vmem:[#allocation19 + $0xa0] sm:$0xff]  ;;  %v154_v62 = vld [vmem:[#allocation19 + $0x50] sm:$0xff]  ;;  %202 = vst.msk [vmem:[#allocation4 + $0x8] sm:$0x3] %vm201_vm4, %v1799_v1  ;;  %s1801_s20 = smov 64  }
  0x1f   :  { %v351_v38 = vunpack.c.l.b16 %v174_v30  ;;  %v352_v39 = vunpack.c.l.b16 %v175_v33  ;;  %v181_v47 = vpack.c.bf16 %v157_v43, %v157_v43  ;;  %v172_v49 = vpack.c.bf16 %v148_v44, %v148_v44  ;;  %v165_v51 = vld [vmem:[#allocation19 + $0xa8] sm:$0xff]  ;;  %v155_v63 = vld [vmem:[#allocation19 + $0x58] sm:$0xff]  ;;  %v146_v0 = vld [vmem:[#allocation19 + $0x10] sm:$0xff]  ;;  %663 = vst.msk [vmem:[#allocation9] sm:$0x3] %vm662_vm5, %v1799_v1 }
  0x20   :  { %v203_v8 = vld [vmem:[%s2255_s1] sm:$0xff]  ;;  %v204_v9 = vld [vmem:[%s2255_s1 + $0x8] sm:$0xff]  ;;  %v1515_v13 = vld [vmem:[%s2255_s1 + $0x10] sm:$0xff]  ;;  %v393_v40 = vunpack.c.l.b16 %v190_v34  ;;  %v394_v41 = vunpack.c.l.b16 %v191_v35  ;;  %v1945_v45 = vpack.c.b16 %v312_v37, %v311_v36  ;;  %v173_v54 = vpack.c.bf16 %v149_v48, %v149_v48  ;;  %664 = vst.msk [vmem:[#allocation10] sm:$0x3] %vm662_vm5, %v1799_v1 }
  0x21   :  { %205 = vst.msk [vmem:[#allocation2 + $0x1] sm:$0xff] %vm194_vm0, %v203_v8  ;;  %v1516_v16 = vld [vmem:[%s2255_s1 + $0x18] sm:$0xff]  ;;  %v356_v52 = vpack.c.b16 %v352_v39, %v351_v38  ;;  %v188_v55 = vpack.c.bf16 %v164_v50, %v164_v50  ;;  %v309_v56 = vunpack.c.l.b16 %v180_v46  ;;  %v310_v57 = vunpack.c.l.b16 %v181_v47  ;;  %v147_v6 = vld [vmem:[#allocation19 + $0x18] sm:$0xff]  ;;  %v160_v27 = vld [vmem:[#allocation19 + $0x80] sm:$0xff] }
  0x22   :  { %206 = vst.msk [vmem:[#allocation2 + $0x9] sm:$0xff] %vm194_vm0, %v204_v9  ;;  %455 = vmatpush.bf16.msrb.mxu2 %v218_v10  ;;  %v1947_v53 = vpack.c.b16 %v394_v41, %v393_v40  ;;  %328 = vmatpush.bf16.msra.mxu3 %v1945_v45  ;;  %v349_v58 = vunpack.c.l.b16 %v172_v49  ;;  %v189_v59 = vpack.c.bf16 %v165_v51, %v165_v51  ;;  %v350_v60 = vunpack.c.l.b16 %v173_v54  ;;  %v162_v7 = vld [vmem:[#allocation19 + $0x90] sm:$0xff]  ;;  %v163_v8 = vld [vmem:[#allocation19 + $0x98] sm:$0xff]  ;;  %v161_v28 = vld [vmem:[#allocation19 + $0x88] sm:$0xff] }
  0x23   :  { %368 = vmatpush.bf16.msrb.mxu0 %v356_v52  ;;  %v391_v61 = vunpack.c.l.b16 %v188_v55  ;;  %v1951_v2 = vpack.c.b16 %v310_v57, %v309_v56  ;;  %v178_v4 = vpack.c.bf16 %v154_v62, %v154_v62  ;;  %v179_v5 = vpack.c.bf16 %v155_v63, %v155_v63  ;;  %v1964_v49 = vld [vmem:[%s2235_s2] ss:$0 sm:$0xff]  ;;  %665 = vst.msk [vmem:[#allocation11] sm:$0x3] %vm662_vm5, %v1799_v1 }
  0x24   :  { %410 = vmatpush.bf16.msrb.mxu1 %v1947_v53  ;;  %v392_v3 = vunpack.c.l.b16 %v189_v59  ;;  %v355_v9 = vpack.c.b16 %v350_v60, %v349_v58  ;;  %v170_v10 = vpack.c.bf16 %v146_v0, %v146_v0  ;;  %v184_v40 = vpack.c.bf16 %v160_v27, %v160_v27  ;;  %666 = vst.msk [vmem:[#allocation12] sm:$0x3] %vm662_vm5, %v1799_v1 }
  0x25   :  { %v185_v41 = vpack.c.bf16 %v161_v28, %v161_v28  ;;  %vm682_vm6 = vcmask 261120  }
  0x26   :  { %329 = vmatpush.bf16.msra.mxu3 %v1951_v2  ;;  %v387_v47 = vunpack.c.l.b16 %v184_v40 }
  0x27   :  { %369 = vmatpush.bf16.msrb.mxu0 %v355_v9  ;;  %v388_v48 = vunpack.c.l.b16 %v185_v41 }
  0x28   :  { %v210_v14 = vld [vmem:[#allocation2 + $0x1] sm:$0xff] }
  0x29   :  { %v207_v15 = vld [vmem:[#allocation2] sm:$0xff]  ;;  %v211_v17 = vld [vmem:[#allocation2 + $0x9] sm:$0xff] }
  0x2a   :  { %v208_v18 = vld [vmem:[#allocation2 + $0x8] sm:$0xff]  ;;  %v212_v20 = vpack.c.bf16 %v211_v17, %v210_v14  ;;  %v186_v14 = vpack.c.bf16 %v162_v7, %v162_v7  ;;  %v1954_v17 = vpack.c.b16 %v392_v3, %v391_v61 }
  0x2b   :  { %v254_v19 = vld [vmem:[#allocation2 + $0x2] sm:$0xff]  ;;  %v209_v21 = vpack.c.bf16 %v208_v18, %v207_v15  ;;  %v255_v22 = vld [vmem:[#allocation2 + $0xa] sm:$0xff]  ;;  %v307_v18 = vunpack.c.l.b16 %v178_v4 }
  0x2c   :  { %437 = vst.msk [vmem:[#allocation2 + $0x1] sm:$0xff] %vm194_vm0, %v1515_v13  ;;  %v256_v23 = vpack.c.bf16 %v255_v22, %v254_v19  ;;  %1509 = vmatmul.msk.bf16.vlgmr.msra.gmra.mxu0 %vm194_vm0, %v212_v20  ;;  %v171_v13 = vpack.c.bf16 %v147_v6, %v147_v6  ;;  %v152_v15 = vld [vmem:[#allocation19 + $0x40] sm:$0xff]  ;;  %v308_v19 = vunpack.c.l.b16 %v179_v5  ;;  %v187_v20 = vpack.c.bf16 %v163_v8, %v163_v8  ;;  %v145_v22 = vld [vmem:[#allocation19 + $0x8] sm:$0xff] }
  0x2d   :  { %438 = vst.msk [vmem:[#allocation2 + $0x9] sm:$0xff] %vm194_vm0, %v1516_v16  ;;  %1510 = vmatmul.msk.bf16.vlgmr.msra.gmra.mxu1 %vm194_vm0, %v209_v21  ;;  %v153_v16 = vld [vmem:[#allocation19 + $0x48] sm:$0xff]  ;;  %v144_v21 = vld [vmem:[#allocation19] sm:$0xff]  ;;  %v389_v25 = vunpack.c.l.b16 %v186_v14  ;;  %v176_v26 = vpack.c.bf16 %v152_v15, %v152_v15  ;;  %v169_v37 = vpack.c.bf16 %v145_v22, %v145_v22 }
  0x2e   :  { %1511 = vmatmul.msk.bf16.vlgmr.msra.gmra.mxu2 %vm194_vm0, %v256_v23  ;;  %v347_v23 = vunpack.c.l.b16 %v170_v10  ;;  %v348_v24 = vunpack.c.l.b16 %v171_v13  ;;  %411 = vmatpush.bf16.msrb.mxu1 %v1954_v17  ;;  %v314_v31 = vpack.c.b16 %v308_v19, %v307_v18  ;;  %v390_v32 = vunpack.c.l.b16 %v187_v20 }
  0x2f   :  { %538 = vmatpush.bf16.msra.mxu2 %v356_v52  ;;  %v177_v33 = vpack.c.bf16 %v153_v16, %v153_v16  ;;  %v305_v35 = vunpack.c.l.b16 %v176_v26  ;;  %v168_v36 = vpack.c.bf16 %v144_v21, %v144_v21  ;;  %v346_v44 = vunpack.c.l.b16 %v169_v37 }
  0x30   :  { %v354_v34 = vpack.c.b16 %v348_v24, %v347_v23  ;;  %330 = vmatpush.bf16.msra.mxu3 %v314_v31  ;;  %v1957_v38 = vpack.c.b16 %v390_v32, %v389_v25  ;;  %v395_v52 = vpack.c.b16 %v388_v48, %v387_v47 }
  0x31   :  { %v306_v39 = vunpack.c.l.b16 %v177_v33  ;;  %v345_v43 = vunpack.c.l.b16 %v168_v36 }
  0x32   :  { %370 = vmatpush.bf16.msrb.mxu0 %v354_v34  ;;  %412 = vmatpush.bf16.msrb.mxu1 %v1957_v38 }
  0x33   :  { %539 = vmatpush.bf16.msra.mxu2 %v355_v9  ;;  %v313_v46 = vpack.c.b16 %v306_v39, %v305_v35  ;;  %v353_v50 = vpack.c.b16 %v346_v44, %v345_v43  ;;  %v442_v58 = vld [vmem:[#allocation2 + $0x1] sm:$0xff] }
  0x34   :  { %v443_v59 = vld [vmem:[#allocation2 + $0x9] sm:$0xff]  ;;  %v439_v10 = vld [vmem:[#allocation2] sm:$0xff] }
  0x35   :  { %331 = vmatpush.bf16.msra.mxu3 %v313_v46  ;;  %v444_v61 = vpack.c.bf16 %v443_v59, %v442_v58  ;;  %v440_v13 = vld [vmem:[#allocation2 + $0x8] sm:$0xff]  ;;  %v634_v58 = vld [vmem:[#allocation22 + $0x70] sm:$0xff] }
  0x36   :  { %371 = vmatpush.bf16.msrb.mxu0 %v353_v50  ;;  %413 = vmatpush.bf16.msrb.mxu1 %v395_v52  ;;  %v479_v14 = vld [vmem:[#allocation2 + $0x2] sm:$0xff]  ;;  %v480_v15 = vld [vmem:[#allocation2 + $0xa] sm:$0xff]  ;;  %v441_v16 = vpack.c.bf16 %v440_v13, %v439_v10 }
  0x37   :  { %540 = vmatpush.bf16.msra.mxu2 %v354_v34  ;;  %v481_v18 = vpack.c.bf16 %v480_v15, %v479_v14  ;;  %v628_v10 = vld [vmem:[#allocation22 + $0x40] sm:$0xff]  ;;  %v629_v14 = vld [vmem:[#allocation22 + $0x48] sm:$0xff] }
  0x38   :  { %v640_v15 = vpack.c.bf16 %v629_v14, %v628_v10  ;;  %v1561_v14 = vld [vmem:[%s2243_s10] ss:$0 sm:$0xff] }
  0x39   :  { %472 = vmatpush.bf16.msrb.mxu3 %v1925_v11 }
  0x3a   :  { %492 = vmatpush.bf16.msra.mxu0 %v1927_v12  ;;  %522 = vmatpush.bf16.msra.mxu1 %v1945_v45 }
  0x3b   :  { %541 = vmatpush.bf16.msra.mxu2 %v353_v50 }
  0x3e   :  { %1517 = vmatmul.msk.bf16.vlgmr.msrb.gmra.mxu2 %vm194_vm0, %v444_v61  ;;  %523 = vmatpush.bf16.msra.mxu1 %v1951_v2 }
  0x42   :  { %524 = vmatpush.bf16.msra.mxu1 %v314_v31 }
  0x46   :  { %525 = vmatpush.bf16.msra.mxu1 %v313_v46 }
  0xa9   :  { %v229_v29 = vpop.f32.mrf.mxu0 }
  0xaa   :  { %v249_v30 = vpop.f32.mrf.mxu1 }
  0xab   :  { %v250_v42 = vadd.f32 %v249_v30, %v229_v29 }
  0xb1   :  { %v272_v51 = vpop.f32.mrf.mxu2  ;;  %v231_v56 = vpop.f32.mrf.mxu0 }
  0xb2   :  { %v277_v54 = vadd.f32 %v272_v51, %v250_v42  ;;  %v251_v57 = vpop.f32.mrf.mxu1 }
  0xb3   :  { %v252_v62 = vadd.f32 %v251_v57, %v231_v56  ;;  %v593_v57 = vld [vmem:[#allocation21 + $0x78] sm:$0xff] }
  0xb4   :  { %v282_v55 = vadd.f32 %v1964_v49, %v277_v54 }
  0xb6   :  { %v284_v60 = vmax.f32 %v282_v55, 0.0 }
  0xb8   :  { %286 = vst.msk [vmem:[#allocation3] sm:$0xff] %vm199_vm3, %v284_v60  ;;  %v635_v60 = vld [vmem:[#allocation22 + $0x78] sm:$0xff] }
  0xb9   :  { %v274_v11 = vpop.f32.mrf.mxu2  ;;  %v643_v61 = vpack.c.bf16 %v635_v60, %v634_v58  ;;  %v720_v58 = vld [vmem:[#allocation10] sm:$0x3] }
  0xba   :  { %v278_v12 = vadd.f32 %v274_v11, %v252_v62  ;;  %v590_v62 = vld [vmem:[#allocation21 + $0x60] sm:$0xff]  ;;  %v591_v11 = vld [vmem:[#allocation21 + $0x68] sm:$0xff] }
  0xbc   :  { %v283_v63 = vadd.f32 %v1964_v49, %v278_v12  ;;  %v632_v12 = vld [vmem:[#allocation22 + $0x60] sm:$0xff] }
  0xbe   :  { %v285_v45 = vmax.f32 %v283_v63, 0.0  ;;  %v600_v63 = vpack.c.bf16 %v591_v11, %v590_v62 }
  0xc0   :  { %287 = vst.msk [vmem:[#allocation3 + $0x8] sm:$0xff] %vm199_vm3, %v285_v45  ;;  %v633_v45 = vld [vmem:[#allocation22 + $0x68] sm:$0xff] }
  0xc1   :  { %v457_v28 = vpop.f32.mrf.mxu2 }
  0xc7   :  { %v288_v0 = vld [vmem:[#allocation3] ss:$2 sm:$0xff]  ;;  %v290_v3 = vld [vmem:[#allocation3 + $0x1] ss:$2 sm:$0xff] }
  0xc8   :  { %v291_v4 = vmax.f32 %v288_v0, %v290_v3  ;;  %v642_v0 = vpack.c.bf16 %v633_v45, %v632_v12  ;;  %v588_v3 = vld [vmem:[#allocation21 + $0x50] sm:$0xff] }
  0xca   :  { %292 = vst.msk [vmem:[#allocation4 + $0x1] sm:$0xff] %vm199_vm3, %v291_v4  ;;  %v589_v4 = vld [vmem:[#allocation21 + $0x58] sm:$0xff] }
  0xd1   :  { %v295_v5 = vld [vmem:[#allocation4 + $0x1] sm:$0xff] }
  0xd2   :  { %v293_v6 = vld [vmem:[#allocation4] sm:$0xff]  ;;  %v296_v8 = vpack.c.bf16 %v295_v5, %v295_v5  ;;  %v630_v5 = vld [vmem:[#allocation22 + $0x50] sm:$0xff] }
  0xd3   :  { %v377_v7 = vld [vmem:[#allocation4 + $0x2] sm:$0xff]  ;;  %v294_v9 = vpack.c.bf16 %v293_v6, %v293_v6  ;;  %v599_v6 = vpack.c.bf16 %v589_v4, %v588_v3 }
  0xd4   :  { %v378_v2 = vpack.c.bf16 %v377_v7, %v377_v7  ;;  %1512 = vmatmul.msk.bf16.vlgmr.msra.gmra.mxu3 %vm199_vm3, %v296_v8  ;;  %v631_v7 = vld [vmem:[#allocation22 + $0x58] sm:$0xff] }
  0xd5   :  { %1513 = vmatmul.msk.bf16.vlgmr.msrb.gmra.mxu0 %vm199_vm3, %v294_v9  ;;  %556 = vmatpush.bf16.msra.mxu3 %v1947_v53  ;;  %v1987_v53 = vld [vmem:[%s2237_s4] ss:$0 sm:$0xff]  ;;  %v641_v8 = vpack.c.bf16 %v631_v7, %v630_v5  ;;  %v586_v9 = vld [vmem:[#allocation21 + $0x40] sm:$0xff] }
  0xd6   :  { %1514 = vmatmul.msk.bf16.vlgmr.msrb.gmra.mxu1 %vm199_vm3, %v378_v2  ;;  %v587_v2 = vld [vmem:[#allocation21 + $0x48] sm:$0xff] }
  0xd7   :  { %648 = vmatpush.bf16.msrb.mxu1 %v643_v61  ;;  %v598_v13 = vpack.c.bf16 %v587_v2, %v586_v9 }
  0xd9   :  { %557 = vmatpush.bf16.msra.mxu3 %v1954_v17 }
  0xdb   :  { %649 = vmatpush.bf16.msrb.mxu1 %v642_v0 }
  0xdd   :  { %558 = vmatpush.bf16.msra.mxu3 %v1957_v38  ;;  %v459_v38 = vpop.f32.mrf.mxu2 }
  0xdf   :  { %650 = vmatpush.bf16.msrb.mxu1 %v641_v8 }
  0xe1   :  { %559 = vmatpush.bf16.msra.mxu3 %v395_v52 }
  0xe3   :  { %651 = vmatpush.bf16.msrb.mxu1 %v640_v15 }
  0xe4   :  { %1518 = vmatmul.msk.bf16.vlgmr.msrb.gmra.mxu3 %vm194_vm0, %v441_v16  ;;  %v584_v16 = vld [vmem:[#allocation21 + $0x30] sm:$0xff] }
  0xe5   :  { %1519 = vmatmul.msk.bf16.vlgmr.msra.gmra.mxu0 %vm194_vm0, %v481_v18  ;;  %v585_v18 = vld [vmem:[#allocation21 + $0x38] sm:$0xff] }
 0x152   :  { %v373_v19 = vpop.f32.mrf.mxu0 }
 0x153   :  { %v415_v20 = vpop.f32.mrf.mxu1 }
 0x157   :  { %v333_v21 = vpop.f32.mrf.mxu3 }
 0x158   :  { %v374_v22 = vadd.f32 %v373_v19, %v333_v21  ;;  %v626_v19 = vld [vmem:[#allocation22 + $0x30] sm:$0xff]  ;;  %v627_v21 = vld [vmem:[#allocation22 + $0x38] sm:$0xff] }
 0x15a   :  { %v375_v17 = vpop.f32.mrf.mxu0  ;;  %v419_v23 = vadd.f32 %v415_v20, %v374_v22  ;;  %v597_v20 = vpack.c.bf16 %v585_v18, %v584_v16  ;;  %v639_v22 = vpack.c.bf16 %v627_v21, %v626_v19 }
 0x15b   :  { %v417_v24 = vpop.f32.mrf.mxu1  ;;  %v669_v17 = vld [vmem:[%s2240_s7 + $0x10] sm:$0xff] }
 0x15c   :  { %v423_v25 = vadd.f32 %v1987_v53, %v419_v23  ;;  %v670_v23 = vld [vmem:[%s2240_s7 + $0x18] sm:$0xff]  ;;  %v582_v24 = vld [vmem:[#allocation21 + $0x20] sm:$0xff]  ;;  %652 = vmatpush.bf16.msrb.mxu1 %v639_v22 }
 0x15e   :  { %v424_v26 = vmax.f32 %v423_v25, 0.0  ;;  %v672_v25 = vpack.c.bf16 %v670_v23, %v669_v17 }
 0x15f   :  { %v335_v27 = vpop.f32.mrf.mxu3 }
 0x160   :  { %425 = vst [vmem:[#allocation5] sm:$0xff] %v424_v26  ;;  %v583_v26 = vld [vmem:[#allocation21 + $0x28] sm:$0xff]  ;;  %v624_v27 = vld [vmem:[#allocation22 + $0x20] sm:$0xff]  ;;  %692 = vmatpush.bf16.msrb.mxu2 %v672_v25 }
 0x162   :  { %v494_v29 = vpop.f32.mrf.mxu0 }
 0x167   :  { %v474_v30 = vpop.f32.mrf.mxu3  ;;  %v426_v31 = vld [vmem:[#allocation5] ss:$2 sm:$0xf]  ;;  %v428_v32 = vld [vmem:[#allocation5 + $0x1] ss:$2 sm:$0xf] }
 0x168   :  { %v475_v33 = vadd.f32 %v474_v30, %v457_v28  ;;  %v429_v34 = vmax.f32 %v426_v31, %v428_v32  ;;  %v625_v28 = vld [vmem:[#allocation22 + $0x28] sm:$0xff]  ;;  %v580_v31 = vld [vmem:[#allocation21 + $0x10] sm:$0xff]  ;;  %v581_v32 = vld [vmem:[#allocation21 + $0x18] sm:$0xff] }
 0x169   :  { %v638_v30 = vpack.c.bf16 %v625_v28, %v624_v27 }
 0x16a   :  { %v499_v35 = vadd.f32 %v494_v29, %v475_v33  ;;  %430 = vst [vmem:[#allocation6] sm:$0x1] %v429_v34  ;;  %v496_v41 = vpop.f32.mrf.mxu0  ;;  %v596_v29 = vpack.c.bf16 %v583_v26, %v582_v24  ;;  %v622_v33 = vld [vmem:[#allocation22 + $0x10] sm:$0xff] }
 0x16b   :  { %431 = vst [vmem:[#allocation6 + $0x1] sm:$0x2] %v429_v34  ;;  %653 = vmatpush.bf16.msrb.mxu1 %v638_v30 }
 0x16c   :  { %v501_v36 = vadd.f32 %v1964_v49, %v499_v35  ;;  %432 = vst [vmem:[#allocation6 + $0x2] sm:$0x4] %v429_v34  ;;  %v667_v35 = vld [vmem:[%s2240_s7] sm:$0xff] }
 0x16d   :  { %433 = vst [vmem:[#allocation6 + $0x3] sm:$0x8] %v429_v34  ;;  %v623_v34 = vld [vmem:[#allocation22 + $0x18] sm:$0xff] }
 0x16e   :  { %v503_v37 = vmax.f32 %v501_v36, 0.0  ;;  %v668_v36 = vld [vmem:[%s2240_s7 + $0x8] sm:$0xff]  ;;  %s1800_s7 = smov 32  }
 0x16f   :  { %v476_v39 = vpop.f32.mrf.mxu3  ;;  %742 = vrot.lane.b32.xlu1 %v720_v58, %s1800_s7 }
 0x170   :  { %505 = vst.msk [vmem:[#allocation3] sm:$0xff] %vm199_vm3, %v503_v37  ;;  %v477_v40 = vadd.f32 %v476_v39, %v459_v38  ;;  %v671_v37 = vpack.c.bf16 %v668_v36, %v667_v35  ;;  %v675_v38 = vld [vmem:[#allocation24 + $0x10] sm:$0xff]  ;;  %v676_v39 = vld [vmem:[#allocation24 + $0x18] sm:$0xff] }
 0x172   :  { %v500_v42 = vadd.f32 %v496_v41, %v477_v40  ;;  %v595_v40 = vpack.c.bf16 %v581_v32, %v580_v31  ;;  %v678_v41 = vpack.c.bf16 %v676_v39, %v675_v38  ;;  %693 = vmatpush.bf16.msrb.mxu2 %v671_v37 }
 0x174   :  { %v502_v43 = vadd.f32 %v1964_v49, %v500_v42  ;;  %v592_v49 = vld [vmem:[#allocation21 + $0x70] sm:$0xff]  ;;  %v637_v42 = vpack.c.bf16 %v623_v34, %v622_v33  ;;  %712 = vmatpush.bf16.msrb.mxu3 %v678_v41 }
 0x175   :  { %v601_v59 = vpack.c.bf16 %v593_v57, %v592_v49  ;;  %v701_v57 = vld [vmem:[#allocation11] sm:$0x3] }
 0x176   :  { %v504_v44 = vmax.f32 %v502_v43, 0.0  ;;  %v578_v43 = vld [vmem:[#allocation21] sm:$0xff]  ;;  %654 = vmatpush.bf16.msrb.mxu1 %v637_v42  ;;  %v702_v61 = vpack.c.bf16 %v701_v57, %v701_v57 }
 0x177   :  { %606 = vmatpush.bf16.msrb.mxu0 %v601_v59 }
 0x178   :  { %506 = vst.msk [vmem:[#allocation3 + $0x8] sm:$0xff] %vm199_vm3, %v504_v44  ;;  %v579_v44 = vld [vmem:[#allocation21 + $0x8] sm:$0xff] }
 0x17b   :  { %607 = vmatpush.bf16.msrb.mxu0 %v600_v63  ;;  %v762_v63 = vld [vmem:[#allocation12] sm:$0x3] }
 0x17c   :  { %784 = vrot.lane.b32.xlu1 %v762_v63, %s1800_s7 }
 0x17f   :  { %v507_v46 = vld [vmem:[#allocation3] ss:$2 sm:$0xff]  ;;  %v508_v47 = vld [vmem:[#allocation3 + $0x1] ss:$2 sm:$0xff]  ;;  %608 = vmatpush.bf16.msrb.mxu0 %v599_v6 }
 0x180   :  { %v509_v48 = vmax.f32 %v507_v46, %v508_v47  ;;  %v620_v46 = vld [vmem:[#allocation22] sm:$0xff]  ;;  %v621_v47 = vld [vmem:[#allocation22 + $0x8] sm:$0xff] }
 0x182   :  { %510 = vst.msk [vmem:[#allocation4 + $0x1] sm:$0xff] %vm199_vm3, %v509_v48  ;;  %v680_v48 = vld [vmem:[#allocation9] sm:$0x3] }
 0x183   :  { %609 = vmatpush.bf16.msrb.mxu0 %v598_v13  ;;  %v1560_v13 = vld [vmem:[%s2242_s9] ss:$0 sm:$0xff]  ;;  %s1802_s9 = smov 96  }
 0x187   :  { %610 = vmatpush.bf16.msrb.mxu0 %v597_v20 }
 0x189   :  { %v513_v50 = vld [vmem:[#allocation4 + $0x1] sm:$0xff] }
 0x18a   :  { %v511_v51 = vld [vmem:[#allocation4] sm:$0xff]  ;;  %v514_v54 = vpack.c.bf16 %v513_v50, %v513_v50  ;;  %v681_v50 = vpack.c.bf16 %v680_v48, %v680_v48 }
 0x18b   :  { %v547_v52 = vld [vmem:[#allocation4 + $0x2] sm:$0xff]  ;;  %v512_v55 = vpack.c.bf16 %v511_v51, %v511_v51  ;;  %611 = vmatpush.bf16.msrb.mxu0 %v596_v29  ;;  %v594_v51 = vpack.c.bf16 %v579_v44, %v578_v43 }
 0x18c   :  { %v548_v56 = vpack.c.bf16 %v547_v52, %v547_v52  ;;  %1520 = vmatmul.msk.bf16.vlgmr.msra.gmra.mxu1 %vm199_vm3, %v514_v54  ;;  %v636_v52 = vpack.c.bf16 %v621_v47, %v620_v46  ;;  %v673_v54 = vld [vmem:[#allocation24] sm:$0xff] }
 0x18d   :  { %1521 = vmatmul.msk.bf16.vlgmr.msra.gmra.mxu2 %vm199_vm3, %v512_v55  ;;  %v674_v55 = vld [vmem:[#allocation24 + $0x8] sm:$0xff] }
 0x18e   :  { %1522 = vmatmul.msk.bf16.vlgmr.msra.gmra.mxu3 %vm199_vm3, %v548_v56  ;;  %839 = vmatpush.bf16.msra.mxu2 %v672_v25  ;;  %v677_v56 = vpack.c.bf16 %v674_v55, %v673_v54 }
 0x18f   :  { %612 = vmatpush.bf16.msrb.mxu0 %v595_v40  ;;  %655 = vmatpush.bf16.msrb.mxu1 %v636_v52 }
 0x190   :  { %713 = vmatpush.bf16.msrb.mxu3 %v677_v56 }
 0x192   :  { %840 = vmatpush.bf16.msra.mxu2 %v671_v37 }
 0x193   :  { %613 = vmatpush.bf16.msrb.mxu0 %v594_v51  ;;  %1007 = vmatpush.bf16.msra.mxu1 %v678_v41 }
 0x194   :  { %859 = vmatpush.bf16.msra.mxu3 %v678_v41 }
 0x197   :  { %987 = vmatpush.bf16.msra.mxu0 %v672_v25  ;;  %1008 = vmatpush.bf16.msra.mxu1 %v677_v56 }
 0x198   :  { %860 = vmatpush.bf16.msra.mxu3 %v677_v56 }
 0x19b   :  { %988 = vmatpush.bf16.msra.mxu0 %v671_v37 }
 0x19d   :  { %1523 = vmatmul.msk.bf16.vlgmr.msrb.gmra.mxu2 %vm682_vm6, %v681_v50 }
 0x19e   :  { %1135 = vmatpush.bf16.msrb.mxu2 %v672_v25  ;;  %1524 = vmatmul.msk.bf16.vlgmr.msrb.gmra.mxu3 %vm682_vm6, %v702_v61 }
 0x19f   :  { %1155 = vmatpush.bf16.msrb.mxu3 %v678_v41 }
 0x1a2   :  { %1136 = vmatpush.bf16.msrb.mxu2 %v671_v37 }
 0x1a3   :  { %1156 = vmatpush.bf16.msrb.mxu3 %v677_v56 }
 0x1e1   :  { %v743_v58 = vpop.permute.xlu1 %742 }
 0x209   :  { %v527_v1 = vpop.f32.mrf.mxu1 }
 0x210   :  { %v543_v49 = vpop.f32.mrf.mxu2 }
 0x211   :  { %v544_v59 = vadd.f32 %v543_v49, %v527_v1  ;;  %v561_v60 = vpop.f32.mrf.mxu3  ;;  %v529_v62 = vpop.f32.mrf.mxu1 }
 0x212   :  { %v785_v62 = vpop.permute.xlu1 %784 }
 0x213   :  { %v565_v11 = vadd.f32 %v561_v60, %v544_v59 }
 0x215   :  { %v566_v12 = vadd.f32 %v1987_v53, %v565_v11 }
 0x217   :  { %v567_v45 = vmax.f32 %v566_v12, 0.0 }
 0x218   :  { %v545_v0 = vpop.f32.mrf.mxu2 }
 0x219   :  { %568 = vst [vmem:[#allocation5] sm:$0xff] %v567_v45  ;;  %v563_v3 = vpop.f32.mrf.mxu3 }
 0x220   :  { %v569_v4 = vld [vmem:[#allocation5] ss:$2 sm:$0xf]  ;;  %v570_v5 = vld [vmem:[#allocation5 + $0x1] ss:$2 sm:$0xf]  ;;  %v695_v53 = vpop.f32.mrf.mxu2 }
 0x221   :  { %v571_v6 = vmax.f32 %v569_v4, %v570_v5  ;;  %v715_v2 = vpop.f32.mrf.mxu3 }
 0x223   :  { %572 = vst [vmem:[#allocation6 + $0x1] sm:$0x1] %v571_v6 }
 0x224   :  { %573 = vst [vmem:[#allocation6 + $0x2] sm:$0x2] %v571_v6 }
 0x225   :  { %574 = vst [vmem:[#allocation6 + $0x3] sm:$0x4] %v571_v6 }
 0x226   :  { %575 = vst [vmem:[#allocation6 + $0x4] sm:$0x8] %v571_v6 }
 0x228   :  { %v697_v9 = vpop.f32.mrf.mxu2 }
 0x229   :  { %v717_v10 = vpop.f32.mrf.mxu3 }
 0x22d   :  { %v576_v7 = vld [vmem:[#allocation6] sm:$0xff] }
 0x22e   :  { %v577_v8 = vpack.c.bf16 %v576_v7, %v576_v7 }
 0x230   :  { %614 = vmatmul.bf16.vlgmr.msrb.gmra.mxu0 %v577_v8  ;;  %656 = vmatmul.bf16.vlgmr.msrb.gmra.mxu1 %v577_v8 }
 0x2ad   :  { %v615_v15 = vpop.f32.mrf.mxu0  ;;  %v657_v16 = vpop.f32.mrf.mxu1 }
 0x2ae   :  { %v616_v18 = vadd.f32 %v1560_v13, %v615_v15  ;;  %v658_v19 = vadd.f32 %v1561_v14, %v657_v16 }
 0x2b0   :  { %619 = vst [vmem:[#allocation7] sm:$0xff] %v616_v18 }
 0x2b1   :  { %661 = vst [vmem:[#allocation8] sm:$0xff] %v658_v19 }
 0x2b5   :  { %v617_v20 = vpop.f32.mrf.mxu0  ;;  %v659_v21 = vpop.f32.mrf.mxu1 }
 0x2b7   :  { %v679_v22 = vld [vmem:[#allocation7] sm:$0x3]  ;;  %v827_v16 = vld [vmem:[#allocation7 + $0x2] sm:$0x3] }
 0x2b8   :  { %v699_v17 = vadd.f32 %v695_v53, %v679_v22  ;;  %v700_v23 = vld [vmem:[#allocation8 + $0x6] sm:$0x3] }
 0x2b9   :  { %v719_v24 = vadd.f32 %v715_v2, %v700_v23 }
 0x2ba   :  { %1566 = vtanh.f32 %v699_v17  ;;  %v1525_v27 = vmul.f32 -1.442695, %v699_v17  ;;  %v847_v17 = vld [vmem:[#allocation8 + $0x4] sm:$0x3] }
 0x2bb   :  { %1568 = vtanh.f32 %v719_v24  ;;  %v1526_v28 = vmul.f32 -1.442695, %v719_v24 }
 0x2bc   :  { %1570 = vpow2.f32 %v1525_v27 }
 0x2bd   :  { %1572 = vpow2.f32 %v1526_v28 }
 0x2c0   :  { %v1567_v25 = vpop.eup %1566 }
 0x2c1   :  { %747 = vrot.lane.b32.xlu0 %v1567_v25, %s1801_s20  ;;  %v1569_v26 = vpop.eup %1568 }
 0x2c2   :  { %v1571_v29 = vpop.eup %1570 }
 0x2c3   :  { %v724_v30 = vadd.f32 1.0, %v1571_v29  ;;  %v1573_v31 = vpop.eup %1572 }
 0x2c4   :  { %v766_v32 = vadd.f32 1.0, %v1573_v31 }
 0x2c5   :  { %1574 = vrcp.f32 %v724_v30  ;;  %v736_v41 = vand.u32 2147483648, %v724_v30  ;;  %vm730_vm8 = vweird.f32 %v724_v30  ;;  %v734_v42 = vand.u32 2147483647, %v724_v30 }
 0x2c6   :  { %1576 = vrcp.f32 %v766_v32  ;;  %v778_v1 = vand.u32 2147483648, %v766_v32  ;;  %vm772_vm12 = vweird.f32 %v766_v32  ;;  %v776_v52 = vand.u32 2147483647, %v766_v32 }
 0x2c7   :  { %v737_v46 = vor.u32 1.1754944e-38, %v736_v41  ;;  %vm735_vm10 = vcmp.eq.f32.partialorder %v734_v42, 8.507059e+37 }
 0x2c8   :  { %v779_v55 = vor.u32 1.1754944e-38, %v778_v1  ;;  %vm777_vm14 = vcmp.eq.f32.partialorder %v776_v52, 8.507059e+37 }
 0x2c9   :  { %789 = vrot.lane.b32.xlu0 %v1569_v26, %s1801_s20 }
 0x2cb   :  { %v1575_v33 = vpop.eup %1574 }
 0x2cc   :  { %v726_v34 = vmul.f32 %v1575_v33, %v724_v30  ;;  %v1577_v36 = vpop.eup %1576  ;;  %vm731_vm7 = vweird.f32 %v1575_v33 }
 0x2cd   :  { %v768_v38 = vmul.f32 %v1577_v36, %v766_v32  ;;  %vm732_vm9 = vmor %vm730_vm8, %vm731_vm7  ;;  %vm773_vm11 = vweird.f32 %v1577_v36 }
 0x2ce   :  { %v727_v35 = vsub.f32 1.0, %v726_v34  ;;  %vm774_vm13 = vmor %vm772_vm12, %vm773_vm11 }
 0x2cf   :  { %v769_v40 = vsub.f32 1.0, %v768_v38 }
 0x2d0   :  { %v728_v37 = vmul.f32 %v1575_v33, %v727_v35 }
 0x2d1   :  { %v770_v44 = vmul.f32 %v1577_v36, %v769_v40 }
 0x2d2   :  { %v729_v39 = vadd.f32 %v1575_v33, %v728_v37 }
 0x2d3   :  { %v771_v50 = vadd.f32 %v1577_v36, %v770_v44 }
 0x2d4   :  { %v733_v43 = vsel %vm732_vm9, %v1575_v33, %v729_v39 }
 0x2d5   :  { %v738_v47 = vsel %vm735_vm10, %v737_v46, %v733_v43  ;;  %v775_v54 = vsel %vm774_vm13, %v1577_v36, %v771_v50 }
 0x2d6   :  { %v780_v56 = vsel %vm777_vm14, %v779_v55, %v775_v54  ;;  %v745_v59 = vmul.f32 %v743_v58, %v738_v47 }
 0x2d7   :  { %v787_v11 = vmul.f32 %v785_v62, %v780_v56 }
 0x333   :  { %v748_v48 = vpop.permute.xlu0 %747 }
 0x334   :  { %v750_v51 = vmul.f32 %v748_v48, %v738_v47 }
 0x336   :  { %752 = vrot.lane.b32.xlu2 %v750_v51, %s1800_s7 }
 0x33b   :  { %v790_v49 = vpop.permute.xlu0 %789 }
 0x33c   :  { %v792_v57 = vmul.f32 %v790_v49, %v780_v56 }
 0x33e   :  { %794 = vrot.lane.b32.xlu2 %v792_v57, %s1800_s7 }
 0x390   :  { %v753_v60 = vpop.permute.xlu2 %752 }
 0x391   :  { %v755_v61 = vadd.f32 %v753_v60, %v745_v59 }
 0x393   :  { %1578 = vtanh.f32 %v755_v61 }
 0x398   :  { %v795_v12 = vpop.permute.xlu2 %794 }
 0x399   :  { %v1579_v63 = vpop.eup %1578  ;;  %v797_v45 = vadd.f32 %v795_v12, %v787_v11 }
 0x39a   :  { %758 = vrot.lane.b32.xlu0 %v1579_v63, %s1801_s20 }
 0x39b   :  { %1580 = vtanh.f32 %v797_v45 }
 0x3a1   :  { %v1581_v0 = vpop.eup %1580 }
 0x3a2   :  { %800 = vrot.lane.b32.xlu1 %v1581_v0, %s1801_s20 }
 0x3aa   :  { %810 = vrot.lane.b32.xlu1 %v755_v61, %s1802_s9 }
 0x40c   :  { %v759_v3 = vpop.permute.xlu0 %758 }
 0x40d   :  { %v761_v4 = vmul.f32 %v759_v3, %v738_v47 }
 0x40f   :  { %805 = vrot.lane.b32.xlu2 %v761_v4, %s1800_s7 }
 0x414   :  { %v801_v5 = vpop.permute.xlu1 %800 }
 0x415   :  { %v803_v6 = vmul.f32 %v801_v5, %v780_v56 }
 0x417   :  { %815 = vrot.lane.b32.xlu0 %v803_v6, %s1800_s7  ;;  %820 = vrot.lane.b32.xlu2 %v797_v45, %s1802_s9 }
 0x41c   :  { %v811_v7 = vpop.permute.xlu1 %810 }
 0x41d   :  { %813 = vst.msk [vmem:[#allocation10] sm:$0x3] %vm662_vm5, %v811_v7 }
 0x424   :  { %v867_v8 = vld [vmem:[#allocation10] sm:$0x3] }
 0x425   :  { %889 = vrot.lane.b32.xlu2 %v867_v8, %s1800_s7 }
 0x469   :  { %v806_v53 = vpop.permute.xlu2 %805 }
 0x46a   :  { %808 = vst.msk [vmem:[#allocation9] sm:$0x3] %vm662_vm5, %v806_v53 }
 0x46b   :  { %824 = vst.msk [vmem:[#allocation13] sm:$0x3] %vm662_vm5, %v806_v53 }
 0x471   :  { %v821_v9 = vpop.permute.xlu2 %820  ;;  %v828_v2 = vld [vmem:[#allocation9] sm:$0x3] }
 0x472   :  { %823 = vst.msk [vmem:[#allocation12] sm:$0x3] %vm662_vm5, %v821_v9  ;;  %v829_v10 = vpack.c.bf16 %v828_v2, %v828_v2 }
 0x474   :  { %1527 = vmatmul.msk.bf16.vlgmr.msra.gmra.mxu2 %vm682_vm6, %v829_v10 }
 0x479   :  { %v909_v22 = vld [vmem:[#allocation12] sm:$0x3] }
 0x47f   :  { %v890_v58 = vpop.permute.xlu2 %889 }
 0x489   :  { %v816_v13 = vpop.permute.xlu0 %815 }
 0x48a   :  { %818 = vst.msk [vmem:[#allocation11] sm:$0x3] %vm662_vm5, %v816_v13 }
 0x48b   :  { %826 = vst.msk [vmem:[#allocation14 + $0x6] sm:$0x3] %vm662_vm5, %v816_v13 }
 0x491   :  { %v848_v14 = vld [vmem:[#allocation11] sm:$0x3] }
 0x492   :  { %v849_v15 = vpack.c.bf16 %v848_v14, %v848_v14 }
 0x494   :  { %1528 = vmatmul.msk.bf16.vlgmr.msra.gmra.mxu3 %vm682_vm6, %v849_v15 }
 0x4f7   :  { %v842_v18 = vpop.f32.mrf.mxu2 }
 0x4f8   :  { %v846_v19 = vadd.f32 %v842_v18, %v827_v16  ;;  %v975_v16 = vld [vmem:[#allocation7 + $0x4] sm:$0x3] }
 0x4fa   :  { %1582 = vtanh.f32 %v846_v19  ;;  %v1529_v27 = vmul.f32 -1.442695, %v846_v19 }
 0x4ff   :  { %v844_v20 = vpop.f32.mrf.mxu2 }
 0x500   :  { %v1583_v21 = vpop.eup %1582 }
 0x501   :  { %894 = vrot.lane.b32.xlu0 %v1583_v21, %s1801_s20 }
 0x509   :  { %931 = vrot.lane.b32.xlu0 %v909_v22, %s1800_s7 }
 0x517   :  { %v862_v23 = vpop.f32.mrf.mxu3 }
 0x518   :  { %v866_v24 = vadd.f32 %v862_v23, %v847_v17  ;;  %v995_v17 = vld [vmem:[#allocation8 + $0x2] sm:$0x3] }
 0x51a   :  { %1584 = vtanh.f32 %v866_v24  ;;  %v1530_v33 = vmul.f32 -1.442695, %v866_v24 }
 0x51b   :  { %1586 = vpow2.f32 %v1529_v27 }
 0x51f   :  { %v864_v25 = vpop.f32.mrf.mxu3 }
 0x520   :  { %v1585_v26 = vpop.eup %1584 }
 0x521   :  { %936 = vrot.lane.b32.xlu1 %v1585_v26, %s1801_s20  ;;  %v1587_v28 = vpop.eup %1586 }
 0x522   :  { %v871_v29 = vadd.f32 1.0, %v1587_v28 }
 0x524   :  { %1588 = vrcp.f32 %v871_v29  ;;  %v883_v36 = vand.u32 2147483648, %v871_v29  ;;  %vm877_vm0 = vweird.f32 %v871_v29  ;;  %v881_v37 = vand.u32 2147483647, %v871_v29 }
 0x525   :  { %1590 = vpow2.f32 %v1530_v33 }
 0x526   :  { %v884_v40 = vor.u32 1.1754944e-38, %v883_v36  ;;  %vm882_vm2 = vcmp.eq.f32.partialorder %v881_v37, 8.507059e+37 }
 0x52a   :  { %v1589_v30 = vpop.eup %1588 }
 0x52b   :  { %v873_v31 = vmul.f32 %v1589_v30, %v871_v29  ;;  %vm878_vm15 = vweird.f32 %v1589_v30  ;;  %v1591_v38 = vpop.eup %1590 }
 0x52c   :  { %vm879_vm1 = vmor %vm877_vm0, %vm878_vm15  ;;  %v913_v41 = vadd.f32 1.0, %v1591_v38 }
 0x52d   :  { %v874_v32 = vsub.f32 1.0, %v873_v31 }
 0x52e   :  { %1592 = vrcp.f32 %v913_v41  ;;  %v925_v1 = vand.u32 2147483648, %v913_v41  ;;  %vm919_vm7 = vweird.f32 %v913_v41  ;;  %v923_v52 = vand.u32 2147483647, %v913_v41 }
 0x52f   :  { %v875_v34 = vmul.f32 %v1589_v30, %v874_v32 }
 0x530   :  { %v926_v55 = vor.u32 1.1754944e-38, %v925_v1  ;;  %vm924_vm9 = vcmp.eq.f32.partialorder %v923_v52, 8.507059e+37 }
 0x531   :  { %v876_v35 = vadd.f32 %v1589_v30, %v875_v34 }
 0x533   :  { %v880_v39 = vsel %vm879_vm1, %v1589_v30, %v876_v35 }
 0x534   :  { %v885_v42 = vsel %vm882_vm2, %v884_v40, %v880_v39  ;;  %v1593_v46 = vpop.eup %1592 }
 0x535   :  { %v915_v47 = vmul.f32 %v1593_v46, %v913_v41  ;;  %vm920_vm4 = vweird.f32 %v1593_v46  ;;  %v892_v59 = vmul.f32 %v890_v58, %v885_v42 }
 0x536   :  { %vm921_vm8 = vmor %vm919_vm7, %vm920_vm4 }
 0x537   :  { %v916_v48 = vsub.f32 1.0, %v915_v47 }
 0x539   :  { %v917_v50 = vmul.f32 %v1593_v46, %v916_v48 }
 0x53b   :  { %v918_v51 = vadd.f32 %v1593_v46, %v917_v50 }
 0x53d   :  { %v922_v54 = vsel %vm921_vm8, %v1593_v46, %v918_v51 }
 0x53e   :  { %v927_v56 = vsel %vm924_vm9, %v926_v55, %v922_v54 }
 0x573   :  { %v895_v43 = vpop.permute.xlu0 %894 }
 0x574   :  { %v897_v44 = vmul.f32 %v895_v43, %v885_v42 }
 0x576   :  { %899 = vrot.lane.b32.xlu1 %v897_v44, %s1800_s7 }
 0x57b   :  { %v932_v62 = vpop.permute.xlu0 %931 }
 0x57c   :  { %v934_v11 = vmul.f32 %v932_v62, %v927_v56 }
 0x593   :  { %v937_v49 = vpop.permute.xlu1 %936 }
 0x594   :  { %v939_v57 = vmul.f32 %v937_v49, %v927_v56 }
 0x596   :  { %941 = vrot.lane.b32.xlu2 %v939_v57, %s1800_s7 }
 0x5e8   :  { %v900_v60 = vpop.permute.xlu1 %899 }
 0x5e9   :  { %v902_v61 = vadd.f32 %v900_v60, %v892_v59 }
 0x5eb   :  { %1594 = vtanh.f32 %v902_v61 }
 0x5f0   :  { %v942_v12 = vpop.permute.xlu2 %941 }
 0x5f1   :  { %v1595_v63 = vpop.eup %1594  ;;  %v944_v45 = vadd.f32 %v942_v12, %v934_v11 }
 0x5f2   :  { %905 = vrot.lane.b32.xlu0 %v1595_v63, %s1801_s20 }
 0x5f3   :  { %1596 = vtanh.f32 %v944_v45 }
 0x5f9   :  { %v1597_v0 = vpop.eup %1596 }
 0x5fa   :  { %947 = vrot.lane.b32.xlu1 %v1597_v0, %s1801_s20 }
 0x602   :  { %957 = vrot.lane.b32.xlu1 %v902_v61, %s1802_s9 }
 0x664   :  { %v906_v3 = vpop.permute.xlu0 %905 }
 0x665   :  { %v908_v4 = vmul.f32 %v906_v3, %v885_v42 }
 0x667   :  { %952 = vrot.lane.b32.xlu2 %v908_v4, %s1800_s7 }
 0x66c   :  { %v948_v5 = vpop.permute.xlu1 %947 }
 0x66d   :  { %v950_v6 = vmul.f32 %v948_v5, %v927_v56 }
 0x66f   :  { %962 = vrot.lane.b32.xlu0 %v950_v6, %s1800_s7  ;;  %967 = vrot.lane.b32.xlu2 %v944_v45, %s1802_s9 }
 0x674   :  { %v958_v7 = vpop.permute.xlu1 %957 }
 0x675   :  { %960 = vst.msk [vmem:[#allocation10] sm:$0x3] %vm662_vm5, %v958_v7 }
 0x67c   :  { %v1015_v8 = vld [vmem:[#allocation10] sm:$0x3] }
 0x67d   :  { %1037 = vrot.lane.b32.xlu2 %v1015_v8, %s1800_s7 }
 0x6c1   :  { %v953_v53 = vpop.permute.xlu2 %952 }
 0x6c2   :  { %955 = vst.msk [vmem:[#allocation9] sm:$0x3] %vm662_vm5, %v953_v53 }
 0x6c3   :  { %972 = vst.msk [vmem:[#allocation13 + $0x2] sm:$0x3] %vm662_vm5, %v953_v53 }
 0x6c9   :  { %v968_v9 = vpop.permute.xlu2 %967  ;;  %v976_v2 = vld [vmem:[#allocation9] sm:$0x3] }
 0x6ca   :  { %970 = vst.msk [vmem:[#allocation12] sm:$0x3] %vm662_vm5, %v968_v9  ;;  %v977_v10 = vpack.c.bf16 %v976_v2, %v976_v2 }
 0x6cc   :  { %1531 = vmatmul.msk.bf16.vlgmr.msra.gmra.mxu0 %vm682_vm6, %v977_v10 }
 0x6d1   :  { %v1057_v22 = vld [vmem:[#allocation12] sm:$0x3] }
 0x6d7   :  { %v1038_v58 = vpop.permute.xlu2 %1037 }
 0x6e1   :  { %v963_v13 = vpop.permute.xlu0 %962 }
 0x6e2   :  { %965 = vst.msk [vmem:[#allocation11] sm:$0x3] %vm662_vm5, %v963_v13 }
 0x6e3   :  { %974 = vst.msk [vmem:[#allocation14 + $0x4] sm:$0x3] %vm662_vm5, %v963_v13 }
 0x6e9   :  { %v996_v14 = vld [vmem:[#allocation11] sm:$0x3] }
 0x6ea   :  { %v997_v15 = vpack.c.bf16 %v996_v14, %v996_v14 }
 0x6ec   :  { %1532 = vmatmul.msk.bf16.vlgmr.msra.gmra.mxu1 %vm682_vm6, %v997_v15 }
 0x749   :  { %v990_v18 = vpop.f32.mrf.mxu0 }
 0x74a   :  { %v994_v19 = vadd.f32 %v990_v18, %v975_v16  ;;  %v1123_v16 = vld [vmem:[#allocation7 + $0x6] sm:$0x3] }
 0x74c   :  { %1598 = vtanh.f32 %v994_v19  ;;  %v1533_v27 = vmul.f32 -1.442695, %v994_v19 }
 0x751   :  { %v992_v20 = vpop.f32.mrf.mxu0 }
 0x752   :  { %v1599_v21 = vpop.eup %1598 }
 0x753   :  { %1042 = vrot.lane.b32.xlu0 %v1599_v21, %s1801_s20 }
 0x75b   :  { %1079 = vrot.lane.b32.xlu0 %v1057_v22, %s1800_s7 }
 0x769   :  { %v1010_v23 = vpop.f32.mrf.mxu1 }
 0x76a   :  { %v1014_v24 = vadd.f32 %v1010_v23, %v995_v17  ;;  %v1143_v17 = vld [vmem:[#allocation8] sm:$0x3] }
 0x76c   :  { %1600 = vtanh.f32 %v1014_v24  ;;  %v1534_v33 = vmul.f32 -1.442695, %v1014_v24 }
 0x76d   :  { %1602 = vpow2.f32 %v1533_v27 }
 0x771   :  { %v1012_v25 = vpop.f32.mrf.mxu1 }
 0x772   :  { %v1601_v26 = vpop.eup %1600 }
 0x773   :  { %1084 = vrot.lane.b32.xlu1 %v1601_v26, %s1801_s20  ;;  %v1603_v28 = vpop.eup %1602 }
 0x774   :  { %v1019_v29 = vadd.f32 1.0, %v1603_v28 }
 0x776   :  { %1604 = vrcp.f32 %v1019_v29  ;;  %v1031_v36 = vand.u32 2147483648, %v1019_v29  ;;  %vm1025_vm11 = vweird.f32 %v1019_v29  ;;  %v1029_v37 = vand.u32 2147483647, %v1019_v29 }
 0x777   :  { %1606 = vpow2.f32 %v1534_v33 }
 0x778   :  { %v1032_v40 = vor.u32 1.1754944e-38, %v1031_v36  ;;  %vm1030_vm13 = vcmp.eq.f32.partialorder %v1029_v37, 8.507059e+37 }
 0x77c   :  { %v1605_v30 = vpop.eup %1604 }
 0x77d   :  { %v1021_v31 = vmul.f32 %v1605_v30, %v1019_v29  ;;  %vm1026_vm10 = vweird.f32 %v1605_v30  ;;  %v1607_v38 = vpop.eup %1606 }
 0x77e   :  { %vm1027_vm12 = vmor %vm1025_vm11, %vm1026_vm10  ;;  %v1061_v41 = vadd.f32 1.0, %v1607_v38 }
 0x77f   :  { %v1022_v32 = vsub.f32 1.0, %v1021_v31 }
 0x780   :  { %1608 = vrcp.f32 %v1061_v41  ;;  %v1073_v1 = vand.u32 2147483648, %v1061_v41  ;;  %vm1067_vm15 = vweird.f32 %v1061_v41  ;;  %v1071_v52 = vand.u32 2147483647, %v1061_v41 }
 0x781   :  { %v1023_v34 = vmul.f32 %v1605_v30, %v1022_v32 }
 0x782   :  { %v1074_v55 = vor.u32 1.1754944e-38, %v1073_v1  ;;  %vm1072_vm1 = vcmp.eq.f32.partialorder %v1071_v52, 8.507059e+37 }
 0x783   :  { %v1024_v35 = vadd.f32 %v1605_v30, %v1023_v34 }
 0x785   :  { %v1028_v39 = vsel %vm1027_vm12, %v1605_v30, %v1024_v35 }
 0x786   :  { %v1033_v42 = vsel %vm1030_vm13, %v1032_v40, %v1028_v39  ;;  %v1609_v46 = vpop.eup %1608  ;;  %vm1329_vm13 = vcmask 1024  }
 0x787   :  { %v1063_v47 = vmul.f32 %v1609_v46, %v1061_v41  ;;  %vm1068_vm14 = vweird.f32 %v1609_v46  ;;  %v1040_v59 = vmul.f32 %v1038_v58, %v1033_v42 }
 0x788   :  { %vm1069_vm0 = vmor %vm1067_vm15, %vm1068_vm14 }
 0x789   :  { %v1064_v48 = vsub.f32 1.0, %v1063_v47 }
 0x78b   :  { %v1065_v50 = vmul.f32 %v1609_v46, %v1064_v48 }
 0x78d   :  { %v1066_v51 = vadd.f32 %v1609_v46, %v1065_v50 }
 0x78f   :  { %v1070_v54 = vsel %vm1069_vm0, %v1609_v46, %v1066_v51 }
 0x790   :  { %v1075_v56 = vsel %vm1072_vm1, %v1074_v55, %v1070_v54 }
 0x7c5   :  { %v1043_v43 = vpop.permute.xlu0 %1042 }
 0x7c6   :  { %v1045_v44 = vmul.f32 %v1043_v43, %v1033_v42 }
 0x7c8   :  { %1047 = vrot.lane.b32.xlu1 %v1045_v44, %s1800_s7 }
 0x7cd   :  { %v1080_v62 = vpop.permute.xlu0 %1079 }
 0x7ce   :  { %v1082_v11 = vmul.f32 %v1080_v62, %v1075_v56 }
 0x7e5   :  { %v1085_v49 = vpop.permute.xlu1 %1084 }
 0x7e6   :  { %v1087_v57 = vmul.f32 %v1085_v49, %v1075_v56 }
 0x7e8   :  { %1089 = vrot.lane.b32.xlu2 %v1087_v57, %s1800_s7 }
 0x83a   :  { %v1048_v60 = vpop.permute.xlu1 %1047 }
 0x83b   :  { %v1050_v61 = vadd.f32 %v1048_v60, %v1040_v59 }
 0x83d   :  { %1610 = vtanh.f32 %v1050_v61 }
 0x842   :  { %v1090_v12 = vpop.permute.xlu2 %1089 }
 0x843   :  { %v1611_v63 = vpop.eup %1610  ;;  %v1092_v45 = vadd.f32 %v1090_v12, %v1082_v11 }
 0x844   :  { %1053 = vrot.lane.b32.xlu0 %v1611_v63, %s1801_s20 }
 0x845   :  { %1612 = vtanh.f32 %v1092_v45 }
 0x84b   :  { %v1613_v0 = vpop.eup %1612 }
 0x84c   :  { %1095 = vrot.lane.b32.xlu1 %v1613_v0, %s1801_s20 }
 0x854   :  { %1105 = vrot.lane.b32.xlu1 %v1050_v61, %s1802_s9 }
 0x8b6   :  { %v1054_v3 = vpop.permute.xlu0 %1053 }
 0x8b7   :  { %v1056_v4 = vmul.f32 %v1054_v3, %v1033_v42  ;;  %v1562_v3 = vld [vmem:[%s2244_s11] ss:$0 sm:$0xff] }
 0x8b9   :  { %1100 = vrot.lane.b32.xlu2 %v1056_v4, %s1800_s7 }
 0x8be   :  { %v1096_v5 = vpop.permute.xlu1 %1095 }
 0x8bf   :  { %v1098_v6 = vmul.f32 %v1096_v5, %v1075_v56 }
 0x8c1   :  { %1110 = vrot.lane.b32.xlu0 %v1098_v6, %s1800_s7  ;;  %1115 = vrot.lane.b32.xlu2 %v1092_v45, %s1802_s9 }
 0x8c6   :  { %v1106_v7 = vpop.permute.xlu1 %1105 }
 0x8c7   :  { %1108 = vst.msk [vmem:[#allocation10] sm:$0x3] %vm662_vm5, %v1106_v7 }
 0x8ce   :  { %v1163_v8 = vld [vmem:[#allocation10] sm:$0x3] }
 0x8cf   :  { %1185 = vrot.lane.b32.xlu2 %v1163_v8, %s1800_s7 }
 0x913   :  { %v1101_v53 = vpop.permute.xlu2 %1100 }
 0x914   :  { %1103 = vst.msk [vmem:[#allocation9] sm:$0x3] %vm662_vm5, %v1101_v53 }
 0x915   :  { %1120 = vst.msk [vmem:[#allocation13 + $0x4] sm:$0x3] %vm662_vm5, %v1101_v53 }
 0x91b   :  { %v1116_v9 = vpop.permute.xlu2 %1115  ;;  %v1124_v2 = vld [vmem:[#allocation9] sm:$0x3] }
 0x91c   :  { %1118 = vst.msk [vmem:[#allocation12] sm:$0x3] %vm662_vm5, %v1116_v9  ;;  %v1125_v10 = vpack.c.bf16 %v1124_v2, %v1124_v2  ;;  %v2105_v4 = vld [vmem:[#allocation13 + $0x4] sm:$0x3] }
 0x91d   :  { %v1284_v5 = vmul.f32 %v1562_v3, %v2105_v4 }
 0x91e   :  { %1535 = vmatmul.msk.bf16.vlgmr.msrb.gmra.mxu2 %vm682_vm6, %v1125_v10  ;;  %v2111_v10 = vld [vmem:[#allocation14 + $0x4] sm:$0x3] }
 0x91f   :  { %v1292_v6 = vsel %vm662_vm5, %v1284_v5, 0.0 }
 0x923   :  { %v1205_v22 = vld [vmem:[#allocation12] sm:$0x3] }
 0x929   :  { %v1186_v58 = vpop.permute.xlu2 %1185 }
 0x933   :  { %v1111_v13 = vpop.permute.xlu0 %1110 }
 0x934   :  { %1113 = vst.msk [vmem:[#allocation11] sm:$0x3] %vm662_vm5, %v1111_v13 }
 0x935   :  { %1122 = vst.msk [vmem:[#allocation14 + $0x2] sm:$0x3] %vm662_vm5, %v1111_v13 }
 0x93b   :  { %v1144_v14 = vld [vmem:[#allocation11] sm:$0x3] }
 0x93c   :  { %v1145_v15 = vpack.c.bf16 %v1144_v14, %v1144_v14 }
 0x93e   :  { %1536 = vmatmul.msk.bf16.vlgmr.msrb.gmra.mxu3 %vm682_vm6, %v1145_v15  ;;  %v2115_v15 = vld [vmem:[#allocation13] sm:$0x3] }
 0x9a1   :  { %v1138_v18 = vpop.f32.mrf.mxu2 }
 0x9a2   :  { %v1142_v19 = vadd.f32 %v1138_v18, %v1123_v16  ;;  %v1282_v16 = vmul.f32 %v1562_v3, %v2115_v15 }
 0x9a4   :  { %1614 = vtanh.f32 %v1142_v19  ;;  %v1537_v27 = vmul.f32 -1.442695, %v1142_v19  ;;  %v1286_v18 = vsel %vm662_vm5, %v1282_v16, 0.0  ;;  %v2119_v19 = vld [vmem:[#allocation13 + $0x2] sm:$0x3] }
 0x9a9   :  { %v1140_v20 = vpop.f32.mrf.mxu2 }
 0x9aa   :  { %v1615_v21 = vpop.eup %1614  ;;  %v1283_v20 = vmul.f32 %v1562_v3, %v2119_v19 }
 0x9ab   :  { %1190 = vrot.lane.b32.xlu0 %v1615_v21, %s1801_s20 }
 0x9ac   :  { %v1289_v21 = vsel %vm662_vm5, %v1283_v20, 0.0 }
 0x9b3   :  { %1227 = vrot.lane.b32.xlu0 %v1205_v22, %s1800_s7  ;;  %v2123_v22 = vld [vmem:[#allocation14 + $0x2] sm:$0x3] }
 0x9c1   :  { %v1158_v23 = vpop.f32.mrf.mxu3 }
 0x9c2   :  { %v1162_v24 = vadd.f32 %v1158_v23, %v1143_v17 }
 0x9c4   :  { %1616 = vtanh.f32 %v1162_v24  ;;  %v1538_v33 = vmul.f32 -1.442695, %v1162_v24 }
 0x9c5   :  { %1618 = vpow2.f32 %v1537_v27 }
 0x9c9   :  { %v1160_v25 = vpop.f32.mrf.mxu3 }
 0x9ca   :  { %v1617_v26 = vpop.eup %1616 }
 0x9cb   :  { %1232 = vrot.lane.b32.xlu1 %v1617_v26, %s1801_s20  ;;  %v1619_v28 = vpop.eup %1618 }
 0x9cc   :  { %v1167_v29 = vadd.f32 1.0, %v1619_v28 }
 0x9ce   :  { %1620 = vrcp.f32 %v1167_v29  ;;  %v1179_v36 = vand.u32 2147483648, %v1167_v29  ;;  %vm1173_vm4 = vweird.f32 %v1167_v29  ;;  %v1177_v37 = vand.u32 2147483647, %v1167_v29 }
 0x9cf   :  { %1622 = vpow2.f32 %v1538_v33 }
 0x9d0   :  { %v1180_v40 = vor.u32 1.1754944e-38, %v1179_v36  ;;  %vm1178_vm8 = vcmp.eq.f32.partialorder %v1177_v37, 8.507059e+37 }
 0x9d4   :  { %v1621_v30 = vpop.eup %1620 }
 0x9d5   :  { %v1169_v31 = vmul.f32 %v1621_v30, %v1167_v29  ;;  %vm1174_vm2 = vweird.f32 %v1621_v30  ;;  %v1623_v38 = vpop.eup %1622 }
 0x9d6   :  { %vm1175_vm7 = vmor %vm1173_vm4, %vm1174_vm2  ;;  %v1209_v41 = vadd.f32 1.0, %v1623_v38 }
 0x9d7   :  { %v1170_v32 = vsub.f32 1.0, %v1169_v31 }
 0x9d8   :  { %1624 = vrcp.f32 %v1209_v41  ;;  %v1221_v1 = vand.u32 2147483648, %v1209_v41  ;;  %vm1215_vm10 = vweird.f32 %v1209_v41  ;;  %v1219_v52 = vand.u32 2147483647, %v1209_v41 }
 0x9d9   :  { %v1171_v34 = vmul.f32 %v1621_v30, %v1170_v32  ;;  %v2139_v32 = vld [vmem:[#allocation14 + $0x6] sm:$0x3] }
 0x9da   :  { %v1222_v55 = vor.u32 1.1754944e-38, %v1221_v1  ;;  %vm1220_vm12 = vcmp.eq.f32.partialorder %v1219_v52, 8.507059e+37 }
 0x9db   :  { %v1172_v35 = vadd.f32 %v1621_v30, %v1171_v34 }
 0x9dd   :  { %v1176_v39 = vsel %vm1175_vm7, %v1621_v30, %v1172_v35 }
 0x9de   :  { %v1181_v42 = vsel %vm1178_vm8, %v1180_v40, %v1176_v39  ;;  %v1625_v46 = vpop.eup %1624  ;;  %v1803_v40 = vmov 0  }
 0x9df   :  { %v1211_v47 = vmul.f32 %v1625_v46, %v1209_v41  ;;  %vm1216_vm9 = vweird.f32 %v1625_v46  ;;  %v1188_v59 = vmul.f32 %v1186_v58, %v1181_v42  ;;  %1557 = vset.pattern.permute.xlu2 %v1803_v40  ;;  %1556 = vset.pattern.permute.xlu1 %v1803_v40 }
 0x9e0   :  { %vm1217_vm11 = vmor %vm1215_vm10, %vm1216_vm9  ;;  %1555 = vset.pattern.permute.xlu0 %v1803_v40 }
 0x9e1   :  { %v1212_v48 = vsub.f32 1.0, %v1211_v47 }
 0x9e3   :  { %v1213_v50 = vmul.f32 %v1625_v46, %v1212_v48 }
 0x9e5   :  { %v1214_v51 = vadd.f32 %v1625_v46, %v1213_v50 }
 0x9e7   :  { %v1218_v54 = vsel %vm1217_vm11, %v1625_v46, %v1214_v51 }
 0x9e8   :  { %v1223_v56 = vsel %vm1220_vm12, %v1222_v55, %v1218_v54 }
 0xa1d   :  { %v1191_v43 = vpop.permute.xlu0 %1190 }
 0xa1e   :  { %v1193_v44 = vmul.f32 %v1191_v43, %v1181_v42 }
 0xa20   :  { %1195 = vrot.lane.b32.xlu1 %v1193_v44, %s1800_s7  ;;  %v1563_v44 = vld [vmem:[#allocation15] ss:$0 sm:$0xff] }
 0xa25   :  { %v1228_v62 = vpop.permute.xlu0 %1227 }
 0xa26   :  { %v1230_v11 = vmul.f32 %v1228_v62, %v1223_v56 }
 0xa3d   :  { %v1233_v49 = vpop.permute.xlu1 %1232 }
 0xa3e   :  { %v1235_v57 = vmul.f32 %v1233_v49, %v1223_v56 }
 0xa40   :  { %1237 = vrot.lane.b32.xlu2 %v1235_v57, %s1800_s7 }
 0xa92   :  { %v1196_v60 = vpop.permute.xlu1 %1195 }
 0xa93   :  { %v2093_v61 = vadd.f32 %v1196_v60, %v1188_v59 }
 0xa95   :  { %1626 = vtanh.f32 %v2093_v61 }
 0xa9a   :  { %v1238_v12 = vpop.permute.xlu2 %1237 }
 0xa9b   :  { %v1627_v63 = vpop.eup %1626  ;;  %v2096_v45 = vadd.f32 %v1238_v12, %v1230_v11 }
 0xa9c   :  { %1201 = vrot.lane.b32.xlu0 %v1627_v63, %s1801_s20 }
 0xa9d   :  { %1628 = vtanh.f32 %v2096_v45 }
 0xaa3   :  { %v1629_v0 = vpop.eup %1628 }
 0xaa4   :  { %1243 = vrot.lane.b32.xlu1 %v1629_v0, %s1801_s20 }
 0xaac   :  { %1298 = vrot.lane.b32.xlu1 %v1562_v3, %s1802_s9 }
 0xad6   :  { %1293 = vadd.xlane.f32.xlu1 %v1292_v6 }
 0xb0e   :  { %v1202_v7 = vpop.permute.xlu0 %1201 }
 0xb0f   :  { %v1204_v8 = vmul.f32 %v1202_v7, %v1181_v42 }
 0xb11   :  { %1248 = vrot.lane.b32.xlu2 %v1204_v8, %s1800_s7 }
 0xb16   :  { %v1244_v53 = vpop.permute.xlu1 %1243 }
 0xb17   :  { %v1246_v9 = vmul.f32 %v1244_v53, %v1223_v56 }
 0xb19   :  { %1258 = vrot.lane.b32.xlu0 %v1246_v9, %s1800_s7 }
 0xb1e   :  { %v1299_v2 = vpop.permute.xlu1 %1298 }
 0xb1f   :  { %v1303_v13 = vmul.f32 %v1299_v2, %v2111_v10  ;;  %v1302_v17 = vmul.f32 %v1299_v2, %v2123_v22  ;;  %v1304_v33 = vmul.f32 %v1299_v2, %v2139_v32 }
 0xb21   :  { %v1311_v14 = vsel %vm662_vm5, %v1303_v13, 0.0  ;;  %v1308_v23 = vsel %vm662_vm5, %v1302_v17, 0.0  ;;  %v1314_v34 = vsel %vm662_vm5, %v1304_v33, 0.0 }
 0xb22   :  { %1312 = vadd.xlane.f32.xlu1 %v1311_v14 }
 0xb3a   :  { %1287 = vadd.xlane.f32.xlu2 %v1286_v18 }
 0xb43   :  { %1290 = vadd.xlane.f32.xlu0 %v1289_v21 }
 0xb49   :  { %v1294_v38 = vpop.xlane.xlu1 %1293 }
 0xb4b   :  { %1309 = vadd.xlane.f32.xlu0 %v1308_v23 }
 0xb6b   :  { %v1249_v24 = vpop.permute.xlu2 %1248 }
 0xb6c   :  { %1251 = vst.msk [vmem:[#allocation9] sm:$0x3] %vm662_vm5, %v1249_v24 }
 0xb6d   :  { %1268 = vst.msk [vmem:[#allocation13 + $0x6] sm:$0x3] %vm662_vm5, %v1249_v24 }
 0xb74   :  { %v2129_v25 = vld [vmem:[#allocation13 + $0x6] sm:$0x3] }
 0xb75   :  { %v1285_v26 = vmul.f32 %v1562_v3, %v2129_v25 }
 0xb77   :  { %v1295_v27 = vsel %vm662_vm5, %v1285_v26, 0.0 }
 0xb78   :  { %1296 = vadd.xlane.f32.xlu2 %v1295_v27 }
 0xb8b   :  { %v1259_v28 = vpop.permute.xlu0 %1258 }
 0xb8c   :  { %1261 = vst.msk [vmem:[#allocation11] sm:$0x3] %vm662_vm5, %v1259_v28 }
 0xb8d   :  { %1269 = vst.msk [vmem:[#allocation14] sm:$0x3] %vm662_vm5, %v1259_v28  ;;  %v1409_v28 = vld [vmem:[%s2246_s13 + $0x30] sm:$0xff] }
 0xb94   :  { %v2135_v29 = vld [vmem:[#allocation14] sm:$0x3] }
 0xb95   :  { %v1301_v30 = vmul.f32 %v1299_v2, %v2135_v29  ;;  %v1313_v41 = vpop.xlane.xlu1 %1312 }
 0xb96   :  { %v1319_v46 = vadd.f32 %v1313_v41, %v1294_v38 }
 0xb97   :  { %v1305_v31 = vsel %vm662_vm5, %v1301_v30, 0.0  ;;  %v1410_v30 = vld [vmem:[%s2246_s13 + $0x38] sm:$0xff] }
 0xb98   :  { %1306 = vadd.xlane.f32.xlu2 %v1305_v31  ;;  %v1327_v51 = vadd.f32 %v1563_v44, %v1319_v46  ;;  %v1405_v31 = vld [vmem:[%s2246_s13 + $0x10] sm:$0xff]  ;;  %v1416_v33 = vpack.c.bf16 %v1410_v30, %v1409_v28 }
 0xb9a   :  { %v1332_v56 = vsel %vm1329_vm13, %v1327_v51, -inf  ;;  %1426 = vmatpush.bf16.msrb.mxu0 %v1416_v33 }
 0xba0   :  { %1315 = vadd.xlane.f32.xlu2 %v1314_v34 }
 0xbad   :  { %v1288_v35 = vpop.xlane.xlu2 %1287 }
 0xbb6   :  { %v1291_v36 = vpop.xlane.xlu0 %1290 }
 0xbbe   :  { %v1310_v42 = vpop.xlane.xlu0 %1309 }
 0xbbf   :  { %v1318_v47 = vadd.f32 %v1310_v42, %v1291_v36  ;;  %v1403_v36 = vld [vmem:[%s2246_s13] sm:$0xff]  ;;  %v1462_v42 = vld [vmem:[%s2248_s15 + $0x30] sm:$0xff] }
 0xbc1   :  { %v1326_v1 = vadd.f32 %v1563_v44, %v1318_v47  ;;  %v1461_v47 = vld [vmem:[%s2248_s15 + $0x28] sm:$0xff] }
 0xbc3   :  { %v1331_v49 = vsel %vm1329_vm13, %v1326_v1, -inf }
 0xbeb   :  { %v1297_v37 = vpop.xlane.xlu2 %1296 }
 0xc0b   :  { %v1307_v39 = vpop.xlane.xlu2 %1306 }
 0xc0c   :  { %v1317_v43 = vadd.f32 %v1307_v39, %v1288_v35  ;;  %v1408_v35 = vld [vmem:[%s2246_s13 + $0x28] sm:$0xff] }
 0xc0d   :  { %v1404_v39 = vld [vmem:[%s2246_s13 + $0x8] sm:$0xff] }
 0xc0e   :  { %v1325_v48 = vadd.f32 %v1563_v44, %v1317_v43  ;;  %v1412_v40 = vpack.c.bf16 %v1404_v39, %v1403_v36  ;;  %v1463_v43 = vld [vmem:[%s2248_s15 + $0x38] sm:$0xff] }
 0xc0f   :  { %v1467_v46 = vpack.c.bf16 %v1463_v43, %v1462_v42 }
 0xc10   :  { %v1330_v54 = vsel %vm1329_vm13, %v1325_v48, -inf }
 0xc11   :  { %v1334_v58 = vmax.f32 %v1330_v54, %v1331_v49  ;;  %1479 = vmatpush.bf16.msra.mxu2 %v1467_v46 }
 0xc13   :  { %v1316_v50 = vpop.xlane.xlu2 %1315 }
 0xc14   :  { %v1320_v52 = vadd.f32 %v1316_v50, %v1297_v37 }
 0xc16   :  { %v1328_v55 = vadd.f32 %v1563_v44, %v1320_v52  ;;  %v1460_v44 = vld [vmem:[%s2248_s15 + $0x20] sm:$0xff] }
 0xc18   :  { %v1333_v57 = vsel %vm1329_vm13, %v1328_v55, -inf }
 0xc19   :  { %v1335_v59 = vmax.f32 %v1332_v56, %v1333_v57 }
 0xc1b   :  { %v1336_v60 = vmax.f32 %v1334_v58, %v1335_v59 }
 0xc1d   :  { %v1337_v62 = vsub.f32 %v1325_v48, %v1336_v60  ;;  %v1338_v11 = vsub.f32 %v1326_v1, %v1336_v60  ;;  %v1340_v12 = vsub.f32 %v1328_v55, %v1336_v60  ;;  %v1339_v63 = vsub.f32 %v1327_v51, %v1336_v60 }
 0xc1e   :  { %v1466_v48 = vpack.c.bf16 %v1461_v47, %v1460_v44 }
 0xc1f   :  { %v1341_v0 = vmul.f32 1.442695, %v1337_v62  ;;  %v1343_v3 = vmul.f32 1.442695, %v1338_v11  ;;  %v1347_v5 = vmul.f32 1.442695, %v1340_v12 }
 0xc20   :  { %v1345_v6 = vmul.f32 1.442695, %v1339_v63  ;;  %1480 = vmatpush.bf16.msra.mxu2 %v1466_v48 }
 0xc21   :  { %1630 = vpow2.f32 %v1341_v0 }
 0xc22   :  { %1632 = vpow2.f32 %v1343_v3 }
 0xc23   :  { %1634 = vpow2.f32 %v1347_v5 }
 0xc24   :  { %1636 = vpow2.f32 %v1345_v6 }
 0xc27   :  { %v1631_v7 = vpop.eup %1630 }
 0xc28   :  { %v1633_v8 = vpop.eup %1632  ;;  %v1349_v53 = vsel %vm1329_vm13, %v1631_v7, 0.0 }
 0xc29   :  { %v1635_v9 = vpop.eup %1634  ;;  %v1350_v2 = vsel %vm1329_vm13, %v1633_v8, 0.0 }
 0xc2a   :  { %v1637_v13 = vpop.eup %1636  ;;  %v1351_v14 = vadd.f32 %v1350_v2, %v1349_v53  ;;  %v1354_v20 = vsel %vm1329_vm13, %v1635_v9, 0.0  ;;  %v1457_v2 = vld [vmem:[%s2248_s15 + $0x8] sm:$0xff] }
 0xc2b   :  { %v1352_v16 = vsel %vm1329_vm13, %v1637_v13, 0.0 }
 0xc2c   :  { %v1353_v18 = vadd.f32 %v1352_v16, %v1351_v14  ;;  %v1564_v14 = vld [vmem:[%s2247_s14] ss:$0 sm:$0xff]  ;;  %s1497_s14 = sshll.u32 %s2250_s17, 4  ;;  %s1498_s14 = int_to_ptr.hbm [resolvable:$true] %s1497_s14 }
 0xc2e   :  { %v1355_v21 = vadd.f32 %v1354_v20, %v1353_v18 }
 0xc30   :  { %1638 = vrcp.f32 %v1355_v21 }
 0xc36   :  { %v1639_v17 = vpop.eup %1638 }
 0xc37   :  { %v1359_v23 = vmul.f32 %v1639_v17, %v1637_v13  ;;  %v1358_v24 = vmul.f32 %v1639_v17, %v1633_v8  ;;  %v1357_v26 = vmul.f32 %v1639_v17, %v1631_v7  ;;  %v1360_v27 = vmul.f32 %v1639_v17, %v1635_v9  ;;  %v1456_v9 = vld [vmem:[%s2248_s15] sm:$0xff] }
 0xc38   :  { %v1464_v13 = vpack.c.bf16 %v1457_v2, %v1456_v9 }
 0xc39   :  { %1373 = vperm.xlu2 %1557, %v1359_v23   ;;  %1368 = vperm.xlu1 %1556, %v1358_v24  }
 0xc3a   :  { %1363 = vperm.xlu0 %1555, %v1357_v26  }
 0xc41   :  { %1253 = vrot.lane.b32.xlu2 %v2093_v61, %s1802_s9  ;;  %1378 = vperm.xlu1 %1556, %v1360_v27   ;;  %v1406_v61 = vld [vmem:[%s2246_s13 + $0x18] sm:$0xff]  ;;  %v1565_v27 = vld [vmem:[%s2249_s16] ss:$0 sm:$0xff] }
 0xc42   :  { %v1413_v34 = vpack.c.bf16 %v1406_v61, %v1405_v31 }
 0xc44   :  { %1442 = vmatpush.bf16.msrb.mxu1 %v1413_v34 }
 0xc48   :  { %1443 = vmatpush.bf16.msrb.mxu1 %v1412_v40 }
 0xc49   :  { %1263 = vrot.lane.b32.xlu1 %v2096_v45, %s1802_s9  ;;  %v1407_v45 = vld [vmem:[%s2246_s13 + $0x20] sm:$0xff] }
 0xc4a   :  { %v1415_v38 = vpack.c.bf16 %v1408_v35, %v1407_v45 }
 0xc4c   :  { %1427 = vmatpush.bf16.msrb.mxu0 %v1415_v38 }
 0xc93   :  { %v1374_v37 = vpop.permute.xlu2 %1373 }
 0xc94   :  { %v1383_v59 = vmul.f32 %v1374_v37, %v2105_v4  ;;  %v1394_v60 = vmul.f32 %v1374_v37, %v2111_v10 }
 0xc96   :  { %v1388_v11 = vsel %vm662_vm5, %v1383_v59, 0.0 }
 0xc9b   :  { %v1254_v41 = vpop.permute.xlu2 %1253 }
 0xc9c   :  { %1256 = vst.msk [vmem:[#allocation10] sm:$0x3] %vm662_vm5, %v1254_v41 }
 0xcab   :  { %v1369_v50 = vpop.permute.xlu1 %1368 }
 0xcac   :  { %v1382_v51 = vmul.f32 %v1369_v50, %v2119_v19  ;;  %v1393_v1 = vmul.f32 %v1369_v50, %v2123_v22  ;;  %v1364_v52 = vpop.permute.xlu0 %1363 }
 0xcad   :  { %v1381_v54 = vmul.f32 %v1364_v52, %v2115_v15  ;;  %v1392_v55 = vmul.f32 %v1364_v52, %v2135_v29  ;;  %v1399_v15 = vsel %vm662_vm5, %v1394_v60, 0.0 }
 0xcae   :  { %v1386_v56 = vsel %vm662_vm5, %v1382_v51, 0.0  ;;  %v1397_v49 = vsel %vm662_vm5, %v1393_v1, 0.0 }
 0xcaf   :  { %v1385_v57 = vsel %vm662_vm5, %v1381_v54, 0.0  ;;  %v1396_v58 = vsel %vm662_vm5, %v1392_v55, 0.0 }
 0xcb0   :  { %v1387_v19 = vadd.f32 %v1386_v56, %v1385_v57  ;;  %v1398_v62 = vadd.f32 %v1397_v49, %v1396_v58 }
 0xcb2   :  { %v1389_v63 = vadd.f32 %v1388_v11, %v1387_v19  ;;  %v1400_v0 = vadd.f32 %v1399_v15, %v1398_v62 }
 0xcb3   :  { %v1379_v22 = vpop.permute.xlu1 %1378 }
 0xcb4   :  { %v1384_v29 = vmul.f32 %v1379_v22, %v2129_v25  ;;  %v1395_v12 = vmul.f32 %v1379_v22, %v2139_v32  ;;  %v1458_v25 = vld [vmem:[%s2248_s15 + $0x10] sm:$0xff]  ;;  %v1459_v32 = vld [vmem:[%s2248_s15 + $0x18] sm:$0xff]  ;;  %s1804_s15 = smov [#allocation25]  }
 0xcb5   :  { %v1465_v53 = vpack.c.bf16 %v1459_v32, %v1458_v25  ;;  %s1495_s4 = sshll.u32 %s1804_s15, 4  ;;  %s1496_s4 = int_to_ptr.vmem [resolvable:$true] %s1495_s4 }
 0xcb6   :  { %v1390_v3 = vsel %vm662_vm5, %v1384_v29, 0.0  ;;  %v1401_v5 = vsel %vm662_vm5, %v1395_v12, 0.0 }
 0xcb7   :  { %v1391_v4 = vadd.f32 %v1390_v3, %v1389_v63  ;;  %v1402_v6 = vadd.f32 %v1401_v5, %v1400_v0  ;;  %1481 = vmatpush.bf16.msra.mxu2 %v1465_v53 }
 0xcb9   :  { %v1411_v10 = vpack.c.bf16 %v1391_v4, %v1391_v4  ;;  %v1414_v7 = vpack.c.bf16 %v1402_v6, %v1402_v6 }
 0xcbb   :  { %v1264_v8 = vpop.permute.xlu1 %1263  ;;  %1539 = vmatmul.msk.bf16.vlgmr.msrb.gmra.mxu0 %vm682_vm6, %v1414_v7  ;;  %1540 = vmatmul.msk.bf16.vlgmr.msrb.gmra.mxu1 %vm682_vm6, %v1411_v10 }
 0xcbc   :  { %1266 = vst.msk [vmem:[#allocation12] sm:$0x3] %vm662_vm5, %v1264_v8  ;;  %1482 = vmatpush.bf16.msra.mxu2 %v1464_v13  ;;  %vm1488_vm5 = vcmask 25600  }
 0xd38   :  { %v1429_v16 = vpop.f32.mrf.mxu0  ;;  %v1445_v18 = vpop.f32.mrf.mxu1 }
 0xd39   :  { %v1446_v20 = vadd.f32 %v1445_v18, %v1429_v16 }
 0xd3b   :  { %v1453_v21 = vadd.f32 %v1564_v14, %v1446_v20 }
 0xd3d   :  { %v1454_v17 = vmax.f32 %v1453_v21, 0.0 }
 0xd3f   :  { %v1455_v23 = vpack.c.bf16 %v1454_v17, %v1454_v17 }
 0xd40   :  { %v1431_v24 = vpop.f32.mrf.mxu0  ;;  %v1447_v26 = vpop.f32.mrf.mxu1 }
 0xd41   :  { %1541 = vmatmul.msk.bf16.vlgmr.msra.gmra.mxu2 %vm199_vm3, %v1455_v23 }
 0xdc4   :  { %v1484_v28 = vpop.f32.mrf.mxu2 }
 0xdc5   :  { %v1485_v30 = vadd.f32 %v1565_v27, %v1484_v28 }
 0xdc7   :  { %1489 = vst.msk [vmem:[#allocation25] sm:$0x3] %vm1488_vm5, %v1485_v30 }
 0xdc8   :  { %1500 = dma.vmem_to_hbm [thread:$0]  %s1496_s4, 32, %s1498_s14, [#allocation18]  }
 0xdcc   :  { %v1486_v31 = vpop.f32.mrf.mxu2 }
 0xdcd   :  { %1790 = dma.done.wait [#allocation18], 32  }
 0xdce   :  { %1791 = vsyncadd [#allocation18], 4294967264 }
 0xdcf   :  { %1505 = vsyncpa [#allocation17], 1 }
 0xdd0   :  { %1506 = vsyncpa [#allocation20], 1 }
 0xdd1   :  { %1507 = vsyncpa [#allocation23], 1 }
 0xdd2   :  { %1508 = vsyncpa [#allocation18], 1 }

</bundles_post_ra>
